<compile_context>
chip_gen: v7x
topology: tpu7x:2x2x1
jax: 0.10.0
libtpu: 0.0.40
codegen_flags: <defaults>
</compile_context>

<pallas_src>
import functools

import jax
import jax.numpy as jnp
import numpy as np
from jax.experimental import pallas as pl
from jax.experimental.pallas import tpu as pltpu


def _round_up(x, m):
    return (x + m - 1) // m * m


def _vmem_limit_bytes():
    """3/4 of per-core VMEM (fallback 48 MiB), capped at 96 MiB."""
    cap = 64 * 1024 * 1024
    try:
        get_info = getattr(pltpu, "get_tpu_info", None)
        if get_info is not None:
            cap = int(getattr(get_info(), "vmem_capacity_bytes", cap))
    except Exception:
        pass
    return int(min(cap * 3 // 4, 96 * 1024 * 1024))


def _double_conv_kernel(x_ref, w1_ref, b1_ref, w2_ref, b2_ref, mask_ref,
                        o_ref, mid_ref, *, h, wp2, rb):
    """Fused (3x3 conv -> folded-BN -> ReLU) x 2 for one batch image.

    Spatial layout: row-major flattened over a padded width `wp2` (multiple of 8),
    channels on lanes, so each 3x3 tap is a contiguous row-offset of the slab.

    x_ref:    (1, P_x, Cin_p)      zero-padded flattened input slab
    w1_ref:   (9, Cin_p, Cmid_p)   BN-folded conv1 weights, tap-major (ky*3+kx)
    b1_ref:   (1, Cmid_p)          BN-folded conv1 bias (f32)
    w2_ref:   (9, Cmid_p, Cout_p)  BN-folded conv2 weights
    b2_ref:   (1, Cout_p)          BN-folded conv2 bias (f32)
    mask_ref: (H*wp2, 1)           1.0 where the flattened column is a real output
    o_ref:    (1, H*wp2, Cout_p)   output slab (cols >= W are garbage, dropped)
    mid_ref:  VMEM (P_mid, Cmid_p) intermediate slab; row (f + 7) holds padded
                                   spatial position f, so band stores are 8-aligned.
    """
    cmid = w1_ref.shape[-1]
    p_mid = mid_ref.shape[0]

    # Zero only the halo strips of the intermediate slab; the interior rows are
    # fully rewritten by the band stores below (no full-scratch memset).
    head = wp2 + 8                    # top halo row (+ left halo of first row)
    tail = (h + 1) * wp2 + 8          # bottom halo row + tap over-reach rows
    mid_ref[pl.ds(0, head), :] = jnp.zeros((head, cmid), mid_ref.dtype)
    mid_ref[pl.ds(tail, p_mid - tail), :] = jnp.zeros((p_mid - tail, cmid),
                                                      mid_ref.dtype)

    b1 = b1_ref[...]
    b2 = b2_ref[...]

    def conv_band(load, w_ref, bias, y0, m):
        # 3x3 conv over one band of output rows: 9 contiguous-row-offset MXU
        # matmuls accumulated in registers (band sized so the f32 acc fits vregs).
        acc = jnp.zeros((m, w_ref.shape[-1]), jnp.float32)
        for ky in range(3):
            for kx in range(3):
                acc = acc + jnp.dot(load((y0 + ky) * wp2 + kx, m),
                                    w_ref[ky * 3 + kx],
                                    preferred_element_type=jnp.float32)
        return jnp.maximum(acc + bias, 0.0)

    # Pass 1: conv1 -> BN -> ReLU, kept in VMEM (never round-trips HBM).
    for y0 in range(0, h, rb):
        m = min(rb, h - y0) * wp2
        y1 = conv_band(lambda off, mm: x_ref[0, pl.ds(off, mm), :],
                       w1_ref, b1, y0, m)
        # Zero the garbage columns so conv2's left/right halo reads stay zero.
        y1 = y1 * mask_ref[pl.ds(y0 * wp2, m), :]
        mid_ref[pl.ds((y0 + 1) * wp2 + 8, m), :] = y1.astype(mid_ref.dtype)

    # Pass 2: conv2 -> BN -> ReLU -> output slab.
    for y0 in range(0, h, rb):
        m = min(rb, h - y0) * wp2
        y2 = conv_band(lambda off, mm: mid_ref[pl.ds(off + 7, mm), :],
                       w2_ref, b2, y0, m)
        o_ref[0, pl.ds(y0 * wp2, m), :] = y2.astype(o_ref.dtype)


def _fold_bn(w_oihw, gamma, beta, mean, var, eps):
    """Fold eval-mode BatchNorm into conv weights/bias. All math in f32."""
    w = w_oihw.astype(jnp.float32)
    scale = gamma.astype(jnp.float32) * jax.lax.rsqrt(var.astype(jnp.float32) + eps)
    w_f = w * scale[:, None, None, None]                        # (O, I, 3, 3)
    b_f = beta.astype(jnp.float32) - mean.astype(jnp.float32) * scale
    # Tap-major layout (ky*3+kx, I, O) so the kernel indexes one tap per matmul.
    w_t = jnp.transpose(w_f, (2, 3, 1, 0)).reshape(9, w.shape[1], w.shape[0])
    return w_t, b_f


@functools.partial(jax.jit, static_argnames=("eps", "compute_dtype"))
def double_conv(x, w1, bn1, w2, bn2, *, eps=1e-5, compute_dtype=jnp.bfloat16):
    """DoubleConv forward. x: (N, Cin, H, W); w*: (O, I, 3, 3); bn* = (g, b, mean, var)."""
    n, cin, h, w = x.shape
    cmid = w1.shape[0]
    cout = w2.shape[0]
    assert w1.shape[1:] == (cin, 3, 3) and w2.shape[1:] == (cmid, 3, 3), \
        "filter_size must be 3 (padding=1)"

    # Channel padding only to sublane multiples (8), not 128: keeps small-channel
    # HBM traffic small while staying layout-legal (full-extent last block dims).
    cin_p = _round_up(cin, 8)
    cmid_p = _round_up(cmid, 8)
    cout_p = _round_up(cout, 8)

    wp2 = _round_up(w + 2, 8)          # padded row stride (sublane aligned)
    p_real = (h + 2) * wp2             # flattened padded image rows
    p_x = p_real + 8                   # + tap over-reach rows (zero)
    p_mid = p_real + 16                # + tap over-reach rows (incl. +7 shift)
    m_cmp = h * wp2                    # output slab rows (cols >= w are garbage)

    # Band height so one band's f32 accumulator stays within ~64 KiB of vregs.
    rb = max(1, (64 * 1024) // (wp2 * max(cmid_p, cout_p) * 4))
    rb = min(rb, h)

    # Fold BN into conv weights/bias (f32), pad channels, cast to compute dtype.
    w1_t, b1_f = _fold_bn(w1, *bn1, eps)
    w2_t, b2_f = _fold_bn(w2, *bn2, eps)
    w1_p = jnp.zeros((9, cin_p, cmid_p), compute_dtype).at[:, :cin, :cmid].set(
        w1_t.astype(compute_dtype))
    w2_p = jnp.zeros((9, cmid_p, cout_p), compute_dtype).at[:, :cmid, :cout].set(
        w2_t.astype(compute_dtype))
    b1_p = jnp.zeros((1, cmid_p), jnp.float32).at[0, :cmid].set(b1_f)
    b2_p = jnp.zeros((1, cout_p), jnp.float32).at[0, :cout].set(b2_f)

    # NCHW -> flattened, zero-padded NHWC slab (N, P_x, Cin_p).
    x_nhwc = jnp.transpose(x, (0, 2, 3, 1)).astype(compute_dtype)
    x_pad = jnp.pad(x_nhwc, ((0, 0), (1, 1), (1, wp2 - w - 1), (0, cin_p - cin)))
    x_slab = jnp.pad(x_pad.reshape(n, p_real, cin_p),
                     ((0, 0), (0, p_x - p_real), (0, 0)))

    # Column-validity mask for the output slab (1.0 where col < w), trace-time const.
    col_mask = jnp.asarray(
        (np.arange(m_cmp) % wp2 < w).astype(np.float32).reshape(m_cmp, 1))

    kernel = functools.partial(_double_conv_kernel, h=h, wp2=wp2, rb=rb)

    out = pl.pallas_call(
        kernel,
        out_shape=jax.ShapeDtypeStruct((n, m_cmp, cout_p), x.dtype),
        grid=(n,),
        in_specs=[
            pl.BlockSpec((1, p_x, cin_p), lambda i: (i, 0, 0)),
            pl.BlockSpec((9, cin_p, cmid_p), lambda i: (0, 0, 0)),   # resident
            pl.BlockSpec((1, cmid_p), lambda i: (0, 0)),             # resident
            pl.BlockSpec((9, cmid_p, cout_p), lambda i: (0, 0, 0)),  # resident
            pl.BlockSpec((1, cout_p), lambda i: (0, 0)),             # resident
            pl.BlockSpec((m_cmp, 1), lambda i: (0, 0)),              # resident
        ],
        out_specs=pl.BlockSpec((1, m_cmp, cout_p), lambda i: (i, 0, 0)),
        scratch_shapes=[pltpu.VMEM((p_mid, cmid_p), compute_dtype)],
        compiler_params=pltpu.CompilerParams(
            dimension_semantics=("parallel",),
            vmem_limit_bytes=_vmem_limit_bytes(),
        ),
    )(x_slab, w1_p, b1_p, w2_p, b2_p, col_mask)

    # (N, H*wp2, Cout_p) -> NCHW, drop garbage columns and channel padding.
    out = out.reshape(n, h, wp2, cout_p)[:, :, :w, :cout]
    return jnp.transpose(out, (0, 3, 1, 2))


def _reference_double_conv(x, w1, bn1, w2, bn2, eps=1e-5):
    """Pure-JAX reference matching PyTorch DoubleConv (eval-mode BN)."""
    def stage(y, wgt, params):
        gamma, beta, mean, var = params
        y = jax.lax.conv_general_dilated(
            y, wgt, window_strides=(1, 1), padding=((1, 1), (1, 1)),
            dimension_numbers=("NCHW", "OIHW", "NCHW"))
        scale = gamma / jnp.sqrt(var + eps)
        y = y * scale[None, :, None, None] + (beta - mean * scale)[None, :, None, None]
        return jnp.maximum(y, 0.0)
    return stage(stage(x, w1, bn1), w2, bn2)


if __name__ == "__main__":
    key = jax.random.PRNGKey(0)
    n, cin, cout, h, w = 2, 4, 4, 16, 16  # DoubleConv(in_channels=4, out_channels=4, filter_size=3)
    ks = jax.random.split(key, 11)
    x = jax.random.normal(ks[0], (n, cin, h, w), jnp.float32)
    w1 = jax.random.normal(ks[1], (cout, cin, 3, 3), jnp.float32) * 0.2
    w2 = jax.random.normal(ks[2], (cout, cout, 3, 3), jnp.float32) * 0.2
    bn1 = (jax.random.normal(ks[3], (cout,)) * 0.1 + 1.0,      # gamma
           jax.random.normal(ks[4], (cout,)) * 0.1,            # beta
           jax.random.normal(ks[5], (cout,)) * 0.1,            # running_mean
           jax.random.uniform(ks[6], (cout,)) * 0.5 + 0.5)     # running_var
    bn2 = (jax.random.normal(ks[7], (cout,)) * 0.1 + 1.0,
           jax.random.normal(ks[8], (cout,)) * 0.1,
           jax.random.normal(ks[9], (cout,)) * 0.1,
           jax.random.uniform(ks[10], (cout,)) * 0.5 + 0.5)

    ref = _reference_double_conv(x, w1, bn1, w2, bn2)

    # bf16 compute path (production setting): loose tolerance.
    out_bf16 = jax.block_until_ready(
        double_conv(x, w1, bn1, w2, bn2, compute_dtype=jnp.bfloat16))
    assert out_bf16.shape == (n, cout, h, w), out_bf16.shape
    np.testing.assert_allclose(np.asarray(out_bf16), np.asarray(ref), rtol=0.1, atol=0.1)

    # f32 compute path: tight tolerance validates conv/BN/ReLU semantics exactly.
    out_f32 = jax.block_until_ready(
        double_conv(x, w1, bn1, w2, bn2, compute_dtype=jnp.float32))
    np.testing.assert_allclose(np.asarray(out_f32), np.asarray(ref), rtol=1e-4, atol=1e-4)

    print("KERNEL_OK")
</pallas_src>

<mosaic_0001>
module attributes {stable_mosaic.version = 11 : i64} {
  func.func @_double_conv_kernel(%arg0: i32, %arg1: memref<1x440x8xbf16, #tpu.memory_space<vmem>>, %arg2: memref<9x8x8xbf16, #tpu.memory_space<vmem>>, %arg3: memref<1x8xf32, #tpu.memory_space<vmem>>, %arg4: memref<9x8x8xbf16, #tpu.memory_space<vmem>>, %arg5: memref<1x8xf32, #tpu.memory_space<vmem>>, %arg6: memref<384x1xf32, #tpu.memory_space<vmem>>, %arg7: memref<1x384x8xf32, #tpu.memory_space<vmem>>, %arg8: memref<448x8xbf16, #tpu.memory_space<vmem>>) attributes {dimension_semantics = [#tpu.dimension_semantics<parallel>], iteration_bounds = array<i64: 2>, scalar_prefetch = 0 : i64, scratch_operands = 1 : i64, tpu.core_type = #tpu.core_type<tc>, window_params = [{transform_indices = @transform_0, window_bounds = array<i64: 1, 440, 8>}, {pipeline_mode = #tpu.pipeline_mode<synchronous>, transform_indices = @transform_1, window_bounds = array<i64: 9, 8, 8>}, {pipeline_mode = #tpu.pipeline_mode<synchronous>, transform_indices = @transform_2, window_bounds = array<i64: 1, 8>}, {pipeline_mode = #tpu.pipeline_mode<synchronous>, transform_indices = @transform_3, window_bounds = array<i64: 9, 8, 8>}, {pipeline_mode = #tpu.pipeline_mode<synchronous>, transform_indices = @transform_4, window_bounds = array<i64: 1, 8>}, {pipeline_mode = #tpu.pipeline_mode<synchronous>, transform_indices = @transform_5, window_bounds = array<i64: 384, 1>}, {transform_indices = @transform_6, window_bounds = array<i64: 1, 384, 8>}]} {
    %cst = arith.constant 0.000000e+00 : bf16
    %0 = vector.broadcast %cst : bf16 to vector<32x8xbf16>
    %c0 = arith.constant 0 : index
    %c0_0 = arith.constant 0 : index
    %1 = vector.load %arg8[%c0, %c0_0] : memref<448x8xbf16, #tpu.memory_space<vmem>>, vector<32x8xbf16>
    tpu.vector_store %arg8[%c0, %c0_0], %0 {strides = array<i32>} : memref<448x8xbf16, #tpu.memory_space<vmem>>, vector<32x8xbf16>,
    %cst_1 = arith.constant 0.000000e+00 : bf16
    %2 = vector.broadcast %cst_1 : bf16 to vector<32x8xbf16>
    %c416 = arith.constant 416 : index
    %c0_2 = arith.constant 0 : index
    %3 = vector.load %arg8[%c416, %c0_2] : memref<448x8xbf16, #tpu.memory_space<vmem>>, vector<32x8xbf16>
    tpu.vector_store %arg8[%c416, %c0_2], %2 {strides = array<i32>} : memref<448x8xbf16, #tpu.memory_space<vmem>>, vector<32x8xbf16>,
    %c0_3 = arith.constant 0 : index
    %c0_4 = arith.constant 0 : index
    %4 = vector.load %arg3[%c0_3, %c0_4] : memref<1x8xf32, #tpu.memory_space<vmem>>, vector<1x8xf32>
    %c0_5 = arith.constant 0 : index
    %c0_6 = arith.constant 0 : index
    %5 = vector.load %arg5[%c0_5, %c0_6] : memref<1x8xf32, #tpu.memory_space<vmem>>, vector<1x8xf32>
    %cst_7 = arith.constant 0.000000e+00 : f32
    %6 = vector.broadcast %cst_7 : f32 to vector<384x8xf32>
    %c0_8 = arith.constant 0 : index
    %c0_9 = arith.constant 0 : index
    %c0_10 = arith.constant 0 : index
    %7 = vector.load %arg1[%c0_8, %c0_9, %c0_10] : memref<1x440x8xbf16, #tpu.memory_space<vmem>>, vector<1x384x8xbf16>
    %8 = vector.shape_cast %7 : vector<1x384x8xbf16> to vector<384x8xbf16>
    %c0_11 = arith.constant 0 : index
    %c0_12 = arith.constant 0 : index
    %c0_13 = arith.constant 0 : index
    %9 = vector.load %arg2[%c0_11, %c0_12, %c0_13] : memref<9x8x8xbf16, #tpu.memory_space<vmem>>, vector<1x8x8xbf16>
    %10 = vector.shape_cast %9 : vector<1x8x8xbf16> to vector<8x8xbf16>
    %cst_14 = arith.constant dense<0.000000e+00> : vector<384x8xf32>
    %11 = tpu.matmul %8, %10, %cst_14 {dimension_numbers = #tpu.dot_dimension_numbers<[1], [0], [0], [1], [0, 0, 1, 1], [], []>} : vector<384x8xbf16>, vector<8x8xbf16>, vector<384x8xf32> -> vector<384x8xf32>
    %12 = arith.addf %6, %11 : vector<384x8xf32>
    %c0_15 = arith.constant 0 : index
    %c1 = arith.constant 1 : index
    %c0_16 = arith.constant 0 : index
    %13 = vector.load %arg1[%c0_15, %c1, %c0_16] : memref<1x440x8xbf16, #tpu.memory_space<vmem>>, vector<1x384x8xbf16>
    %14 = vector.shape_cast %13 : vector<1x384x8xbf16> to vector<384x8xbf16>
    %c1_17 = arith.constant 1 : index
    %c0_18 = arith.constant 0 : index
    %c0_19 = arith.constant 0 : index
    %15 = vector.load %arg2[%c1_17, %c0_18, %c0_19] : memref<9x8x8xbf16, #tpu.memory_space<vmem>>, vector<1x8x8xbf16>
    %16 = vector.shape_cast %15 : vector<1x8x8xbf16> to vector<8x8xbf16>
    %cst_20 = arith.constant dense<0.000000e+00> : vector<384x8xf32>
    %17 = tpu.matmul %14, %16, %cst_20 {dimension_numbers = #tpu.dot_dimension_numbers<[1], [0], [0], [1], [0, 0, 1, 1], [], []>} : vector<384x8xbf16>, vector<8x8xbf16>, vector<384x8xf32> -> vector<384x8xf32>
    %18 = arith.addf %12, %17 : vector<384x8xf32>
    %c0_21 = arith.constant 0 : index
    %c2 = arith.constant 2 : index
    %c0_22 = arith.constant 0 : index
    %19 = vector.load %arg1[%c0_21, %c2, %c0_22] : memref<1x440x8xbf16, #tpu.memory_space<vmem>>, vector<1x384x8xbf16>
    %20 = vector.shape_cast %19 : vector<1x384x8xbf16> to vector<384x8xbf16>
    %c2_23 = arith.constant 2 : index
    %c0_24 = arith.constant 0 : index
    %c0_25 = arith.constant 0 : index
    %21 = vector.load %arg2[%c2_23, %c0_24, %c0_25] : memref<9x8x8xbf16, #tpu.memory_space<vmem>>, vector<1x8x8xbf16>
    %22 = vector.shape_cast %21 : vector<1x8x8xbf16> to vector<8x8xbf16>
    %cst_26 = arith.constant dense<0.000000e+00> : vector<384x8xf32>
    %23 = tpu.matmul %20, %22, %cst_26 {dimension_numbers = #tpu.dot_dimension_numbers<[1], [0], [0], [1], [0, 0, 1, 1], [], []>} : vector<384x8xbf16>, vector<8x8xbf16>, vector<384x8xf32> -> vector<384x8xf32>
    %24 = arith.addf %18, %23 : vector<384x8xf32>
    %c0_27 = arith.constant 0 : index
    %c24 = arith.constant 24 : index
    %c0_28 = arith.constant 0 : index
    %25 = vector.load %arg1[%c0_27, %c24, %c0_28] : memref<1x440x8xbf16, #tpu.memory_space<vmem>>, vector<1x384x8xbf16>
    %26 = vector.shape_cast %25 : vector<1x384x8xbf16> to vector<384x8xbf16>
    %c3 = arith.constant 3 : index
    %c0_29 = arith.constant 0 : index
    %c0_30 = arith.constant 0 : index
    %27 = vector.load %arg2[%c3, %c0_29, %c0_30] : memref<9x8x8xbf16, #tpu.memory_space<vmem>>, vector<1x8x8xbf16>
    %28 = vector.shape_cast %27 : vector<1x8x8xbf16> to vector<8x8xbf16>
    %cst_31 = arith.constant dense<0.000000e+00> : vector<384x8xf32>
    %29 = tpu.matmul %26, %28, %cst_31 {dimension_numbers = #tpu.dot_dimension_numbers<[1], [0], [0], [1], [0, 0, 1, 1], [], []>} : vector<384x8xbf16>, vector<8x8xbf16>, vector<384x8xf32> -> vector<384x8xf32>
    %30 = arith.addf %24, %29 : vector<384x8xf32>
    %c0_32 = arith.constant 0 : index
    %c25 = arith.constant 25 : index
    %c0_33 = arith.constant 0 : index
    %31 = vector.load %arg1[%c0_32, %c25, %c0_33] : memref<1x440x8xbf16, #tpu.memory_space<vmem>>, vector<1x384x8xbf16>
    %32 = vector.shape_cast %31 : vector<1x384x8xbf16> to vector<384x8xbf16>
    %c4 = arith.constant 4 : index
    %c0_34 = arith.constant 0 : index
    %c0_35 = arith.constant 0 : index
    %33 = vector.load %arg2[%c4, %c0_34, %c0_35] : memref<9x8x8xbf16, #tpu.memory_space<vmem>>, vector<1x8x8xbf16>
    %34 = vector.shape_cast %33 : vector<1x8x8xbf16> to vector<8x8xbf16>
    %cst_36 = arith.constant dense<0.000000e+00> : vector<384x8xf32>
    %35 = tpu.matmul %32, %34, %cst_36 {dimension_numbers = #tpu.dot_dimension_numbers<[1], [0], [0], [1], [0, 0, 1, 1], [], []>} : vector<384x8xbf16>, vector<8x8xbf16>, vector<384x8xf32> -> vector<384x8xf32>
    %36 = arith.addf %30, %35 : vector<384x8xf32>
    %c0_37 = arith.constant 0 : index
    %c26 = arith.constant 26 : index
    %c0_38 = arith.constant 0 : index
    %37 = vector.load %arg1[%c0_37, %c26, %c0_38] : memref<1x440x8xbf16, #tpu.memory_space<vmem>>, vector<1x384x8xbf16>
    %38 = vector.shape_cast %37 : vector<1x384x8xbf16> to vector<384x8xbf16>
    %c5 = arith.constant 5 : index
    %c0_39 = arith.constant 0 : index
    %c0_40 = arith.constant 0 : index
    %39 = vector.load %arg2[%c5, %c0_39, %c0_40] : memref<9x8x8xbf16, #tpu.memory_space<vmem>>, vector<1x8x8xbf16>
    %40 = vector.shape_cast %39 : vector<1x8x8xbf16> to vector<8x8xbf16>
    %cst_41 = arith.constant dense<0.000000e+00> : vector<384x8xf32>
    %41 = tpu.matmul %38, %40, %cst_41 {dimension_numbers = #tpu.dot_dimension_numbers<[1], [0], [0], [1], [0, 0, 1, 1], [], []>} : vector<384x8xbf16>, vector<8x8xbf16>, vector<384x8xf32> -> vector<384x8xf32>
    %42 = arith.addf %36, %41 : vector<384x8xf32>
    %c0_42 = arith.constant 0 : index
    %c48 = arith.constant 48 : index
    %c0_43 = arith.constant 0 : index
    %43 = vector.load %arg1[%c0_42, %c48, %c0_43] : memref<1x440x8xbf16, #tpu.memory_space<vmem>>, vector<1x384x8xbf16>
    %44 = vector.shape_cast %43 : vector<1x384x8xbf16> to vector<384x8xbf16>
    %c6 = arith.constant 6 : index
    %c0_44 = arith.constant 0 : index
    %c0_45 = arith.constant 0 : index
    %45 = vector.load %arg2[%c6, %c0_44, %c0_45] : memref<9x8x8xbf16, #tpu.memory_space<vmem>>, vector<1x8x8xbf16>
    %46 = vector.shape_cast %45 : vector<1x8x8xbf16> to vector<8x8xbf16>
    %cst_46 = arith.constant dense<0.000000e+00> : vector<384x8xf32>
    %47 = tpu.matmul %44, %46, %cst_46 {dimension_numbers = #tpu.dot_dimension_numbers<[1], [0], [0], [1], [0, 0, 1, 1], [], []>} : vector<384x8xbf16>, vector<8x8xbf16>, vector<384x8xf32> -> vector<384x8xf32>
    %48 = arith.addf %42, %47 : vector<384x8xf32>
    %c0_47 = arith.constant 0 : index
    %c49 = arith.constant 49 : index
    %c0_48 = arith.constant 0 : index
    %49 = vector.load %arg1[%c0_47, %c49, %c0_48] : memref<1x440x8xbf16, #tpu.memory_space<vmem>>, vector<1x384x8xbf16>
    %50 = vector.shape_cast %49 : vector<1x384x8xbf16> to vector<384x8xbf16>
    %c7 = arith.constant 7 : index
    %c0_49 = arith.constant 0 : index
    %c0_50 = arith.constant 0 : index
    %51 = vector.load %arg2[%c7, %c0_49, %c0_50] : memref<9x8x8xbf16, #tpu.memory_space<vmem>>, vector<1x8x8xbf16>
    %52 = vector.shape_cast %51 : vector<1x8x8xbf16> to vector<8x8xbf16>
    %cst_51 = arith.constant dense<0.000000e+00> : vector<384x8xf32>
    %53 = tpu.matmul %50, %52, %cst_51 {dimension_numbers = #tpu.dot_dimension_numbers<[1], [0], [0], [1], [0, 0, 1, 1], [], []>} : vector<384x8xbf16>, vector<8x8xbf16>, vector<384x8xf32> -> vector<384x8xf32>
    %54 = arith.addf %48, %53 : vector<384x8xf32>
    %c0_52 = arith.constant 0 : index
    %c50 = arith.constant 50 : index
    %c0_53 = arith.constant 0 : index
    %55 = vector.load %arg1[%c0_52, %c50, %c0_53] : memref<1x440x8xbf16, #tpu.memory_space<vmem>>, vector<1x384x8xbf16>
    %56 = vector.shape_cast %55 : vector<1x384x8xbf16> to vector<384x8xbf16>
    %c8 = arith.constant 8 : index
    %c0_54 = arith.constant 0 : index
    %c0_55 = arith.constant 0 : index
    %57 = vector.load %arg2[%c8, %c0_54, %c0_55] : memref<9x8x8xbf16, #tpu.memory_space<vmem>>, vector<1x8x8xbf16>
    %58 = vector.shape_cast %57 : vector<1x8x8xbf16> to vector<8x8xbf16>
    %cst_56 = arith.constant dense<0.000000e+00> : vector<384x8xf32>
    %59 = tpu.matmul %56, %58, %cst_56 {dimension_numbers = #tpu.dot_dimension_numbers<[1], [0], [0], [1], [0, 0, 1, 1], [], []>} : vector<384x8xbf16>, vector<8x8xbf16>, vector<384x8xf32> -> vector<384x8xf32>
    %60 = arith.addf %54, %59 : vector<384x8xf32>
    %61 = vector.broadcast %4 : vector<1x8xf32> to vector<384x8xf32>
    %62 = arith.addf %60, %61 : vector<384x8xf32>
    %cst_57 = arith.constant 0.000000e+00 : f32
    %63 = vector.broadcast %cst_57 : f32 to vector<384x8xf32>
    %64 = arith.maximumf %62, %63 : vector<384x8xf32>
    %c0_58 = arith.constant 0 : index
    %c0_59 = arith.constant 0 : index
    %65 = vector.load %arg6[%c0_58, %c0_59] : memref<384x1xf32, #tpu.memory_space<vmem>>, vector<384x1xf32>
    %66 = vector.broadcast %65 : vector<384x1xf32> to vector<384x8xf32>
    %67 = arith.mulf %64, %66 : vector<384x8xf32>
    %68 = arith.truncf %67 : vector<384x8xf32> to vector<384x8xbf16>
    %c32 = arith.constant 32 : index
    %c0_60 = arith.constant 0 : index
    %69 = vector.load %arg8[%c32, %c0_60] : memref<448x8xbf16, #tpu.memory_space<vmem>>, vector<384x8xbf16>
    tpu.vector_store %arg8[%c32, %c0_60], %68 {strides = array<i32>} : memref<448x8xbf16, #tpu.memory_space<vmem>>, vector<384x8xbf16>,
    %cst_61 = arith.constant 0.000000e+00 : f32
    %70 = vector.broadcast %cst_61 : f32 to vector<384x8xf32>
    %c7_62 = arith.constant 7 : index
    %c0_63 = arith.constant 0 : index
    %71 = vector.load %arg8[%c7_62, %c0_63] : memref<448x8xbf16, #tpu.memory_space<vmem>>, vector<384x8xbf16>
    %c0_64 = arith.constant 0 : index
    %c0_65 = arith.constant 0 : index
    %c0_66 = arith.constant 0 : index
    %72 = vector.load %arg4[%c0_64, %c0_65, %c0_66] : memref<9x8x8xbf16, #tpu.memory_space<vmem>>, vector<1x8x8xbf16>
    %73 = vector.shape_cast %72 : vector<1x8x8xbf16> to vector<8x8xbf16>
    %cst_67 = arith.constant dense<0.000000e+00> : vector<384x8xf32>
    %74 = tpu.matmul %71, %73, %cst_67 {dimension_numbers = #tpu.dot_dimension_numbers<[1], [0], [0], [1], [0, 0, 1, 1], [], []>} : vector<384x8xbf16>, vector<8x8xbf16>, vector<384x8xf32> -> vector<384x8xf32>
    %75 = arith.addf %70, %74 : vector<384x8xf32>
    %c8_68 = arith.constant 8 : index
    %c0_69 = arith.constant 0 : index
    %76 = vector.load %arg8[%c8_68, %c0_69] : memref<448x8xbf16, #tpu.memory_space<vmem>>, vector<384x8xbf16>
    %c1_70 = arith.constant 1 : index
    %c0_71 = arith.constant 0 : index
    %c0_72 = arith.constant 0 : index
    %77 = vector.load %arg4[%c1_70, %c0_71, %c0_72] : memref<9x8x8xbf16, #tpu.memory_space<vmem>>, vector<1x8x8xbf16>
    %78 = vector.shape_cast %77 : vector<1x8x8xbf16> to vector<8x8xbf16>
    %cst_73 = arith.constant dense<0.000000e+00> : vector<384x8xf32>
    %79 = tpu.matmul %76, %78, %cst_73 {dimension_numbers = #tpu.dot_dimension_numbers<[1], [0], [0], [1], [0, 0, 1, 1], [], []>} : vector<384x8xbf16>, vector<8x8xbf16>, vector<384x8xf32> -> vector<384x8xf32>
    %80 = arith.addf %75, %79 : vector<384x8xf32>
    %c9 = arith.constant 9 : index
    %c0_74 = arith.constant 0 : index
    %81 = vector.load %arg8[%c9, %c0_74] : memref<448x8xbf16, #tpu.memory_space<vmem>>, vector<384x8xbf16>
    %c2_75 = arith.constant 2 : index
    %c0_76 = arith.constant 0 : index
    %c0_77 = arith.constant 0 : index
    %82 = vector.load %arg4[%c2_75, %c0_76, %c0_77] : memref<9x8x8xbf16, #tpu.memory_space<vmem>>, vector<1x8x8xbf16>
    %83 = vector.shape_cast %82 : vector<1x8x8xbf16> to vector<8x8xbf16>
    %cst_78 = arith.constant dense<0.000000e+00> : vector<384x8xf32>
    %84 = tpu.matmul %81, %83, %cst_78 {dimension_numbers = #tpu.dot_dimension_numbers<[1], [0], [0], [1], [0, 0, 1, 1], [], []>} : vector<384x8xbf16>, vector<8x8xbf16>, vector<384x8xf32> -> vector<384x8xf32>
    %85 = arith.addf %80, %84 : vector<384x8xf32>
    %c31 = arith.constant 31 : index
    %c0_79 = arith.constant 0 : index
    %86 = vector.load %arg8[%c31, %c0_79] : memref<448x8xbf16, #tpu.memory_space<vmem>>, vector<384x8xbf16>
    %c3_80 = arith.constant 3 : index
    %c0_81 = arith.constant 0 : index
    %c0_82 = arith.constant 0 : index
    %87 = vector.load %arg4[%c3_80, %c0_81, %c0_82] : memref<9x8x8xbf16, #tpu.memory_space<vmem>>, vector<1x8x8xbf16>
    %88 = vector.shape_cast %87 : vector<1x8x8xbf16> to vector<8x8xbf16>
    %cst_83 = arith.constant dense<0.000000e+00> : vector<384x8xf32>
    %89 = tpu.matmul %86, %88, %cst_83 {dimension_numbers = #tpu.dot_dimension_numbers<[1], [0], [0], [1], [0, 0, 1, 1], [], []>} : vector<384x8xbf16>, vector<8x8xbf16>, vector<384x8xf32> -> vector<384x8xf32>
    %90 = arith.addf %85, %89 : vector<384x8xf32>
    %c32_84 = arith.constant 32 : index
    %c0_85 = arith.constant 0 : index
    %91 = vector.load %arg8[%c32_84, %c0_85] : memref<448x8xbf16, #tpu.memory_space<vmem>>, vector<384x8xbf16>
    %c4_86 = arith.constant 4 : index
    %c0_87 = arith.constant 0 : index
    %c0_88 = arith.constant 0 : index
    %92 = vector.load %arg4[%c4_86, %c0_87, %c0_88] : memref<9x8x8xbf16, #tpu.memory_space<vmem>>, vector<1x8x8xbf16>
    %93 = vector.shape_cast %92 : vector<1x8x8xbf16> to vector<8x8xbf16>
    %cst_89 = arith.constant dense<0.000000e+00> : vector<384x8xf32>
    %94 = tpu.matmul %91, %93, %cst_89 {dimension_numbers = #tpu.dot_dimension_numbers<[1], [0], [0], [1], [0, 0, 1, 1], [], []>} : vector<384x8xbf16>, vector<8x8xbf16>, vector<384x8xf32> -> vector<384x8xf32>
    %95 = arith.addf %90, %94 : vector<384x8xf32>
    %c33 = arith.constant 33 : index
    %c0_90 = arith.constant 0 : index
    %96 = vector.load %arg8[%c33, %c0_90] : memref<448x8xbf16, #tpu.memory_space<vmem>>, vector<384x8xbf16>
    %c5_91 = arith.constant 5 : index
    %c0_92 = arith.constant 0 : index
    %c0_93 = arith.constant 0 : index
    %97 = vector.load %arg4[%c5_91, %c0_92, %c0_93] : memref<9x8x8xbf16, #tpu.memory_space<vmem>>, vector<1x8x8xbf16>
    %98 = vector.shape_cast %97 : vector<1x8x8xbf16> to vector<8x8xbf16>
    %cst_94 = arith.constant dense<0.000000e+00> : vector<384x8xf32>
    %99 = tpu.matmul %96, %98, %cst_94 {dimension_numbers = #tpu.dot_dimension_numbers<[1], [0], [0], [1], [0, 0, 1, 1], [], []>} : vector<384x8xbf16>, vector<8x8xbf16>, vector<384x8xf32> -> vector<384x8xf32>
    %100 = arith.addf %95, %99 : vector<384x8xf32>
    %c55 = arith.constant 55 : index
    %c0_95 = arith.constant 0 : index
    %101 = vector.load %arg8[%c55, %c0_95] : memref<448x8xbf16, #tpu.memory_space<vmem>>, vector<384x8xbf16>
    %c6_96 = arith.constant 6 : index
    %c0_97 = arith.constant 0 : index
    %c0_98 = arith.constant 0 : index
    %102 = vector.load %arg4[%c6_96, %c0_97, %c0_98] : memref<9x8x8xbf16, #tpu.memory_space<vmem>>, vector<1x8x8xbf16>
    %103 = vector.shape_cast %102 : vector<1x8x8xbf16> to vector<8x8xbf16>
    %cst_99 = arith.constant dense<0.000000e+00> : vector<384x8xf32>
    %104 = tpu.matmul %101, %103, %cst_99 {dimension_numbers = #tpu.dot_dimension_numbers<[1], [0], [0], [1], [0, 0, 1, 1], [], []>} : vector<384x8xbf16>, vector<8x8xbf16>, vector<384x8xf32> -> vector<384x8xf32>
    %105 = arith.addf %100, %104 : vector<384x8xf32>
    %c56 = arith.constant 56 : index
    %c0_100 = arith.constant 0 : index
    %106 = vector.load %arg8[%c56, %c0_100] : memref<448x8xbf16, #tpu.memory_space<vmem>>, vector<384x8xbf16>
    %c7_101 = arith.constant 7 : index
    %c0_102 = arith.constant 0 : index
    %c0_103 = arith.constant 0 : index
    %107 = vector.load %arg4[%c7_101, %c0_102, %c0_103] : memref<9x8x8xbf16, #tpu.memory_space<vmem>>, vector<1x8x8xbf16>
    %108 = vector.shape_cast %107 : vector<1x8x8xbf16> to vector<8x8xbf16>
    %cst_104 = arith.constant dense<0.000000e+00> : vector<384x8xf32>
    %109 = tpu.matmul %106, %108, %cst_104 {dimension_numbers = #tpu.dot_dimension_numbers<[1], [0], [0], [1], [0, 0, 1, 1], [], []>} : vector<384x8xbf16>, vector<8x8xbf16>, vector<384x8xf32> -> vector<384x8xf32>
    %110 = arith.addf %105, %109 : vector<384x8xf32>
    %c57 = arith.constant 57 : index
    %c0_105 = arith.constant 0 : index
    %111 = vector.load %arg8[%c57, %c0_105] : memref<448x8xbf16, #tpu.memory_space<vmem>>, vector<384x8xbf16>
    %c8_106 = arith.constant 8 : index
    %c0_107 = arith.constant 0 : index
    %c0_108 = arith.constant 0 : index
    %112 = vector.load %arg4[%c8_106, %c0_107, %c0_108] : memref<9x8x8xbf16, #tpu.memory_space<vmem>>, vector<1x8x8xbf16>
    %113 = vector.shape_cast %112 : vector<1x8x8xbf16> to vector<8x8xbf16>
    %cst_109 = arith.constant dense<0.000000e+00> : vector<384x8xf32>
    %114 = tpu.matmul %111, %113, %cst_109 {dimension_numbers = #tpu.dot_dimension_numbers<[1], [0], [0], [1], [0, 0, 1, 1], [], []>} : vector<384x8xbf16>, vector<8x8xbf16>, vector<384x8xf32> -> vector<384x8xf32>
    %115 = arith.addf %110, %114 : vector<384x8xf32>
    %116 = vector.broadcast %5 : vector<1x8xf32> to vector<384x8xf32>
    %117 = arith.addf %115, %116 : vector<384x8xf32>
    %cst_110 = arith.constant 0.000000e+00 : f32
    %118 = vector.broadcast %cst_110 : f32 to vector<384x8xf32>
    %119 = arith.maximumf %117, %118 : vector<384x8xf32>
    %c0_111 = arith.constant 0 : index
    %c0_112 = arith.constant 0 : index
    %c0_113 = arith.constant 0 : index
    %120 = vector.load %arg7[%c0_111, %c0_112, %c0_113] : memref<1x384x8xf32, #tpu.memory_space<vmem>>, vector<1x384x8xf32>
    %121 = vector.shape_cast %120 : vector<1x384x8xf32> to vector<384x8xf32>
    %122 = vector.shape_cast %119 : vector<384x8xf32> to vector<1x384x8xf32>
    tpu.vector_store %arg7[%c0_111, %c0_112, %c0_113], %122 {strides = array<i32>} : memref<1x384x8xf32, #tpu.memory_space<vmem>>, vector<1x384x8xf32>,
    return
  }
  func.func @transform_0(%arg0: i32) -> (i32, i32, i32) {
    %c0_i32 = arith.constant 0 : i32
    %c0_i32_0 = arith.constant 0 : i32
    %c0_i32_1 = arith.constant 0 : i32
    return %arg0, %c0_i32, %c0_i32_0 : i32, i32, i32
  }
  func.func @transform_1(%arg0: i32) -> (i32, i32, i32) {
    %c0_i32 = arith.constant 0 : i32
    %c0_i32_0 = arith.constant 0 : i32
    %c0_i32_1 = arith.constant 0 : i32
    %c0_i32_2 = arith.constant 0 : i32
    return %c0_i32, %c0_i32_0, %c0_i32_1 : i32, i32, i32
  }
  func.func @transform_2(%arg0: i32) -> (i32, i32) {
    %c0_i32 = arith.constant 0 : i32
    %c0_i32_0 = arith.constant 0 : i32
    %c0_i32_1 = arith.constant 0 : i32
    return %c0_i32, %c0_i32_0 : i32, i32
  }
  func.func @transform_3(%arg0: i32) -> (i32, i32, i32) {
    %c0_i32 = arith.constant 0 : i32
    %c0_i32_0 = arith.constant 0 : i32
    %c0_i32_1 = arith.constant 0 : i32
    %c0_i32_2 = arith.constant 0 : i32
    return %c0_i32, %c0_i32_0, %c0_i32_1 : i32, i32, i32
  }
  func.func @transform_4(%arg0: i32) -> (i32, i32) {
    %c0_i32 = arith.constant 0 : i32
    %c0_i32_0 = arith.constant 0 : i32
    %c0_i32_1 = arith.constant 0 : i32
    return %c0_i32, %c0_i32_0 : i32, i32
  }
  func.func @transform_5(%arg0: i32) -> (i32, i32) {
    %c0_i32 = arith.constant 0 : i32
    %c0_i32_0 = arith.constant 0 : i32
    %c0_i32_1 = arith.constant 0 : i32
    return %c0_i32, %c0_i32_0 : i32, i32
  }
  func.func @transform_6(%arg0: i32) -> (i32, i32, i32) {
    %c0_i32 = arith.constant 0 : i32
    %c0_i32_0 = arith.constant 0 : i32
    %c0_i32_1 = arith.constant 0 : i32
    return %arg0, %c0_i32, %c0_i32_0 : i32, i32, i32
  }
}

</mosaic_0001>

<bundles_post_ra>
// kernel: double_conv.1
= control target key start
LH: loop header
LB: loop body
LE: loop exit
PB: predicated region body
PF: predicated region fallthrough
CT: control target
= control target key end

     0   :  { %s12841_s21 = smov 0   ;;  %s15795_s0 = inlined_call_operand.vmem [shape: bf16[2,440,8], index: 0, kind: input, shape index: {}]   ;;  %s15796_s1 = inlined_call_operand.vmem [shape: bf16[9,8,8], index: 1, kind: input, shape index: {}]   ;;  %s15797_s2 = inlined_call_operand.vmem [shape: f32[1,8], index: 2, kind: input, shape index: {}]   ;;  %s15798_s3 = inlined_call_operand.vmem [shape: bf16[9,8,8], index: 3, kind: input, shape index: {}]   ;;  %s15799_s4 = inlined_call_operand.vmem [shape: f32[1,8], index: 4, kind: input, shape index: {}]   ;;  %s15800_s5 = inlined_call_operand.vmem [shape: f32[384,1], index: 5, kind: input, shape index: {}]   ;;  %s15801_s6 = inlined_call_operand.vmem [shape: f32[2,384,8], index: 6, kind: output, shape index: {}]  }
   0x1 LB: > { %s9925_s22 = sadd.s32 4294967295, %s12803_s21   ;;  %p9929_p0 = scmp.ge.s32.totalorder %s12803_s21, 1  ;;  %s12803_s21 = sphi %s12841_s21, %s16_s21  }
   0x2   : > { %p212_p1 = scmp.lt.s32.totalorder %s12803_s21, 3 }
   0x4   : > { %p213_p2 = pnand %p9929_p0, %p212_p1 }
   0x6   : > { %216 = sbr.rel (%p213_p2) target bundleno = 2108 (0x83c), region = 44 }
   0xd   : > { %v9932_v0 = vld [vmem:[%s15796_s1 + $0x4] sm:$0xf]  ;;  %vm704_vm0 = vcmask 1043456   ;;  %p242_p3 = scmp.lt.s32.totalorder %s9925_s22, 1  ;;  %v308_v2 = vld [vmem:[%s15796_s1] sm:$0xf] }
   0xe   : > { %12628 = vmatprep.subr.msk.bf16.mxu0 %vm704_vm0, %v9932_v0  ;;  %v706_v1 = vsel %vm704_vm0, %v9932_v0, 0  ;;  %vm253_vm1 = vcmask 64512   ;;  %vm435_vm2 = vsmask.f32 7424  ;;  %v982_v24 = vsel %vm704_vm0, %v308_v2, 0 }
   0xf   : > { %10961 = vmatpush3.bf16.msra.mxu0 %v706_v1  ;;  %s16069_s22 = smov (!%p242_p3, %s9925_s22), 1  ;;  %v12907_v33 = vld [vmem:[%s15796_s1 + $0x8] sm:$0xf]  ;;  %vm1215_vm3 = vcmask 1046528   ;;  %vm5781_vm4 = vsmask.f32 4352 }
  0x10   : > { %12629 = vmatprep.subr.msk.bf16.mxu0 %vm704_vm0, %v308_v2  ;;  %s12646_s27 = smul.u32 220, %s16069_s22  ;;  %vm6309_vm5 = vsmask.f32 3328  ;;  %vm6794_vm6 = vsmask.f32 256 }
  0x11   : > { %s12647_s10 = smul.u32 384, %s16069_s22 }
  0x12   : > { %s12864_s30 = scalar_lea.vmem %s15795_s0, %s12646_s27 }
  0x13   : > { %v260_v3 = vld [vmem:[%s12864_s30] sm:$0xf]  ;;  %v12868_v4 = vld [vmem:[%s12864_s30 + $0x4] sm:$0xf]  ;;  %v12874_v6 = vld [vmem:[%s12864_s30 + $0x8] sm:$0xff]   ;;  %s15647_s14 = scalar_lea.vmem %s15801_s6, %s12647_s10 }
  0x14   : > { %v12871_v5 = vcombine.low %v260_v3, %v12868_v4  ;;  %v12877_v7 = vld [vmem:[%s12864_s30 + $0x10] sm:$0xff]   ;;  %v444_v10 = vshll.u32 %v12874_v6, 16  ;;  %v448_v11 = vshrl.u32 %v12874_v6, 16  ;;  %v12885_v13 = vld [vmem:[%s12864_s30 + $0x18] sm:$0xff]   ;;  %v12889_v15 = vld [vmem:[%s12864_s30 + $0x20] sm:$0xff]  }
  0x15   : > { %v452_v12 = vshll.u32 %v12877_v7, 16  ;;  %v456_v14 = vshrl.u32 %v12877_v7, 16  ;;  %v460_v19 = vshll.u32 %v12885_v13, 16  ;;  %v468_v22 = vshll.u32 %v12889_v15, 16  ;;  %v12894_v23 = vld [vmem:[%s12864_s30 + $0x28] sm:$0xff]   ;;  %v12911_v35 = vld [vmem:[%s12864_s30 + $0x30] sm:$0xff]  }
  0x16   : > { %v437_v8 = vshrl.u32 %v12871_v5, 16  ;;  %v439_v9 = vshll.u32 %v12871_v5, 16  ;;  %v446_v17 = vrot.slane %v444_v10, 1  ;;  %v464_v27 = vshrl.u32 %v12885_v13, 16  ;;  %v12915_v39 = vld [vmem:[%s12864_s30 + $0x38] sm:$0xff]   ;;  %v12921_v41 = vld [vmem:[%s12864_s30 + $0x40] sm:$0xff]  }
  0x17   : > { %v454_v18 = vrot.slane %v452_v12, 1  ;;  %v462_v26 = vrot.slane %v460_v19, 1  ;;  %v472_v30 = vshrl.u32 %v12889_v15, 16  ;;  %v476_v31 = vshll.u32 %v12894_v23, 16  ;;  %v12929_v47 = vld [vmem:[%s12864_s30 + $0x48] sm:$0xff]   ;;  %v12934_v50 = vld [vmem:[%s12864_s30 + $0x50] sm:$0xff]  }
  0x18   : > { %v441_v16 = vrot.slane %v439_v9, 1  ;;  %v450_v21 = vor.u32 %v448_v11, %v446_v17  ;;  %v470_v34 = vrot.slane %v468_v22, 1  ;;  %v484_v40 = vshll.u32 %v12911_v35, 16  ;;  %v12938_v52 = vld [vmem:[%s12864_s30 + $0x58] sm:$0xff]   ;;  %v12943_v57 = vld [vmem:[%s12864_s30 + $0x60] sm:$0xff]   ;;  %v12947_v59 = vld [vmem:[%s12864_s30 + $0x68] sm:$0xff]  }
  0x19   : > { %v458_v25 = vor.u32 %v456_v14, %v454_v18  ;;  %v466_v36 = vor.u32 %v464_v27, %v462_v26  ;;  %v478_v38 = vrot.slane %v476_v31, 1  ;;  %v480_v43 = vshrl.u32 %v12894_v23, 16  ;;  %v12952_v63 = vld [vmem:[%s12864_s30 + $0x70] sm:$0xff]   ;;  %v12957_v2 = vld [vmem:[%s12864_s30 + $0x78] sm:$0xff]   ;;  %v12963_v11 = vld [vmem:[%s12864_s30 + $0x80] sm:$0xff]  }
  0x1a   : > { %v442_v20 = vor.u32 %v441_v16, %v437_v8  ;;  %v455_v29 = vsel %vm435_vm2, %v450_v21, %v454_v18  ;;  %v474_v37 = vor.u32 %v472_v30, %v470_v34  ;;  %v488_v44 = vshrl.u32 %v12911_v35, 16  ;;  %v12967_v14 = vld [vmem:[%s12864_s30 + $0x88] sm:$0xff]  }
  0x1b   : > { %v463_v32 = vsel %vm435_vm2, %v458_v25, %v462_v26  ;;  %v471_v42 = vsel %vm435_vm2, %v466_v36, %v470_v34  ;;  %v492_v46 = vshll.u32 %v12915_v39, 16  ;;  %v486_v48 = vrot.slane %v484_v40, 1  ;;  %v12977_v26 = vld [vmem:[%s12864_s30 + $0x90] sm:$0xff]  }
  0x1c   : > { %v447_v28 = vsel %vm435_vm2, %v442_v20, %v446_v17  ;;  %v479_v45 = vsel %vm435_vm2, %v474_v37, %v478_v38  ;;  %v500_v49 = vshll.u32 %v12921_v41, 16  ;;  %v482_v51 = vor.u32 %v480_v43, %v478_v38  ;;  %v12990_v43 = vld [vmem:[%s12864_s30 + $0xa0] sm:$0xff]  }
  0x1d   : > { %10962 = vmatprep.mubr.msk.bf16.mxu0 %vm253_vm1, %v447_v28  ;;  %v490_v53 = vor.u32 %v488_v44, %v486_v48  ;;  %v494_v54 = vrot.slane %v492_v46, 1  ;;  %v496_v55 = vshrl.u32 %v12915_v39, 16  ;;  %v508_v56 = vshll.u32 %v12929_v47, 16 }
  0x1e   : > { %10963 = vmatmul.mubr.msk.bf16.vlgmr.msra.gmra.mrb[0].mxu0 %vm253_vm1, %v455_v29  ;;  %v504_v58 = vshrl.u32 %v12921_v41, 16  ;;  %v502_v60 = vrot.slane %v500_v49, 1  ;;  %v512_v61 = vshrl.u32 %v12929_v47, 16  ;;  %v516_v62 = vshll.u32 %v12934_v50, 16 }
  0x1f   : > { %11011 = vmatpush3.bf16.msra.mxu0 %v982_v24  ;;  %10966 = vmatprep.mubr.msk.bf16.mxu0 %vm253_vm1, %v463_v32  ;;  %v487_v0 = vsel %vm435_vm2, %v482_v51, %v486_v48  ;;  %v524_v1 = vshll.u32 %v12938_v52, 16  ;;  %v495_v3 = vsel %vm435_vm2, %v490_v53, %v494_v54  ;;  %v510_v8 = vrot.slane %v508_v56, 1 }
  0x20   : > { %12630 = vmatprep.subr.msk.bf16.mxu0 %vm704_vm0, %v12907_v33  ;;  %v520_v9 = vshrl.u32 %v12934_v50, 16  ;;  %v532_v10 = vshll.u32 %v12943_v57, 16  ;;  %v540_v12 = vshll.u32 %v12947_v59, 16  ;;  %v498_v16 = vor.u32 %v496_v55, %v494_v54 }
  0x21   : > { %v518_v17 = vrot.slane %v516_v62, 1  ;;  %v548_v18 = vshll.u32 %v12952_v63, 16  ;;  %v526_v19 = vrot.slane %v524_v1, 1  ;;  %v528_v20 = vshrl.u32 %v12938_v52, 16 }
  0x22   : > { %v536_v21 = vshrl.u32 %v12943_v57, 16  ;;  %v556_v22 = vshll.u32 %v12957_v2, 16  ;;  %v506_v24 = vor.u32 %v504_v58, %v502_v60  ;;  %v564_v25 = vshll.u32 %v12963_v11, 16 }
  0x23   : > { %v534_v27 = vrot.slane %v532_v10, 1  ;;  %v542_v28 = vrot.slane %v540_v12, 1  ;;  %v544_v29 = vshrl.u32 %v12947_v59, 16  ;;  %v572_v30 = vshll.u32 %v12967_v14, 16 }
  0x24   : > { %v503_v31 = vsel %vm435_vm2, %v498_v16, %v502_v60  ;;  %v550_v32 = vrot.slane %v548_v18, 1  ;;  %v552_v34 = vshrl.u32 %v12952_v63, 16  ;;  %v558_v36 = vrot.slane %v556_v22, 1  ;;  %v13012_v16 = vld [vmem:[%s12864_s30 + $0xa8] sm:$0xff]  }
  0x25   : > { %v560_v37 = vshrl.u32 %v12957_v2, 16  ;;  %v568_v38 = vshrl.u32 %v12963_v11, 16  ;;  %v576_v40 = vshrl.u32 %v12967_v14, 16  ;;  %v511_v44 = vsel %vm435_vm2, %v506_v24, %v510_v8 }
  0x26   : > { %10967 = vmatmul.mubr.msk.bf16.gmra.mrb[4].mxu0 %vm253_vm1, %v471_v42  ;;  %v12987_v42 = vld [vmem:[%s12864_s30 + $0x98] sm:$0xff]   ;;  %v580_v46 = vshll.u32 %v12977_v26, 16  ;;  %v574_v48 = vrot.slane %v572_v30, 1  ;;  %v584_v49 = vshrl.u32 %v12977_v26, 16  ;;  %v514_v51 = vor.u32 %v512_v61, %v510_v8 }
  0x27   : > { %10970 = vmatprep.mubr.msk.bf16.mxu0 %vm253_vm1, %v479_v45  ;;  %v566_v45 = vrot.slane %v564_v25, 1  ;;  %v588_v53 = vshll.u32 %v12987_v42, 16  ;;  %v596_v54 = vshll.u32 %v12990_v43, 16  ;;  %v522_v55 = vor.u32 %v520_v9, %v518_v17 }
  0x28   : > { %v519_v56 = vsel %vm435_vm2, %v514_v51, %v518_v17  ;;  %v530_v60 = vor.u32 %v528_v20, %v526_v19  ;;  %v538_v62 = vor.u32 %v536_v21, %v534_v27  ;;  %v546_v1 = vor.u32 %v544_v29, %v542_v28  ;;  %v13022_v29 = vld [vmem:[%s12864_s30 + $0xb0] sm:$0xff]  }
  0x29   : > { %v527_v58 = vsel %vm435_vm2, %v522_v55, %v526_v19  ;;  %v562_v10 = vor.u32 %v560_v37, %v558_v36  ;;  %v570_v12 = vor.u32 %v568_v38, %v566_v45  ;;  %v578_v19 = vor.u32 %v576_v40, %v574_v48 }
  0x2a   : > { %v543_v61 = vsel %vm435_vm2, %v538_v62, %v542_v28  ;;  %v551_v8 = vsel %vm435_vm2, %v546_v1, %v550_v32  ;;  %v582_v20 = vrot.slane %v580_v46, 1  ;;  %v592_v21 = vshrl.u32 %v12987_v42, 16  ;;  %v13036_v46 = vld [vmem:[%s12864_s30 + $0xc0] ss:$0 sps:$4 sm:$0x11]  }
  0x2b   : > { %v567_v17 = vsel %vm435_vm2, %v562_v10, %v566_v45  ;;  %v575_v18 = vsel %vm435_vm2, %v570_v12, %v574_v48  ;;  %v590_v22 = vrot.slane %v588_v53, 1  ;;  %v598_v24 = vrot.slane %v596_v54, 1 }
  0x2c   : > { %v600_v25 = vshrl.u32 %v12990_v43, 16  ;;  %v586_v28 = vor.u32 %v584_v49, %v582_v20  ;;  %v608_v30 = vshrl.u32 %v13012_v16, 16  ;;  %v616_v37 = vshrl.u32 %v13022_v29, 16 }
  0x2d   : > { %v594_v38 = vor.u32 %v592_v21, %v590_v22  ;;  %v1217_v10 = vrot.slane %v12874_v6, 1 }
  0x2e   : > { %10971 = vmatmul.mubr.msk.bf16.gmra.mrb[8].mxu0 %vm253_vm1, %v487_v0  ;;  %v535_v0 = vsel %vm435_vm2, %v530_v60, %v534_v27  ;;  %v604_v27 = vshll.u32 %v13012_v16, 16  ;;  %v602_v45 = vor.u32 %v600_v25, %v598_v24  ;;  %v1229_v25 = vrot.slane %v12915_v39, 1 }
  0x2f   : > { %10974 = vmatprep.mubr.msk.bf16.mxu0 %vm253_vm1, %v495_v3  ;;  %v554_v3 = vor.u32 %v552_v34, %v550_v32  ;;  %v583_v32 = vsel %vm435_vm2, %v578_v19, %v582_v20  ;;  %v591_v34 = vsel %vm435_vm2, %v586_v28, %v590_v22  ;;  %v599_v48 = vsel %vm435_vm2, %v594_v38, %v598_v24 }
  0x30   : > { %v606_v40 = vrot.slane %v604_v27, 1  ;;  %v1227_v24 = vrot.slane %v12911_v35, 1  ;;  %v1233_v28 = vrot.slane %v12929_v47, 1 }
  0x31   : > { %v559_v9 = vsel %vm435_vm2, %v554_v3, %v558_v36  ;;  %v612_v36 = vshll.u32 %v13022_v29, 16  ;;  %v1338_v3 = vsel %vm704_vm0, %v12907_v33, 0 }
  0x32   : > { %v607_v49 = vsel %vm435_vm2, %v602_v45, %v606_v40  ;;  %v610_v54 = vor.u32 %v608_v30, %v606_v40 }
  0x33   : > { %v614_v51 = vrot.slane %v612_v36, 1 }
  0x35   : > { %v615_v60 = vsel %vm435_vm2, %v610_v54, %v614_v51 }
  0x36   : > { %10975 = vmatmul.mubr.msk.bf16.gmra.mrb[12].mxu0 %vm253_vm1, %v503_v31  ;;  %v13026_v31 = vld [vmem:[%s12864_s30 + $0xb8] sm:$0xff]  }
  0x37   : > { %10978 = vmatprep.mubr.msk.bf16.mxu0 %vm253_vm1, %v511_v44  ;;  %v620_v44 = vshll.u32 %v13026_v31, 16  ;;  %v624_v53 = vshrl.u32 %v13026_v31, 16  ;;  %v1261_v54 = vrot.slane %v13026_v31, 1 }
  0x39   : > { %v622_v55 = vrot.slane %v620_v44, 1 }
  0x3e   : > { %10979 = vmatmul.mubr.msk.bf16.gmra.mrb[16].mxu0 %vm253_vm1, %v519_v56  ;;  %v628_v56 = vshll.u32 %v13036_v46, 16 }
  0x3f   : > { %10982 = vmatprep.mubr.msk.bf16.mxu0 %vm253_vm1, %v527_v58  ;;  %v618_v58 = vor.u32 %v616_v37, %v614_v51 }
  0x41   : > { %v623_v62 = vsel %vm435_vm2, %v618_v58, %v622_v55  ;;  %v12685_v58 = vld [vmem:[%s12864_s30 + $0xc] sm:$0xff]  }
  0x46   : > { %10983 = vmatmul.mubr.msk.bf16.gmra.mrb[20].mxu0 %vm253_vm1, %v535_v0  ;;  %v626_v0 = vor.u32 %v624_v53, %v622_v55 }
  0x47   : > { %10986 = vmatprep.mubr.msk.bf16.mxu0 %vm253_vm1, %v543_v61  ;;  %v630_v61 = vrot.slane %v628_v56, 1 }
  0x49   : > { %v631_v1 = vsel %vm435_vm2, %v626_v0, %v630_v61  ;;  %v12689_v0 = vld [vmem:[%s12864_s30 + $0x2c] sm:$0xff]   ;;  %v12690_v61 = vld [vmem:[%s12864_s30 + $0x34] sm:$0xff]  }
  0x4e   : > { %10987 = vmatmul.mubr.msk.bf16.gmra.mrb[24].mxu0 %vm253_vm1, %v551_v8  ;;  %v10032_v8 = vld [vmem:[%s15796_s1 + $0xc] sm:$0xf] }
  0x4f   : > { %10990 = vmatprep.mubr.msk.bf16.mxu0 %vm253_vm1, %v559_v9  ;;  %v1856_v19 = vsel %vm704_vm0, %v10032_v8, 0 }
  0x56   : > { %10991 = vmatmul.mubr.msk.bf16.gmra.mrb[28].mxu0 %vm253_vm1, %v567_v17  ;;  %v1219_v17 = vrot.slane %v12877_v7, 1 }
  0x57   : > { %10994 = vmatprep.mubr.msk.bf16.mxu0 %vm253_vm1, %v575_v18 }
  0x58   : > { %v1220_v18 = vsel %vm1215_vm3, %v1217_v10, %v1219_v17 }
  0x5e   : > { %10995 = vmatmul.mubr.msk.bf16.gmra.mrb[32].mxu0 %vm253_vm1, %v583_v32 }
  0x5f   : > { %10998 = vmatprep.mubr.msk.bf16.mxu0 %vm253_vm1, %v591_v34 }
  0x66   : > { %10999 = vmatmul.mubr.msk.bf16.gmra.mrb[36].mxu0 %vm253_vm1, %v599_v48 }
  0x67   : > { %11002 = vmatprep.mubr.msk.bf16.mxu0 %vm253_vm1, %v607_v49 }
  0x6e   : > { %11003 = vmatmul.mubr.msk.bf16.gmra.mrb[40].mxu0 %vm253_vm1, %v615_v60 }
  0x6f   : > { %11006 = vmatprep.mubr.msk.bf16.mxu0 %vm253_vm1, %v623_v62  ;;  %v12688_v62 = vld [vmem:[%s12864_s30 + $0x24] sm:$0xff]  }
  0x76   : > { %11007 = vmatmul.mubr.msk.bf16.gmra.mrb[44].mxu0 %vm253_vm1, %v631_v1  ;;  %v12691_v1 = vld [vmem:[%s12864_s30 + $0x3c] sm:$0xff]  }
  0x77   : > { %11012 = vmatprep.mubr.msk.bf16.mxu0 %vm253_vm1, %v12871_v5  ;;  %v1209_v5 = vld [vmem:[%s12864_s30] sm:$0xe] }
  0x78   : > { %v10007_v33 = vcombine.low %v1209_v5, %v12868_v4  ;;  %v1221_v4 = vrot.slane %v12885_v13, 1  ;;  %v12694_v5 = vld [vmem:[%s12864_s30 + $0x54] sm:$0xff]  }
  0x7a   : > { %v1216_v9 = vrot.slane %v10007_v33, 1  ;;  %v1222_v20 = vsel %vm1215_vm3, %v1219_v17, %v1221_v4  ;;  %v12695_v33 = vld [vmem:[%s12864_s30 + $0x5c] sm:$0xff]  }
  0x7b   : > { %v12699_v17 = vld [vmem:[%s12864_s30 + $0x7c] sm:$0xff]  }
  0x7c   : > { %v1218_v12 = vsel %vm1215_vm3, %v1216_v9, %v1217_v10  ;;  %v12696_v9 = vld [vmem:[%s12864_s30 + $0x64] sm:$0xff]   ;;  %v12697_v10 = vld [vmem:[%s12864_s30 + $0x6c] sm:$0xff]  }
  0x7e   : > { %11013 = vmatmul.mubr.msk.bf16.vlgmr.msra.gmra.mrb[0].mxu0 %vm253_vm1, %v12874_v6  ;;  %v13117_v6 = vld [vmem:[%s15796_s1 + $0x10] sm:$0xf] }
  0x7f   : > { %11061 = vmatpush3.bf16.msra.mxu0 %v1338_v3  ;;  %11016 = vmatprep.mubr.msk.bf16.mxu0 %vm253_vm1, %v12877_v7  ;;  %v1223_v7 = vrot.slane %v12889_v15, 1  ;;  %v2574_v60 = vsel %vm704_vm0, %v13117_v6, 0  ;;  %v12692_v3 = vld [vmem:[%s12864_s30 + $0x44] sm:$0xff]  }
  0x80   : > { %12631 = vmatprep.subr.msk.bf16.mxu0 %vm704_vm0, %v10032_v8  ;;  %v12693_v8 = vld [vmem:[%s12864_s30 + $0x4c] sm:$0xff]  }
  0x81   : > { %v1224_v21 = vsel %vm1215_vm3, %v1221_v4, %v1223_v7  ;;  %v12700_v4 = vld [vmem:[%s12864_s30 + $0x84] sm:$0xff]  }
  0x86   : > { %11017 = vmatmul.mubr.msk.bf16.gmra.mrb[4].mxu0 %vm253_vm1, %v12885_v13  ;;  %v1225_v13 = vrot.slane %v12894_v23, 1 }
  0x87   : > { %11020 = vmatprep.mubr.msk.bf16.mxu0 %vm253_vm1, %v12889_v15  ;;  %v1230_v15 = vsel %vm1215_vm3, %v1227_v24, %v1229_v25 }
  0x88   : > { %v1226_v22 = vsel %vm1215_vm3, %v1223_v7, %v1225_v13  ;;  %v1228_v27 = vsel %vm1215_vm3, %v1225_v13, %v1227_v24  ;;  %v13235_v7 = vld [vmem:[%s12864_s30 + $0x10] sm:$0xf]  ;;  %v12704_v13 = vld [vmem:[%s12864_s30 + $0xa4] sm:$0xff]   ;;  %v13243_v24 = vld [vmem:[%s12864_s30 + $0x14] sm:$0xff]  }
  0x8e   : > { %11021 = vmatmul.mubr.msk.bf16.gmra.mrb[8].mxu0 %vm253_vm1, %v12894_v23  ;;  %v1231_v23 = vrot.slane %v12921_v41, 1 }
  0x8f   : > { %11024 = vmatprep.mubr.msk.bf16.mxu0 %vm253_vm1, %v12911_v35  ;;  %v1235_v35 = vrot.slane %v12934_v50, 1 }
  0x90   : > { %v1232_v30 = vsel %vm1215_vm3, %v1229_v25, %v1231_v23  ;;  %v1234_v32 = vsel %vm1215_vm3, %v1231_v23, %v1233_v28 }
  0x91   : > { %v1236_v34 = vsel %vm1215_vm3, %v1233_v28, %v1235_v35 }
  0x96   : > { %11025 = vmatmul.mubr.msk.bf16.gmra.mrb[12].mxu0 %vm253_vm1, %v12915_v39  ;;  %v1237_v39 = vrot.slane %v12938_v52, 1 }
  0x97   : > { %11028 = vmatprep.mubr.msk.bf16.mxu0 %vm253_vm1, %v12921_v41  ;;  %v1239_v41 = vrot.slane %v12943_v57, 1 }
  0x98   : > { %v1238_v36 = vsel %vm1215_vm3, %v1235_v35, %v1237_v39 }
  0x99   : > { %v1240_v37 = vsel %vm1215_vm3, %v1237_v39, %v1239_v41 }
  0x9e   : > { %11029 = vmatmul.mubr.msk.bf16.gmra.mrb[16].mxu0 %vm253_vm1, %v12929_v47  ;;  %v1241_v47 = vrot.slane %v12947_v59, 1 }
  0x9f   : > { %11032 = vmatprep.mubr.msk.bf16.mxu0 %vm253_vm1, %v12934_v50  ;;  %v1243_v50 = vrot.slane %v12952_v63, 1 }
  0xa0   : > { %v1242_v38 = vsel %vm1215_vm3, %v1239_v41, %v1241_v47 }
  0xa1   : > { %v1244_v40 = vsel %vm1215_vm3, %v1241_v47, %v1243_v50  ;;  %v2317_v47 = vshrl.u32 %v13243_v24, 16 }
  0xa6   : > { %11033 = vmatmul.mubr.msk.bf16.gmra.mrb[20].mxu0 %vm253_vm1, %v12938_v52  ;;  %v1245_v52 = vrot.slane %v12957_v2, 1 }
  0xa7   : > { %11036 = vmatprep.mubr.msk.bf16.mxu0 %vm253_vm1, %v12943_v57  ;;  %v1247_v57 = vrot.slane %v12963_v11, 1 }
  0xa8   : > { %v1246_v44 = vsel %vm1215_vm3, %v1243_v50, %v1245_v52 }
  0xa9   : > { %v1248_v45 = vsel %vm1215_vm3, %v1245_v52, %v1247_v57 }
  0xae   : > { %11037 = vmatmul.mubr.msk.bf16.gmra.mrb[24].mxu0 %vm253_vm1, %v12947_v59  ;;  %v1249_v59 = vrot.slane %v12967_v14, 1 }
  0xaf   : > { %11040 = vmatprep.mubr.msk.bf16.mxu0 %vm253_vm1, %v12952_v63  ;;  %v1251_v63 = vrot.slane %v12977_v26, 1 }
  0xb0   : > { %v1250_v48 = vsel %vm1215_vm3, %v1247_v57, %v1249_v59 }
  0xb1   : > { %v1252_v49 = vsel %vm1215_vm3, %v1249_v59, %v1251_v63 }
  0xb6   : > { %11041 = vmatmul.mubr.msk.bf16.gmra.mrb[28].mxu0 %vm253_vm1, %v12957_v2  ;;  %v1253_v2 = vrot.slane %v12987_v42, 1 }
  0xb7   : > { %11044 = vmatprep.mubr.msk.bf16.mxu0 %vm253_vm1, %v12963_v11  ;;  %v1255_v11 = vrot.slane %v12990_v43, 1 }
  0xb8   : > { %v1254_v51 = vsel %vm1215_vm3, %v1251_v63, %v1253_v2 }
  0xb9   : > { %v1256_v53 = vsel %vm1215_vm3, %v1253_v2, %v1255_v11 }
  0xbe   : > { %11045 = vmatmul.mubr.msk.bf16.gmra.mrb[32].mxu0 %vm253_vm1, %v12967_v14  ;;  %v1257_v14 = vrot.slane %v13012_v16, 1 }
  0xbf   : > { %11048 = vmatprep.mubr.msk.bf16.mxu0 %vm253_vm1, %v12977_v26 }
  0xc0   : > { %v1258_v26 = vsel %vm1215_vm3, %v1255_v11, %v1257_v14 }
  0xc6   : > { %11049 = vmatmul.mubr.msk.bf16.gmra.mrb[36].mxu0 %vm253_vm1, %v12987_v42  ;;  %v1259_v42 = vrot.slane %v13022_v29, 1 }
  0xc7   : > { %11052 = vmatprep.mubr.msk.bf16.mxu0 %vm253_vm1, %v12990_v43 }
  0xc8   : > { %v1260_v55 = vsel %vm1215_vm3, %v1257_v14, %v1259_v42  ;;  %v1262_v43 = vsel %vm1215_vm3, %v1259_v42, %v1261_v54  ;;  %v13285_v42 = vld [vmem:[%s12864_s30 + $0x3c] sm:$0xff]  }
  0xce   : > { %11053 = vmatmul.mubr.msk.bf16.gmra.mrb[40].mxu0 %vm253_vm1, %v13012_v16  ;;  %v1263_v16 = vrot.slane %v13036_v46, 1  ;;  %v13195_v46 = vld [vmem:[%s15796_s1 + $0x14] sm:$0xf] }
  0xcf   : > { %11056 = vmatprep.mubr.msk.bf16.mxu0 %vm253_vm1, %v13022_v29  ;;  %v12686_v29 = vld [vmem:[%s12864_s30 + $0x14] sm:$0xff]  }
  0xd0   : > { %v1264_v56 = vsel %vm1215_vm3, %v1261_v54, %v1263_v16  ;;  %v13289_v16 = vld [vmem:[%s12864_s30 + $0x44] sm:$0xff]  }
  0xd6   : > { %11057 = vmatmul.mubr.msk.bf16.gmra.mrb[44].mxu0 %vm253_vm1, %v13026_v31  ;;  %v12687_v31 = vld [vmem:[%s12864_s30 + $0x1c] sm:$0xff]  }
  0xd7   : > { %11062 = vmatprep.mubr.msk.bf16.mxu0 %vm253_vm1, %v1218_v12  ;;  %v12698_v12 = vld [vmem:[%s12864_s30 + $0x74] sm:$0xff]  }
  0xde   : > { %11063 = vmatmul.mubr.msk.bf16.vlgmr.msra.gmra.mrb[0].mxu0 %vm253_vm1, %v1220_v18  ;;  %v12701_v18 = vld [vmem:[%s12864_s30 + $0x8c] sm:$0xff]  }
  0xdf   : > { %11111 = vmatpush3.bf16.msra.mxu0 %v1856_v19  ;;  %11066 = vmatprep.mubr.msk.bf16.mxu0 %vm253_vm1, %v1222_v20  ;;  %v12702_v19 = vld [vmem:[%s12864_s30 + $0x94] sm:$0xff]   ;;  %v12703_v20 = vld [vmem:[%s12864_s30 + $0x9c] sm:$0xff]  }
  0xe0   : > { %12632 = vmatprep.subr.msk.bf16.mxu0 %vm704_vm0, %v13117_v6  ;;  %v2131_v6 = vld [vmem:[%s12864_s30 + $0xc] sm:$0xf] }
  0xe6   : > { %11067 = vmatmul.mubr.msk.bf16.gmra.mrb[4].mxu0 %vm253_vm1, %v1224_v21  ;;  %v12705_v21 = vld [vmem:[%s12864_s30 + $0xac] sm:$0xff]  }
  0xe7   : > { %11070 = vmatprep.mubr.msk.bf16.mxu0 %vm253_vm1, %v1226_v22  ;;  %v10082_v22 = vcombine.low %v2131_v6, %v13235_v7 }
  0xe9   : > { %v2308_v25 = vshll.u32 %v10082_v22, 16  ;;  %v2306_v23 = vshrl.u32 %v10082_v22, 16 }
  0xeb   : > { %v2310_v28 = vrot.slane %v2308_v25, 1 }
  0xed   : > { %v2311_v35 = vor.u32 %v2310_v28, %v2306_v23 }
  0xee   : > { %11071 = vmatmul.mubr.msk.bf16.gmra.mrb[8].mxu0 %vm253_vm1, %v1228_v27  ;;  %v12706_v27 = vld [vmem:[%s12864_s30 + $0xb4] sm:$0xff]  }
  0xef   : > { %11074 = vmatprep.mubr.msk.bf16.mxu0 %vm253_vm1, %v1230_v15  ;;  %v12707_v15 = vld [vmem:[%s12864_s30 + $0xbc] sm:$0xff]  }
  0xf6   : > { %11075 = vmatmul.mubr.msk.bf16.gmra.mrb[12].mxu0 %vm253_vm1, %v1232_v30  ;;  %v2313_v30 = vshll.u32 %v13243_v24, 16 }
  0xf7   : > { %11078 = vmatprep.mubr.msk.bf16.mxu0 %vm253_vm1, %v1234_v32  ;;  %v13250_v32 = vld [vmem:[%s12864_s30 + $0x1c] sm:$0xff]  }
  0xf8   : > { %v2315_v39 = vrot.slane %v2313_v30, 1  ;;  %v2321_v41 = vshll.u32 %v13250_v32, 16  ;;  %v13329_v30 = vld [vmem:[%s12864_s30 + $0x6c] sm:$0xff]  }
  0xfa   : > { %v2323_v52 = vrot.slane %v2321_v41, 1  ;;  %v13333_v41 = vld [vmem:[%s12864_s30 + $0x74] sm:$0xff]  }
  0xfe   : > { %11079 = vmatmul.mubr.msk.bf16.gmra.mrb[16].mxu0 %vm253_vm1, %v1236_v34  ;;  %v13254_v34 = vld [vmem:[%s12864_s30 + $0x24] sm:$0xff]  }
  0xff   : > { %11082 = vmatprep.mubr.msk.bf16.mxu0 %vm253_vm1, %v1238_v36  ;;  %v12708_v36 = vld [vmem:[%s12864_s30 + $0xc4] sm:$0xff]   ;;  %v2329_v50 = vshll.u32 %v13254_v34, 16  ;;  %v2333_v2 = vshrl.u32 %v13254_v34, 16 }
 0x101   : > { %v2331_v59 = vrot.slane %v2329_v50, 1 }
 0x103   : > { %v2335_v54 = vor.u32 %v2333_v2, %v2331_v59 }
 0x106   : > { %11083 = vmatmul.mubr.msk.bf16.gmra.mrb[20].mxu0 %vm253_vm1, %v1240_v37  ;;  %v2316_v37 = vsel %vm435_vm2, %v2311_v35, %v2315_v39 }
 0x107   : > { %11086 = vmatprep.mubr.msk.bf16.mxu0 %vm253_vm1, %v1242_v38  ;;  %v2325_v38 = vshrl.u32 %v13250_v32, 16 }
 0x109   : > { %v2327_v57 = vor.u32 %v2325_v38, %v2323_v52 }
 0x10e   : > { %11087 = vmatmul.mubr.msk.bf16.gmra.mrb[24].mxu0 %vm253_vm1, %v1244_v40  ;;  %v13264_v40 = vld [vmem:[%s12864_s30 + $0x2c] sm:$0xff]  }
 0x10f   : > { %11090 = vmatprep.mubr.msk.bf16.mxu0 %vm253_vm1, %v1246_v44  ;;  %v2319_v44 = vor.u32 %v2317_v47, %v2315_v39  ;;  %v2341_v11 = vshrl.u32 %v13264_v40, 16  ;;  %v2401_v47 = vshll.u32 %v13329_v30, 16 }
 0x111   : > { %v2324_v63 = vsel %vm435_vm2, %v2319_v44, %v2323_v52  ;;  %v2405_v52 = vshrl.u32 %v13329_v30, 16  ;;  %v2409_v44 = vshll.u32 %v13333_v41, 16 }
 0x113   : > { %v2411_v2 = vrot.slane %v2409_v44, 1 }
 0x116   : > { %11091 = vmatmul.mubr.msk.bf16.gmra.mrb[28].mxu0 %vm253_vm1, %v1248_v45  ;;  %v13268_v45 = vld [vmem:[%s12864_s30 + $0x34] sm:$0xff]  }
 0x117   : > { %11094 = vmatprep.mubr.msk.bf16.mxu0 %vm253_vm1, %v1250_v48  ;;  %v2337_v48 = vshll.u32 %v13264_v40, 16  ;;  %v2345_v14 = vshll.u32 %v13268_v45, 16 }
 0x11e   : > { %11095 = vmatmul.mubr.msk.bf16.gmra.mrb[32].mxu0 %vm253_vm1, %v1252_v49  ;;  %v2977_v49 = vsel %vm704_vm0, %v13195_v46, 0 }
 0x11f   : > { %11098 = vmatprep.mubr.msk.bf16.mxu0 %vm253_vm1, %v1254_v51  ;;  %v2332_v51 = vsel %vm435_vm2, %v2327_v57, %v2331_v59  ;;  %v2403_v57 = vrot.slane %v2401_v47, 1  ;;  %v13343_v59 = vld [vmem:[%s12864_s30 + $0x7c] sm:$0xff]  }
 0x126   : > { %11099 = vmatmul.mubr.msk.bf16.gmra.mrb[36].mxu0 %vm253_vm1, %v1256_v53  ;;  %v13281_v53 = vld [vmem:[%s15796_s1 + $0x18] sm:$0xf] }
 0x127   : > { %11102 = vmatprep.mubr.msk.bf16.mxu0 %vm253_vm1, %v1258_v26  ;;  %v2339_v26 = vrot.slane %v2337_v48, 1 }
 0x12e   : > { %11103 = vmatmul.mubr.msk.bf16.gmra.mrb[40].mxu0 %vm253_vm1, %v1260_v55  ;;  %v2343_v55 = vor.u32 %v2341_v11, %v2339_v26 }
 0x12f   : > { %11106 = vmatprep.mubr.msk.bf16.mxu0 %vm253_vm1, %v1262_v43  ;;  %v2347_v43 = vrot.slane %v2345_v14, 1  ;;  %v2413_v14 = vshrl.u32 %v13333_v41, 16 }
 0x136   : > { %11107 = vmatmul.mubr.msk.bf16.gmra.mrb[44].mxu0 %vm253_vm1, %v1264_v56  ;;  %v2353_v56 = vshll.u32 %v13285_v42, 16 }
 0x137   : > { %11112 = vmatprep.mubr.msk.bf16.mxu0 %vm253_vm1, %v12685_v58  ;;  %v2340_v58 = vsel %vm435_vm2, %v2335_v54, %v2339_v26  ;;  %v2421_v54 = vshrl.u32 %v13343_v59, 16 }
 0x13e   : > { %11113 = vmatmul.mubr.msk.bf16.vlgmr.msra.gmra.mrb[0].mxu0 %vm253_vm1, %v12686_v29  ;;  %v2349_v29 = vshrl.u32 %v13268_v45, 16 }
 0x13f   : > { %11161 = vmatpush3.bf16.msra.mxu0 %v2574_v60  ;;  %11116 = vmatprep.mubr.msk.bf16.mxu0 %vm253_vm1, %v12687_v31  ;;  %v2348_v31 = vsel %vm435_vm2, %v2343_v55, %v2347_v43  ;;  %v2357_v60 = vshrl.u32 %v13285_v42, 16 }
 0x140   : > { %12633 = vmatprep.subr.msk.bf16.mxu0 %vm704_vm0, %v13195_v46  ;;  %v2361_v46 = vshll.u32 %v13289_v16, 16 }
 0x146   : > { %11117 = vmatmul.mubr.msk.bf16.gmra.mrb[4].mxu0 %vm253_vm1, %v12688_v62  ;;  %v2355_v62 = vrot.slane %v2353_v56, 1  ;;  %v13357_v56 = vld [vmem:[%s12864_s30 + $0x8c] sm:$0xff]  }
 0x147   : > { %11120 = vmatprep.mubr.msk.bf16.mxu0 %vm253_vm1, %v12689_v0  ;;  %v13301_v0 = vld [vmem:[%s12864_s30 + $0x4c] sm:$0xff]  }
 0x14e   : > { %11121 = vmatmul.mubr.msk.bf16.gmra.mrb[8].mxu0 %vm253_vm1, %v12690_v61  ;;  %v2351_v61 = vor.u32 %v2349_v29, %v2347_v43 }
 0x14f   : > { %11124 = vmatprep.mubr.msk.bf16.mxu0 %vm253_vm1, %v12691_v1  ;;  %v2359_v1 = vor.u32 %v2357_v60, %v2355_v62  ;;  %v13361_v60 = vld [vmem:[%s12864_s30 + $0x94] sm:$0xff]  }
 0x156   : > { %11125 = vmatmul.mubr.msk.bf16.gmra.mrb[12].mxu0 %vm253_vm1, %v12692_v3  ;;  %v2363_v3 = vrot.slane %v2361_v46, 1  ;;  %v2433_v46 = vshll.u32 %v13357_v56, 16 }
 0x157   : > { %11128 = vmatprep.mubr.msk.bf16.mxu0 %vm253_vm1, %v12693_v8  ;;  %v13305_v8 = vld [vmem:[%s12864_s30 + $0x54] sm:$0xff]  }
 0x158   : > { %v2381_v25 = vshrl.u32 %v13305_v8, 16 }
 0x15e   : > { %11129 = vmatmul.mubr.msk.bf16.gmra.mrb[16].mxu0 %vm253_vm1, %v12694_v5  ;;  %v2369_v5 = vshll.u32 %v13301_v0, 16 }
 0x15f   : > { %11132 = vmatprep.mubr.msk.bf16.mxu0 %vm253_vm1, %v12695_v33  ;;  %v2356_v33 = vsel %vm435_vm2, %v2351_v61, %v2355_v62 }
 0x166   : > { %11133 = vmatmul.mubr.msk.bf16.gmra.mrb[20].mxu0 %vm253_vm1, %v12696_v9  ;;  %v2365_v9 = vshrl.u32 %v13289_v16, 16 }
 0x167   : > { %11136 = vmatprep.mubr.msk.bf16.mxu0 %vm253_vm1, %v12697_v10  ;;  %v2364_v10 = vsel %vm435_vm2, %v2359_v1, %v2363_v3 }
 0x16e   : > { %11137 = vmatmul.mubr.msk.bf16.gmra.mrb[24].mxu0 %vm253_vm1, %v12698_v12  ;;  %v2373_v12 = vshrl.u32 %v13301_v0, 16 }
 0x16f   : > { %11140 = vmatprep.mubr.msk.bf16.mxu0 %vm253_vm1, %v12699_v17  ;;  %v2377_v17 = vshll.u32 %v13305_v8, 16 }
 0x171   : > { %v2379_v6 = vrot.slane %v2377_v17, 1 }
 0x173   : > { %v2383_v35 = vor.u32 %v2381_v25, %v2379_v6 }
 0x176   : > { %11141 = vmatmul.mubr.msk.bf16.gmra.mrb[28].mxu0 %vm253_vm1, %v12700_v4  ;;  %v2371_v4 = vrot.slane %v2369_v5, 1  ;;  %v2441_v5 = vshll.u32 %v13361_v60, 16 }
 0x177   : > { %11144 = vmatprep.mubr.msk.bf16.mxu0 %vm253_vm1, %v12701_v18  ;;  %v13315_v18 = vld [vmem:[%s12864_s30 + $0x5c] sm:$0xff]  }
 0x178   : > { %v2443_v17 = vrot.slane %v2441_v5, 1 }
 0x17e   : > { %11145 = vmatmul.mubr.msk.bf16.gmra.mrb[32].mxu0 %vm253_vm1, %v12702_v19  ;;  %v2367_v19 = vor.u32 %v2365_v9, %v2363_v3  ;;  %v2437_v3 = vshrl.u32 %v13357_v56, 16  ;;  %v13371_v9 = vld [vmem:[%s12864_s30 + $0x9c] sm:$0xff]  }
 0x17f   : > { %11148 = vmatprep.mubr.msk.bf16.mxu0 %vm253_vm1, %v12703_v20  ;;  %v2375_v20 = vor.u32 %v2373_v12, %v2371_v4 }
 0x180   : > { %v2372_v22 = vsel %vm435_vm2, %v2367_v19, %v2371_v4  ;;  %v13375_v4 = vld [vmem:[%s12864_s30 + $0xa4] sm:$0xff]   ;;  %v2449_v19 = vshll.u32 %v13371_v9, 16 }
 0x181   : > { %v2457_v25 = vshll.u32 %v13375_v4, 16 }
 0x186   : > { %11149 = vmatmul.mubr.msk.bf16.gmra.mrb[36].mxu0 %vm253_vm1, %v12704_v13  ;;  %v13319_v13 = vld [vmem:[%s12864_s30 + $0x64] sm:$0xff]  }
 0x187   : > { %11152 = vmatprep.mubr.msk.bf16.mxu0 %vm253_vm1, %v12705_v21  ;;  %v2385_v21 = vshll.u32 %v13315_v18, 16  ;;  %v2393_v23 = vshll.u32 %v13319_v13, 16  ;;  %v2397_v38 = vshrl.u32 %v13319_v13, 16 }
 0x189   : > { %v2387_v28 = vrot.slane %v2385_v21, 1 }
 0x18e   : > { %11153 = vmatmul.mubr.msk.bf16.gmra.mrb[40].mxu0 %vm253_vm1, %v12706_v27  ;;  %v2380_v27 = vsel %vm435_vm2, %v2375_v20, %v2379_v6  ;;  %v2445_v6 = vshrl.u32 %v13361_v60, 16 }
 0x18f   : > { %11156 = vmatprep.mubr.msk.bf16.mxu0 %vm253_vm1, %v12707_v15  ;;  %v2389_v15 = vshrl.u32 %v13315_v18, 16 }
 0x191   : > { %v2391_v39 = vor.u32 %v2389_v15, %v2387_v28  ;;  %v13385_v15 = vld [vmem:[%s12864_s30 + $0xac] sm:$0xff]  }
 0x196   : > { %11157 = vmatmul.mubr.msk.bf16.gmra.mrb[44].mxu0 %vm253_vm1, %v12708_v36  ;;  %v2395_v36 = vrot.slane %v2393_v23, 1  ;;  %v2447_v23 = vor.u32 %v2445_v6, %v2443_v17 }
 0x197   : > { %11162 = vmatprep.mubr.msk.bf16.mxu0 %vm253_vm1, %v2316_v37  ;;  %v2388_v37 = vsel %vm435_vm2, %v2383_v35, %v2387_v28  ;;  %v2459_v35 = vrot.slane %v2457_v25, 1 }
 0x198   : > { %v2396_v50 = vsel %vm435_vm2, %v2391_v39, %v2395_v36  ;;  %v2399_v48 = vor.u32 %v2397_v38, %v2395_v36  ;;  %v13389_v39 = vld [vmem:[%s12864_s30 + $0xb4] sm:$0xff]   ;;  %v2465_v36 = vshll.u32 %v13385_v15, 16 }
 0x19a   : > { %v2404_v11 = vsel %vm435_vm2, %v2399_v48, %v2403_v57  ;;  %v2467_v44 = vrot.slane %v2465_v36, 1  ;;  %v2868_v36 = vrot.slane %v13289_v16, 1  ;;  %v2876_v16 = vrot.slane %v13319_v13, 1 }
 0x19e   : > { %11163 = vmatmul.mubr.msk.bf16.vlgmr.msra.gmra.mrb[0].mxu0 %vm253_vm1, %v2324_v63  ;;  %v2407_v63 = vor.u32 %v2405_v52, %v2403_v57  ;;  %v2473_v52 = vshll.u32 %v13389_v39, 16  ;;  %v13399_v57 = vld [vmem:[%s12864_s30 + $0xbc] sm:$0xff]  }
 0x19f   : > { %11211 = vmatpush3.bf16.msra.mxu0 %v2977_v49  ;;  %11166 = vmatprep.mubr.msk.bf16.mxu0 %vm253_vm1, %v2332_v51  ;;  %v13347_v49 = vld [vmem:[%s12864_s30 + $0x84] sm:$0xff]   ;;  %v2417_v51 = vshll.u32 %v13343_v59, 16 }
 0x1a0   : > { %12634 = vmatprep.subr.msk.bf16.mxu0 %vm704_vm0, %v13281_v53  ;;  %v2412_v26 = vsel %vm435_vm2, %v2407_v63, %v2411_v2  ;;  %v2425_v55 = vshll.u32 %v13347_v49, 16  ;;  %v2429_v61 = vshrl.u32 %v13347_v49, 16  ;;  %v2884_v13 = vrot.slane %v13347_v49, 1 }
 0x1a1   : > { %v2419_v43 = vrot.slane %v2417_v51, 1  ;;  %v13403_v51 = vld [vmem:[%s12864_s30 + $0xc4] sm:$0xff]   ;;  %v2892_v49 = vrot.slane %v13375_v4, 1 }
 0x1a3   : > { %v2423_v29 = vor.u32 %v2421_v54, %v2419_v43 }
 0x1a6   : > { %11167 = vmatmul.mubr.msk.bf16.gmra.mrb[4].mxu0 %vm253_vm1, %v2340_v58  ;;  %v2415_v58 = vor.u32 %v2413_v14, %v2411_v2  ;;  %v2475_v2 = vrot.slane %v2473_v52, 1 }
 0x1a7   : > { %11170 = vmatprep.mubr.msk.bf16.mxu0 %vm253_vm1, %v2348_v31  ;;  %v2427_v31 = vrot.slane %v2425_v55, 1  ;;  %v2485_v55 = vshrl.u32 %v13399_v57, 16 }
 0x1a8   : > { %v2420_v62 = vsel %vm435_vm2, %v2415_v58, %v2419_v43  ;;  %v2489_v43 = vshll.u32 %v13403_v51, 16 }
 0x1a9   : > { %v2428_v1 = vsel %vm435_vm2, %v2423_v29, %v2427_v31 }
 0x1ae   : > { %11171 = vmatmul.mubr.msk.bf16.gmra.mrb[8].mxu0 %vm253_vm1, %v2356_v33  ;;  %v2435_v33 = vrot.slane %v2433_v46, 1 }
 0x1af   : > { %11174 = vmatprep.mubr.msk.bf16.mxu0 %vm253_vm1, %v2364_v10  ;;  %v2431_v10 = vor.u32 %v2429_v61, %v2427_v31  ;;  %v13414_v31 = vld [vmem:[%s12864_s30 + $0xcc] ss:$0 sps:$4 sm:$0x11]   ;;  %v2849_v61 = vld [vmem:[%s12864_s30 + $0xc] sm:$0xe] }
 0x1b0   : > { %v2439_v12 = vor.u32 %v2437_v3, %v2435_v33  ;;  %v2493_v3 = vshrl.u32 %v13403_v51, 16  ;;  %v2497_v5 = vshll.u32 %v13414_v31, 16 }
 0x1b1   : > { %v2436_v20 = vsel %vm435_vm2, %v2431_v10, %v2435_v33  ;;  %v10132_v10 = vcombine.low %v2849_v61, %v13235_v7  ;;  %v2860_v7 = vrot.slane %v13254_v34, 1  ;;  %v2864_v34 = vrot.slane %v13268_v45, 1 }
 0x1b2   : > { %v2444_v21 = vsel %vm435_vm2, %v2439_v12, %v2443_v17  ;;  %v2499_v17 = vrot.slane %v2497_v5, 1  ;;  %v2870_v45 = vrot.slane %v13301_v0, 1  ;;  %v2878_v0 = vrot.slane %v13329_v30, 1  ;;  %v12740_v5 = vld [vmem:[%s12864_s30 + $0x40] sm:$0xff]  }
 0x1b3   : > { %v2886_v30 = vrot.slane %v13357_v56, 1  ;;  %v2894_v56 = vrot.slane %v13385_v15, 1 }
 0x1b6   : > { %11175 = vmatmul.mubr.msk.bf16.gmra.mrb[12].mxu0 %vm253_vm1, %v2372_v22  ;;  %v2453_v22 = vshrl.u32 %v13371_v9, 16 }
 0x1b7   : > { %11178 = vmatprep.mubr.msk.bf16.mxu0 %vm253_vm1, %v2380_v27  ;;  %v2451_v27 = vrot.slane %v2449_v19, 1  ;;  %v2855_v19 = vrot.slane %v10132_v10, 1  ;;  %v12742_v10 = vld [vmem:[%s12864_s30 + $0x50] sm:$0xff]  }
 0x1b9   : > { %v2455_v28 = vor.u32 %v2453_v22, %v2451_v27  ;;  %v2452_v47 = vsel %vm435_vm2, %v2447_v23, %v2451_v27  ;;  %v2858_v22 = vrot.slane %v13250_v32, 1  ;;  %v3495_v27 = vsel %vm704_vm0, %v13281_v53, 0 }
 0x1ba   : > { %v2862_v32 = vrot.slane %v13264_v40, 1 }
 0x1bb   : > { %v2460_v38 = vsel %vm435_vm2, %v2455_v28, %v2459_v35  ;;  %v2861_v23 = vsel %vm1215_vm3, %v2858_v22, %v2860_v7 }
 0x1bc   : > { %v2863_v53 = vsel %vm1215_vm3, %v2860_v7, %v2862_v32  ;;  %v2865_v28 = vsel %vm1215_vm3, %v2862_v32, %v2864_v34  ;;  %v12750_v7 = vld [vmem:[%s12864_s30 + $0x90] sm:$0xff]   ;;  %v4994_v32 = vld [vmem:[%s15800_s5 + $0x8] sm:$0xff] }
 0x1be   : > { %11179 = vmatmul.mubr.msk.bf16.gmra.mrb[16].mxu0 %vm253_vm1, %v2388_v37  ;;  %v2461_v37 = vshrl.u32 %v13375_v4, 16  ;;  %v2898_v4 = vrot.slane %v13399_v57, 1 }
 0x1bf   : > { %11182 = vmatprep.mubr.msk.bf16.mxu0 %vm253_vm1, %v2396_v50  ;;  %v2469_v50 = vshrl.u32 %v13385_v15, 16 }
 0x1c0   : > { %v2463_v48 = vor.u32 %v2461_v37, %v2459_v35  ;;  %v2866_v35 = vrot.slane %v13285_v42, 1  ;;  %v2872_v37 = vrot.slane %v13305_v8, 1  ;;  %v2874_v42 = vrot.slane %v13315_v18, 1 }
 0x1c1   : > { %v2471_v63 = vor.u32 %v2469_v50, %v2467_v44  ;;  %v2880_v8 = vrot.slane %v13333_v41, 1  ;;  %v2882_v18 = vrot.slane %v13343_v59, 1  ;;  %v2888_v41 = vrot.slane %v13361_v60, 1 }
 0x1c2   : > { %v2468_v14 = vsel %vm435_vm2, %v2463_v48, %v2467_v44  ;;  %v2869_v40 = vsel %vm1215_vm3, %v2866_v35, %v2868_v36  ;;  %v2873_v50 = vsel %vm1215_vm3, %v2870_v45, %v2872_v37  ;;  %v2875_v52 = vsel %vm1215_vm3, %v2872_v37, %v2874_v42  ;;  %v12754_v37 = vld [vmem:[%s12864_s30 + $0xb0] sm:$0xff]  }
 0x1c3   : > { %v2476_v54 = vsel %vm435_vm2, %v2471_v63, %v2475_v2  ;;  %v2877_v44 = vsel %vm1215_vm3, %v2874_v42, %v2876_v16  ;;  %v2879_v48 = vsel %vm1215_vm3, %v2876_v16, %v2878_v0  ;;  %v2881_v63 = vsel %vm1215_vm3, %v2878_v0, %v2880_v8  ;;  %v5000_v42 = vld [vmem:[%s15800_s5 + $0x38] sm:$0xff]  ;;  %v5001_v16 = vld [vmem:[%s15800_s5 + $0x40] sm:$0xff]  ;;  %v5002_v0 = vld [vmem:[%s15800_s5 + $0x48] sm:$0xff] }
 0x1c4   : > { %v2890_v59 = vrot.slane %v13371_v9, 1  ;;  %v2896_v60 = vrot.slane %v13389_v39, 1 }
 0x1c6   : > { %11183 = vmatmul.mubr.msk.bf16.gmra.mrb[20].mxu0 %vm253_vm1, %v2404_v11  ;;  %v2481_v11 = vshll.u32 %v13399_v57, 16  ;;  %v2897_v9 = vsel %vm1215_vm3, %v2894_v56, %v2896_v60  ;;  %v12736_v57 = vld [vmem:[%s12864_s30 + $0x20] sm:$0xff]  }
 0x1c7   : > { %11186 = vmatprep.mubr.msk.bf16.mxu0 %vm253_vm1, %v2412_v26  ;;  %v2477_v26 = vshrl.u32 %v13389_v39, 16  ;;  %v2902_v39 = vrot.slane %v13414_v31, 1  ;;  %v13516_v31 = vld [vmem:[%s15796_s1 + $0x20] sm:$0xf] }
 0x1c8   : > { %v2483_v58 = vrot.slane %v2481_v11, 1  ;;  %v2885_v11 = vsel %vm1215_vm3, %v2882_v18, %v2884_v13 }
 0x1c9   : > { %v2479_v29 = vor.u32 %v2477_v26, %v2475_v2  ;;  %v2883_v2 = vsel %vm1215_vm3, %v2880_v8, %v2882_v18  ;;  %v2889_v26 = vsel %vm1215_vm3, %v2886_v30, %v2888_v41  ;;  %v5003_v8 = vld [vmem:[%s15800_s5 + $0x50] sm:$0xff] }
 0x1ca   : > { %v2487_v46 = vor.u32 %v2485_v55, %v2483_v58  ;;  %v2893_v55 = vsel %vm1215_vm3, %v2890_v59, %v2892_v49 }
 0x1ce   : > { %11187 = vmatmul.mubr.msk.bf16.gmra.mrb[24].mxu0 %vm253_vm1, %v2420_v62  ;;  %v2491_v62 = vrot.slane %v2489_v43, 1  ;;  %v2895_v43 = vsel %vm1215_vm3, %v2892_v49, %v2894_v56  ;;  %v5006_v49 = vld [vmem:[%s15800_s5 + $0x68] sm:$0xff] }
 0x1cf   : > { %11190 = vmatprep.mubr.msk.bf16.mxu0 %vm253_vm1, %v2428_v1  ;;  %v2484_v1 = vsel %vm435_vm2, %v2479_v29, %v2483_v58  ;;  %v2900_v58 = vrot.slane %v13403_v51, 1  ;;  %v2899_v29 = vsel %vm1215_vm3, %v2896_v60, %v2898_v4  ;;  %v12737_v51 = vld [vmem:[%s12864_s30 + $0x28] sm:$0xff]  }
 0x1d0   : > { %v2492_v33 = vsel %vm435_vm2, %v2487_v46, %v2491_v62  ;;  %v2495_v12 = vor.u32 %v2493_v3, %v2491_v62  ;;  %v12735_v62 = vld [vmem:[%s12864_s30 + $0x18] sm:$0xff]  }
 0x1d1   : > { %v2901_v15 = vsel %vm1215_vm3, %v2898_v4, %v2900_v58  ;;  %v2903_v46 = vsel %vm1215_vm3, %v2900_v58, %v2902_v39  ;;  %v12739_v3 = vld [vmem:[%s12864_s30 + $0x38] sm:$0xff]   ;;  %v5009_v39 = vld [vmem:[%s15800_s5 + $0x80] sm:$0xff] }
 0x1d2   : > { %v2500_v6 = vsel %vm435_vm2, %v2495_v12, %v2499_v17  ;;  %v12743_v12 = vld [vmem:[%s12864_s30 + $0x58] sm:$0xff]   ;;  %v12744_v17 = vld [vmem:[%s12864_s30 + $0x60] sm:$0xff]  }
 0x1d6   : > { %11191 = vmatmul.mubr.msk.bf16.gmra.mrb[28].mxu0 %vm253_vm1, %v2436_v20  ;;  %v2856_v20 = vrot.slane %v13243_v24, 1  ;;  %v13438_v24 = vld [vmem:[%s15796_s1 + $0x1c] sm:$0xf] }
 0x1d7   : > { %11194 = vmatprep.mubr.msk.bf16.mxu0 %vm253_vm1, %v2444_v21  ;;  %v4213_v61 = vsel %vm704_vm0, %v13438_v24, 0 }
 0x1d8   : > { %v2857_v21 = vsel %vm1215_vm3, %v2855_v19, %v2856_v20  ;;  %v2859_v25 = vsel %vm1215_vm3, %v2856_v20, %v2858_v22  ;;  %v12745_v19 = vld [vmem:[%s12864_s30 + $0x68] sm:$0xff]   ;;  %v12746_v20 = vld [vmem:[%s12864_s30 + $0x70] sm:$0xff]  }
 0x1d9   : > { %v12749_v22 = vld [vmem:[%s12864_s30 + $0x88] sm:$0xff]  }
 0x1de   : > { %11195 = vmatmul.mubr.msk.bf16.gmra.mrb[32].mxu0 %vm253_vm1, %v2452_v47  ;;  %v2867_v47 = vsel %vm1215_vm3, %v2864_v34, %v2866_v35  ;;  %v12752_v34 = vld [vmem:[%s12864_s30 + $0xa0] sm:$0xff]  }
 0x1df   : > { %11198 = vmatprep.mubr.msk.bf16.mxu0 %vm253_vm1, %v2460_v38  ;;  %v2871_v38 = vsel %vm1215_vm3, %v2868_v36, %v2870_v45  ;;  %v4997_v35 = vld [vmem:[%s15800_s5 + $0x20] sm:$0xff]  ;;  %v4998_v36 = vld [vmem:[%s15800_s5 + $0x28] sm:$0xff]  ;;  %v4999_v45 = vld [vmem:[%s15800_s5 + $0x30] sm:$0xff] }
 0x1e6   : > { %11199 = vmatmul.mubr.msk.bf16.gmra.mrb[36].mxu0 %vm253_vm1, %v2468_v14  ;;  %v2887_v14 = vsel %vm1215_vm3, %v2884_v13, %v2886_v30  ;;  %v5004_v30 = vld [vmem:[%s15800_s5 + $0x58] sm:$0xff] }
 0x1e7   : > { %11202 = vmatprep.mubr.msk.bf16.mxu0 %vm253_vm1, %v2476_v54  ;;  %v2891_v54 = vsel %vm1215_vm3, %v2888_v41, %v2890_v59  ;;  %v5005_v41 = vld [vmem:[%s15800_s5 + $0x60] sm:$0xff]  ;;  %v13618_v59 = vld [vmem:[%s12864_s30 + $0x30] sm:$0xff]  }
 0x1e8   : > { %v3968_v4 = vshll.u32 %v13618_v59, 16 }
 0x1ee   : > { %11203 = vmatmul.mubr.msk.bf16.gmra.mrb[40].mxu0 %vm253_vm1, %v2484_v1  ;;  %v12738_v1 = vld [vmem:[%s12864_s30 + $0x30] sm:$0xff]  }
 0x1ef   : > { %11206 = vmatprep.mubr.msk.bf16.mxu0 %vm253_vm1, %v2492_v33  ;;  %v12741_v33 = vld [vmem:[%s12864_s30 + $0x48] sm:$0xff]  }
 0x1f6   : > { %11207 = vmatmul.mubr.msk.bf16.gmra.mrb[44].mxu0 %vm253_vm1, %v2500_v6  ;;  %v12747_v6 = vld [vmem:[%s12864_s30 + $0x78] sm:$0xff]  }
 0x1f7   : > { %11212 = vmatprep.mubr.msk.bf16.mxu0 %vm253_vm1, %v2857_v21  ;;  %v12748_v21 = vld [vmem:[%s12864_s30 + $0x80] sm:$0xff]  }
 0x1fe   : > { %11213 = vmatmul.mubr.msk.bf16.vlgmr.msra.gmra.mrb[0].mxu0 %vm253_vm1, %v2859_v25  ;;  %v12751_v25 = vld [vmem:[%s12864_s30 + $0x98] sm:$0xff]  }
 0x1ff   : > { %11261 = vmatpush3.bf16.msra.mxu0 %v3495_v27  ;;  %11216 = vmatprep.mubr.msk.bf16.mxu0 %vm253_vm1, %v2861_v23  ;;  %v4993_v27 = vld [vmem:[%s15800_s5] sm:$0xff]  ;;  %v4995_v23 = vld [vmem:[%s15800_s5 + $0x10] sm:$0xff] }
 0x200   : > { %12635 = vmatprep.subr.msk.bf16.mxu0 %vm704_vm0, %v13438_v24  ;;  %v12805_v24 = vmov 0  }
 0x201   : > { %12657 = vset.pattern.permute.xlu0 %v12805_v24  ;;  %254 = vst.msk [vmem:[#allocation2] sm:$0xff] %vm253_vm1, %v12805_v24  ;;  %255 = vst.msk [vmem:[#allocation2 + $0x8] sm:$0xff] %vm253_vm1, %v12805_v24  ;;  %12658 = vset.pattern.permute.xlu1 %v12805_v24 }
 0x202   : > { %256 = vst.msk [vmem:[#allocation2 + $0xd0] sm:$0xff] %vm253_vm1, %v12805_v24  ;;  %257 = vst.msk [vmem:[#allocation2 + $0xd8] sm:$0xff] %vm253_vm1, %v12805_v24  ;;  %5043 = vperm.xlu0 %12657, %v4993_v27   ;;  %5053 = vperm.xlu1 %12658, %v4995_v23   ;;  %v13672_v27 = vld [vmem:[%s12864_s30 + $0x50] sm:$0xff]   ;;  %v5014_v23 = vld [vmem:[%s15800_s5 + $0xa8] sm:$0xff] }
 0x203   : > { %v5015_v24 = vld [vmem:[%s15800_s5 + $0xb0] sm:$0xff] }
 0x206   : > { %11217 = vmatmul.mubr.msk.bf16.gmra.mrb[4].mxu0 %vm253_vm1, %v2863_v53  ;;  %v12753_v53 = vld [vmem:[%s12864_s30 + $0xa8] sm:$0xff]   ;;  %5048 = vperm.xlu0 %12657, %v4994_v32  }
 0x207   : > { %11220 = vmatprep.mubr.msk.bf16.mxu0 %vm253_vm1, %v2865_v28  ;;  %v4996_v28 = vld [vmem:[%s15800_s5 + $0x18] sm:$0xff] }
 0x208   : > { %5058 = vperm.xlu1 %12658, %v4996_v28  }
 0x20a   : > { %5063 = vperm.xlu0 %12657, %v4997_v35  }
 0x20c   : > { %5068 = vperm.xlu1 %12658, %v4998_v36   ;;  %v4000_v36 = vshll.u32 %v13672_v27, 16 }
 0x20e   : > { %11221 = vmatmul.mubr.msk.bf16.gmra.mrb[8].mxu0 %vm253_vm1, %v2867_v47  ;;  %v3770_v47 = vld [vmem:[%s12864_s30 + $0x18] sm:$0xf]  ;;  %5073 = vperm.xlu0 %12657, %v4999_v45  }
 0x20f   : > { %11224 = vmatprep.mubr.msk.bf16.mxu0 %vm253_vm1, %v2869_v40  ;;  %v13578_v40 = vld [vmem:[%s12864_s30 + $0x1c] sm:$0xf] }
 0x210   : > { %5078 = vperm.xlu1 %12658, %v5000_v42   ;;  %v13688_v45 = vld [vmem:[%s12864_s30 + $0x58] sm:$0xff]  }
 0x212   : > { %5083 = vperm.xlu0 %12657, %v5001_v16   ;;  %v4002_v16 = vrot.slane %v4000_v36, 1  ;;  %v13776_v36 = vld [vmem:[%s12864_s30 + $0x90] sm:$0xff]  }
 0x214   : > { %5088 = vperm.xlu1 %12658, %v5002_v0   ;;  %v5018_v0 = vld [vmem:[%s15800_s5 + $0xc8] sm:$0xff] }
 0x216   : > { %11225 = vmatmul.mubr.msk.bf16.gmra.mrb[12].mxu0 %vm253_vm1, %v2871_v38  ;;  %v12755_v38 = vld [vmem:[%s12864_s30 + $0xb8] sm:$0xff]   ;;  %5093 = vperm.xlu0 %12657, %v5003_v8   ;;  %v5019_v8 = vld [vmem:[%s15800_s5 + $0xd0] sm:$0xff] }
 0x217   : > { %11228 = vmatprep.mubr.msk.bf16.mxu0 %vm253_vm1, %v2873_v50  ;;  %v10207_v50 = vcombine.low %v3770_v47, %v13578_v40 }
 0x218   : > { %5098 = vperm.xlu1 %12658, %v5004_v30  }
 0x219   : > { %v3945_v18 = vshrl.u32 %v10207_v50, 16 }
 0x21a   : > { %5103 = vperm.xlu0 %12657, %v5005_v41  }
 0x21c   : > { %5108 = vperm.xlu1 %12658, %v5006_v49   ;;  %v5021_v49 = vld [vmem:[%s15800_s5 + $0xe0] sm:$0xff] }
 0x21e   : > { %11229 = vmatmul.mubr.msk.bf16.gmra.mrb[16].mxu0 %vm253_vm1, %v2875_v52  ;;  %v13595_v52 = vld [vmem:[%s12864_s30 + $0x20] sm:$0xff]  }
 0x21f   : > { %11232 = vmatprep.mubr.msk.bf16.mxu0 %vm253_vm1, %v2877_v44  ;;  %v3947_v44 = vshll.u32 %v10207_v50, 16  ;;  %v3956_v60 = vshrl.u32 %v13595_v52, 16 }
 0x221   : > { %v3949_v13 = vrot.slane %v3947_v44, 1  ;;  %v13698_v44 = vld [vmem:[%s12864_s30 + $0x60] sm:$0xff]  }
 0x222   : > { %v4016_v30 = vshll.u32 %v13698_v44, 16 }
 0x226   : > { %11233 = vmatmul.mubr.msk.bf16.gmra.mrb[20].mxu0 %vm253_vm1, %v2879_v48  ;;  %v12756_v48 = vld [vmem:[%s12864_s30 + $0xc0] sm:$0xff]  }
 0x227   : > { %11236 = vmatprep.mubr.msk.bf16.mxu0 %vm253_vm1, %v2881_v63  ;;  %v12757_v63 = vld [vmem:[%s12864_s30 + $0xc8] sm:$0xff]  }
 0x22e   : > { %11237 = vmatmul.mubr.msk.bf16.gmra.mrb[24].mxu0 %vm253_vm1, %v2883_v2  ;;  %v3952_v2 = vshll.u32 %v13595_v52, 16 }
 0x22f   : > { %11240 = vmatprep.mubr.msk.bf16.mxu0 %vm253_vm1, %v2885_v11  ;;  %v13608_v11 = vld [vmem:[%s12864_s30 + $0x28] sm:$0xff]  }
 0x230   : > { %v3960_v56 = vshll.u32 %v13608_v11, 16 }
 0x232   : > { %v3962_v58 = vrot.slane %v3960_v56, 1  ;;  %v4018_v56 = vrot.slane %v4016_v30, 1 }
 0x236   : > { %11241 = vmatmul.mubr.msk.bf16.gmra.mrb[28].mxu0 %vm253_vm1, %v2887_v14  ;;  %v3950_v14 = vor.u32 %v3949_v13, %v3945_v18  ;;  %v4004_v18 = vshrl.u32 %v13672_v27, 16 }
 0x237   : > { %11244 = vmatprep.mubr.msk.bf16.mxu0 %vm253_vm1, %v2889_v26  ;;  %v3954_v26 = vrot.slane %v3952_v2, 1  ;;  %v4012_v2 = vshrl.u32 %v13688_v45, 16 }
 0x23e   : > { %11245 = vmatmul.mubr.msk.bf16.gmra.mrb[32].mxu0 %vm253_vm1, %v2891_v54  ;;  %v5007_v54 = vld [vmem:[%s15800_s5 + $0x70] sm:$0xff] }
 0x23f   : > { %11248 = vmatprep.mubr.msk.bf16.mxu0 %vm253_vm1, %v2893_v55  ;;  %v12758_v55 = vld [vmem:[%s12864_s30 + $0xd0] sm:$0xff]   ;;  %5113 = vperm.xlu0 %12657, %v5007_v54   ;;  %v4006_v54 = vor.u32 %v4004_v18, %v4002_v16  ;;  %v5032_v18 = vld [vmem:[%s15800_s5 + $0x138] sm:$0xff] }
 0x243   : > { %5123 = vperm.xlu0 %12657, %v5009_v39  }
 0x246   : > { %11249 = vmatmul.mubr.msk.bf16.gmra.mrb[36].mxu0 %vm253_vm1, %v2895_v43  ;;  %v3955_v43 = vsel %vm435_vm2, %v3950_v14, %v3954_v26  ;;  %v13714_v14 = vld [vmem:[%s12864_s30 + $0x68] sm:$0xff]  }
 0x247   : > { %11252 = vmatprep.mubr.msk.bf16.mxu0 %vm253_vm1, %v2897_v9  ;;  %v3964_v9 = vshrl.u32 %v13608_v11, 16 }
 0x24e   : > { %11253 = vmatmul.mubr.msk.bf16.gmra.mrb[40].mxu0 %vm253_vm1, %v2899_v29  ;;  %v13634_v29 = vld [vmem:[%s12864_s30 + $0x38] sm:$0xff]  }
 0x24f   : > { %11256 = vmatprep.mubr.msk.bf16.mxu0 %vm253_vm1, %v2901_v15  ;;  %v5008_v15 = vld [vmem:[%s15800_s5 + $0x78] sm:$0xff] }
 0x250   : > { %5118 = vperm.xlu1 %12658, %v5008_v15   ;;  %v4020_v15 = vshrl.u32 %v13698_v44, 16 }
 0x256   : > { %11257 = vmatmul.mubr.msk.bf16.gmra.mrb[44].mxu0 %vm253_vm1, %v2903_v46  ;;  %v3958_v46 = vor.u32 %v3956_v60, %v3954_v26  ;;  %v5020_v26 = vld [vmem:[%s15800_s5 + $0xd8] sm:$0xff]  ;;  %v13724_v60 = vld [vmem:[%s12864_s30 + $0x70] sm:$0xff]  }
 0x257   : > { %11262 = vmatprep.mubr.msk.bf16.mxu0 %vm253_vm1, %v12735_v62  ;;  %v3966_v62 = vor.u32 %v3964_v9, %v3962_v58  ;;  %v5023_v9 = vld [vmem:[%s15800_s5 + $0xf0] sm:$0xff] }
 0x25e   : > { %11263 = vmatmul.mubr.msk.bf16.vlgmr.msra.gmra.mrb[0].mxu0 %vm253_vm1, %v12736_v57  ;;  %v3970_v57 = vrot.slane %v3968_v4, 1  ;;  %v4024_v4 = vshll.u32 %v13714_v14, 16 }
 0x25f   : > { %11311 = vmatpush3.bf16.msra.mxu0 %v4213_v61  ;;  %11266 = vmatprep.mubr.msk.bf16.mxu0 %vm253_vm1, %v12737_v51  ;;  %v13644_v51 = vld [vmem:[%s12864_s30 + $0x40] sm:$0xff]   ;;  %v5010_v61 = vld [vmem:[%s15800_s5 + $0x88] sm:$0xff] }
 0x260   : > { %12636 = vmatprep.subr.msk.bf16.mxu0 %vm704_vm0, %v13516_v31  ;;  %5128 = vperm.xlu1 %12658, %v5010_v61   ;;  %v13740_v61 = vld [vmem:[%s12864_s30 + $0x78] sm:$0xff]  }
 0x266   : > { %11267 = vmatmul.mubr.msk.bf16.gmra.mrb[4].mxu0 %vm253_vm1, %v12738_v1  ;;  %v5011_v1 = vld [vmem:[%s15800_s5 + $0x90] sm:$0xff] }
 0x267   : > { %11270 = vmatprep.mubr.msk.bf16.mxu0 %vm253_vm1, %v12739_v3  ;;  %v3976_v3 = vshll.u32 %v13634_v29, 16  ;;  %5133 = vperm.xlu0 %12657, %v5011_v1   ;;  %v5024_v1 = vld [vmem:[%s15800_s5 + $0xf8] sm:$0xff] }
 0x26e   : > { %11271 = vmatmul.mubr.msk.bf16.gmra.mrb[8].mxu0 %vm253_vm1, %v12740_v5  ;;  %v3963_v5 = vsel %vm435_vm2, %v3958_v46, %v3962_v58  ;;  %v4028_v46 = vshrl.u32 %v13714_v14, 16 }
 0x26f   : > { %11274 = vmatprep.mubr.msk.bf16.mxu0 %vm253_vm1, %v12741_v33  ;;  %v3972_v33 = vshrl.u32 %v13618_v59, 16 }
 0x276   : > { %11275 = vmatmul.mubr.msk.bf16.gmra.mrb[12].mxu0 %vm253_vm1, %v12742_v10  ;;  %v4616_v10 = vsel %vm704_vm0, %v13516_v31, 0  ;;  %v5013_v31 = vld [vmem:[%s15800_s5 + $0xa0] sm:$0xff] }
 0x277   : > { %11278 = vmatprep.mubr.msk.bf16.mxu0 %vm253_vm1, %v12743_v12  ;;  %v3971_v12 = vsel %vm435_vm2, %v3966_v62, %v3970_v57  ;;  %5143 = vperm.xlu0 %12657, %v5013_v31   ;;  %v4032_v62 = vshll.u32 %v13724_v60, 16  ;;  %v4036_v31 = vshrl.u32 %v13724_v60, 16 }
 0x27b   : > { %5153 = vperm.xlu0 %12657, %v5015_v24   ;;  %v13766_v24 = vld [vmem:[%s12864_s30 + $0x88] sm:$0xff]  }
 0x27e   : > { %11279 = vmatmul.mubr.msk.bf16.gmra.mrb[16].mxu0 %vm253_vm1, %v12744_v17  ;;  %v3980_v17 = vshrl.u32 %v13634_v29, 16 }
 0x27f   : > { %11282 = vmatprep.mubr.msk.bf16.mxu0 %vm253_vm1, %v12745_v19  ;;  %v3984_v19 = vshll.u32 %v13644_v51, 16 }
 0x286   : > { %11283 = vmatmul.mubr.msk.bf16.gmra.mrb[20].mxu0 %vm253_vm1, %v12746_v20  ;;  %v3978_v20 = vrot.slane %v3976_v3, 1  ;;  %v5025_v3 = vld [vmem:[%s15800_s5 + $0x100] sm:$0xff] }
 0x287   : > { %11286 = vmatprep.mubr.msk.bf16.mxu0 %vm253_vm1, %v12747_v6  ;;  %v13662_v6 = vld [vmem:[%s12864_s30 + $0x48] sm:$0xff]  }
 0x288   : > { %v3992_v32 = vshll.u32 %v13662_v6, 16  ;;  %v3996_v35 = vshrl.u32 %v13662_v6, 16 }
 0x28a   : > { %v3994_v47 = vrot.slane %v3992_v32, 1  ;;  %v5028_v32 = vld [vmem:[%s15800_s5 + $0x118] sm:$0xff] }
 0x28c   : > { %v3998_v42 = vor.u32 %v3996_v35, %v3994_v47 }
 0x28e   : > { %11287 = vmatmul.mubr.msk.bf16.gmra.mrb[24].mxu0 %vm253_vm1, %v12748_v21  ;;  %v5012_v21 = vld [vmem:[%s15800_s5 + $0x98] sm:$0xff]  ;;  %v4003_v13 = vsel %vm435_vm2, %v3998_v42, %v4002_v16 }
 0x28f   : > { %11290 = vmatprep.mubr.msk.bf16.mxu0 %vm253_vm1, %v12749_v22  ;;  %v3974_v22 = vor.u32 %v3972_v33, %v3970_v57  ;;  %5138 = vperm.xlu1 %12658, %v5012_v21   ;;  %v4026_v57 = vrot.slane %v4024_v4, 1 }
 0x291   : > { %v4030_v33 = vor.u32 %v4028_v46, %v4026_v57  ;;  %v5036_v46 = vld [vmem:[%s15800_s5 + $0x158] sm:$0xff] }
 0x293   : > { %5148 = vperm.xlu1 %12658, %v5014_v23  }
 0x296   : > { %11291 = vmatmul.mubr.msk.bf16.gmra.mrb[28].mxu0 %vm253_vm1, %v12750_v7  ;;  %v3982_v7 = vor.u32 %v3980_v17, %v3978_v20  ;;  %v5026_v17 = vld [vmem:[%s15800_s5 + $0x108] sm:$0xff] }
 0x297   : > { %11294 = vmatprep.mubr.msk.bf16.mxu0 %vm253_vm1, %v12751_v25  ;;  %v3986_v25 = vrot.slane %v3984_v19, 1  ;;  %v5027_v19 = vld [vmem:[%s15800_s5 + $0x110] sm:$0xff] }
 0x299   : > { %v3987_v28 = vsel %vm435_vm2, %v3982_v7, %v3986_v25  ;;  %v4044_v7 = vshrl.u32 %v13740_v61, 16 }
 0x29e   : > { %11295 = vmatmul.mubr.msk.bf16.gmra.mrb[32].mxu0 %vm253_vm1, %v12752_v34  ;;  %v3979_v34 = vsel %vm435_vm2, %v3974_v22, %v3978_v20  ;;  %v4040_v20 = vshll.u32 %v13740_v61, 16 }
 0x29f   : > { %11298 = vmatprep.mubr.msk.bf16.mxu0 %vm253_vm1, %v12753_v53  ;;  %v3988_v53 = vshrl.u32 %v13644_v51, 16 }
 0x2a0   : > { %v4042_v23 = vrot.slane %v4040_v20, 1 }
 0x2a1   : > { %v3990_v50 = vor.u32 %v3988_v53, %v3986_v25 }
 0x2a6   : > { %11299 = vmatmul.mubr.msk.bf16.gmra.mrb[36].mxu0 %vm253_vm1, %v12754_v37  ;;  %v5016_v37 = vld [vmem:[%s15800_s5 + $0xb8] sm:$0xff] }
 0x2a7   : > { %11302 = vmatprep.mubr.msk.bf16.mxu0 %vm253_vm1, %v12755_v38  ;;  %v5017_v38 = vld [vmem:[%s15800_s5 + $0xc0] sm:$0xff]  ;;  %5158 = vperm.xlu1 %12658, %v5016_v37   ;;  %v5031_v37 = vld [vmem:[%s15800_s5 + $0x130] sm:$0xff] }
 0x2a8   : > { %5163 = vperm.xlu0 %12657, %v5017_v38   ;;  %v4056_v38 = vshll.u32 %v13766_v24, 16 }
 0x2ab   : > { %5168 = vperm.xlu1 %12658, %v5018_v0   ;;  %v4060_v0 = vshrl.u32 %v13766_v24, 16 }
 0x2ac   : > { %5173 = vperm.xlu0 %12657, %v5019_v8   ;;  %v4064_v8 = vshll.u32 %v13776_v36, 16 }
 0x2ae   : > { %11303 = vmatmul.mubr.msk.bf16.gmra.mrb[40].mxu0 %vm253_vm1, %v12756_v48  ;;  %v4008_v48 = vshll.u32 %v13688_v45, 16 }
 0x2af   : > { %11306 = vmatprep.mubr.msk.bf16.mxu0 %vm253_vm1, %v12757_v63  ;;  %v3995_v63 = vsel %vm435_vm2, %v3990_v50, %v3994_v47  ;;  %5178 = vperm.xlu1 %12658, %v5020_v26   ;;  %v5030_v47 = vld [vmem:[%s15800_s5 + $0x128] sm:$0xff]  ;;  %v13802_v26 = vld [vmem:[%s12864_s30 + $0xa0] sm:$0xff]  }
 0x2b0   : > { %v4010_v41 = vrot.slane %v4008_v48, 1  ;;  %5183 = vperm.xlu0 %12657, %v5021_v49   ;;  %v4058_v48 = vrot.slane %v4056_v38, 1  ;;  %v5034_v49 = vld [vmem:[%s15800_s5 + $0x148] sm:$0xff]  ;;  %v4084_v20 = vshrl.u32 %v13802_v26, 16 }
 0x2b2   : > { %v4011_v58 = vsel %vm435_vm2, %v4006_v54, %v4010_v41  ;;  %v4062_v30 = vor.u32 %v4060_v0, %v4058_v48  ;;  %v5035_v54 = vld [vmem:[%s15800_s5 + $0x150] sm:$0xff]  ;;  %v13861_v0 = vld [vmem:[%s12864_s30 + $0xc8] sm:$0xff]  }
 0x2b4   : > { %5193 = vperm.xlu0 %12657, %v5023_v9  }
 0x2b6   : > { %11307 = vmatmul.mubr.msk.bf16.gmra.mrb[44].mxu0 %vm253_vm1, %v12758_v55  ;;  %v4014_v55 = vor.u32 %v4012_v2, %v4010_v41  ;;  %v4066_v41 = vrot.slane %v4064_v8, 1 }
 0x2b7   : > { %11312 = vmatprep.mubr.msk.bf16.mxu0 %vm253_vm1, %v3955_v43  ;;  %v5022_v43 = vld [vmem:[%s15800_s5 + $0xe8] sm:$0xff] }
 0x2b8   : > { %v4019_v39 = vsel %vm435_vm2, %v4014_v55, %v4018_v56  ;;  %5188 = vperm.xlu1 %12658, %v5022_v43   ;;  %5203 = vperm.xlu0 %12657, %v5025_v3   ;;  %v4068_v43 = vshrl.u32 %v13776_v36, 16  ;;  %v4067_v9 = vsel %vm435_vm2, %v4062_v30, %v4066_v41 }
 0x2bc   : > { %5198 = vperm.xlu1 %12658, %v5024_v1   ;;  %5213 = vperm.xlu0 %12657, %v5027_v19  }
 0x2be   : > { %11313 = vmatmul.mubr.msk.bf16.vlgmr.msra.gmra.mrb[0].mxu0 %vm253_vm1, %v3963_v5  ;;  %v4022_v5 = vor.u32 %v4020_v15, %v4018_v56 }
 0x2bf   : > { %11361 = vmatpush3.bf16.msra.mxu0 %v4616_v10  ;;  %11316 = vmatprep.mubr.msk.bf16.mxu0 %vm253_vm1, %v3971_v12  ;;  %v4034_v10 = vrot.slane %v4032_v62, 1  ;;  %v13750_v12 = vld [vmem:[%s12864_s30 + $0x80] sm:$0xff]  }
 0x2c0   : > { %v4027_v21 = vsel %vm435_vm2, %v4022_v5, %v4026_v57  ;;  %v4048_v25 = vshll.u32 %v13750_v12, 16  ;;  %5208 = vperm.xlu1 %12658, %v5026_v17   ;;  %v4052_v42 = vshrl.u32 %v13750_v12, 16  ;;  %v5037_v62 = vld [vmem:[%s15800_s5 + $0x160] sm:$0xff]  ;;  %v4070_v57 = vor.u32 %v4068_v43, %v4066_v41  ;;  %v13828_v5 = vld [vmem:[%s12864_s30 + $0xb0] sm:$0xff]  }
 0x2c1   : > { %v4035_v22 = vsel %vm435_vm2, %v4030_v33, %v4034_v10  ;;  %v4038_v53 = vor.u32 %v4036_v31, %v4034_v10  ;;  %v5038_v33 = vld [vmem:[%s15800_s5 + $0x168] sm:$0xff]  ;;  %v5039_v10 = vld [vmem:[%s15800_s5 + $0x170] sm:$0xff] }
 0x2c2   : > { %v4050_v35 = vrot.slane %v4048_v25, 1  ;;  %v13844_v25 = vld [vmem:[%s12864_s30 + $0xb8] sm:$0xff]  }
 0x2c3   : > { %v4043_v50 = vsel %vm435_vm2, %v4038_v53, %v4042_v23 }
 0x2c4   : > { %5218 = vperm.xlu1 %12658, %v5028_v32   ;;  %v4054_v2 = vor.u32 %v4052_v42, %v4050_v35 }
 0x2c6   : > { %11317 = vmatmul.mubr.msk.bf16.gmra.mrb[4].mxu0 %vm253_vm1, %v3979_v34  ;;  %v5029_v34 = vld [vmem:[%s15800_s5 + $0x120] sm:$0xff]  ;;  %v4059_v56 = vsel %vm435_vm2, %v4054_v2, %v4058_v48  ;;  %v4120_v2 = vshll.u32 %v13861_v0, 16 }
 0x2c7   : > { %11320 = vmatprep.mubr.msk.bf16.mxu0 %vm253_vm1, %v3987_v28  ;;  %v4046_v28 = vor.u32 %v4044_v7, %v4042_v23  ;;  %5223 = vperm.xlu0 %12657, %v5029_v34   ;;  %v5040_v23 = vld [vmem:[%s15800_s5 + $0x178] sm:$0xff] }
 0x2c8   : > { %5228 = vperm.xlu1 %12658, %v5030_v47  }
 0x2c9   : > { %v4051_v16 = vsel %vm435_vm2, %v4046_v28, %v4050_v35  ;;  %v13851_v28 = vld [vmem:[%s12864_s30 + $0xc0] sm:$0xff]   ;;  %v4104_v35 = vshll.u32 %v13844_v25, 16 }
 0x2ca   : > { %v4112_v42 = vshll.u32 %v13851_v28, 16  ;;  %v4116_v41 = vshrl.u32 %v13851_v28, 16 }
 0x2cb   : > { %5233 = vperm.xlu0 %12657, %v5031_v37   ;;  %v4100_v37 = vshrl.u32 %v13828_v5, 16 }
 0x2cc   : > { %5238 = vperm.xlu1 %12658, %v5032_v18   ;;  %v4114_v18 = vrot.slane %v4112_v42, 1 }
 0x2ce   : > { %11321 = vmatmul.mubr.msk.bf16.gmra.mrb[8].mxu0 %vm253_vm1, %v3995_v63  ;;  %v13792_v63 = vld [vmem:[%s12864_s30 + $0x98] sm:$0xff]   ;;  %v4118_v43 = vor.u32 %v4116_v41, %v4114_v18 }
 0x2cf   : > { %11324 = vmatprep.mubr.msk.bf16.mxu0 %vm253_vm1, %v4003_v13  ;;  %v5033_v13 = vld [vmem:[%s15800_s5 + $0x140] sm:$0xff]  ;;  %v4072_v55 = vshll.u32 %v13792_v63, 16  ;;  %v4076_v4 = vshrl.u32 %v13792_v63, 16 }
 0x2d0   : > { %5243 = vperm.xlu0 %12657, %v5033_v13   ;;  %5248 = vperm.xlu1 %12658, %v5034_v49   ;;  %v13865_v13 = vld [vmem:[%s12864_s30 + $0xd0] sm:$0xff]  }
 0x2d1   : > { %v4074_v15 = vrot.slane %v4072_v55, 1  ;;  %v4128_v55 = vshll.u32 %v13865_v13, 16 }
 0x2d3   : > { %v4078_v1 = vor.u32 %v4076_v4, %v4074_v15  ;;  %v4075_v19 = vsel %vm435_vm2, %v4070_v57, %v4074_v15  ;;  %v4488_v15 = vld [vmem:[%s12864_s30 + $0x18] sm:$0xe] }
 0x2d4   : > { %5253 = vperm.xlu0 %12657, %v5035_v54   ;;  %5258 = vperm.xlu1 %12658, %v5036_v46   ;;  %v4124_v54 = vshrl.u32 %v13861_v0, 16 }
 0x2d6   : > { %11325 = vmatmul.mubr.msk.bf16.gmra.mrb[12].mxu0 %vm253_vm1, %v4011_v58  ;;  %v4080_v58 = vshll.u32 %v13802_v26, 16 }
 0x2d7   : > { %11328 = vmatprep.mubr.msk.bf16.mxu0 %vm253_vm1, %v4019_v39  ;;  %v13818_v39 = vld [vmem:[%s12864_s30 + $0xa8] sm:$0xff]  }
 0x2d8   : > { %v4082_v3 = vrot.slane %v4080_v58, 1  ;;  %5263 = vperm.xlu0 %12657, %v5037_v62   ;;  %v4088_v17 = vshll.u32 %v13818_v39, 16  ;;  %v4092_v31 = vshrl.u32 %v13818_v39, 16  ;;  %5268 = vperm.xlu1 %12658, %v5038_v33   ;;  %v4130_v58 = vrot.slane %v4128_v55, 1 }
 0x2d9   : > { %v4132_v62 = vshrl.u32 %v13865_v13, 16 }
 0x2da   : > { %v4090_v7 = vrot.slane %v4088_v17, 1  ;;  %v4086_v32 = vor.u32 %v4084_v20, %v4082_v3 }
 0x2db   : > { %v4134_v33 = vor.u32 %v4132_v62, %v4130_v58 }
 0x2dc   : > { %5273 = vperm.xlu0 %12657, %v5039_v10   ;;  %v4094_v34 = vor.u32 %v4092_v31, %v4090_v7  ;;  %5278 = vperm.xlu1 %12658, %v5040_v23   ;;  %v4091_v47 = vsel %vm435_vm2, %v4086_v32, %v4090_v7  ;;  %v4497_v31 = vrot.slane %v13608_v11, 1  ;;  %v4503_v23 = vrot.slane %v13644_v51, 1 }
 0x2dd   : > { %v4505_v11 = vrot.slane %v13662_v6, 1  ;;  %v4511_v51 = vrot.slane %v13698_v44, 1  ;;  %v4513_v6 = vrot.slane %v13714_v14, 1  ;;  %v4519_v44 = vrot.slane %v13750_v12, 1 }
 0x2de   : > { %11329 = vmatmul.mubr.msk.bf16.gmra.mrb[16].mxu0 %vm253_vm1, %v4027_v21  ;;  %v4083_v21 = vsel %vm435_vm2, %v4078_v1, %v4082_v3  ;;  %v10257_v3 = vcombine.low %v4488_v15, %v13578_v40  ;;  %v4499_v40 = vrot.slane %v13618_v59, 1  ;;  %v4507_v59 = vrot.slane %v13672_v27, 1 }
 0x2df   : > { %11332 = vmatprep.mubr.msk.bf16.mxu0 %vm253_vm1, %v4035_v22  ;;  %v4096_v22 = vshll.u32 %v13828_v5, 16  ;;  %v4515_v27 = vrot.slane %v13724_v60, 1  ;;  %v4521_v14 = vrot.slane %v13766_v24, 1  ;;  %v4523_v60 = vrot.slane %v13776_v36, 1 }
 0x2e0   : > { %v4494_v17 = vrot.slane %v10257_v3, 1  ;;  %v4500_v7 = vsel %vm1215_vm3, %v4497_v31, %v4499_v40  ;;  %v4527_v12 = vrot.slane %v13802_v26, 1  ;;  %v4529_v24 = vrot.slane %v13818_v39, 1  ;;  %v13980_v3 = vld [vmem:[%s15798_s3] sm:$0xf] }
 0x2e1   : > { %v4098_v53 = vrot.slane %v4096_v22, 1  ;;  %v4531_v36 = vrot.slane %v13828_v5, 1  ;;  %v4535_v26 = vrot.slane %v13851_v28, 1  ;;  %v4537_v39 = vrot.slane %v13861_v0, 1  ;;  %v10283_v0 = vld [vmem:[%s15798_s3 + $0x4] sm:$0xf] }
 0x2e2   : > { %v4539_v5 = vrot.slane %v13865_v13, 1  ;;  %v13965_v13 = vld [vmem:[#allocation2] sm:$0xf0]  ;;  %12637 = vmatprep.subr.msk.bf16.mxu1 %vm704_vm0, %v10283_v0 }
 0x2e3   : > { %v4099_v38 = vsel %vm435_vm2, %v4094_v34, %v4098_v53  ;;  %v4102_v8 = vor.u32 %v4100_v37, %v4098_v53  ;;  %v4506_v53 = vsel %vm1215_vm3, %v4503_v23, %v4505_v11  ;;  %v4532_v41 = vsel %vm1215_vm3, %v4529_v24, %v4531_v36 }
 0x2e4   : > { %v4538_v55 = vsel %vm1215_vm3, %v4535_v26, %v4537_v39 }
 0x2e6   : > { %11333 = vmatmul.mubr.msk.bf16.gmra.mrb[20].mxu0 %vm253_vm1, %v4043_v50  ;;  %v4108_v50 = vshrl.u32 %v13844_v25, 16 }
 0x2e7   : > { %11336 = vmatprep.mubr.msk.bf16.mxu0 %vm253_vm1, %v4051_v16  ;;  %v4106_v16 = vrot.slane %v4104_v35, 1  ;;  %v4508_v35 = vsel %vm1215_vm3, %v4505_v11, %v4507_v59 }
 0x2e9   : > { %v4110_v48 = vor.u32 %v4108_v50, %v4106_v16  ;;  %v4107_v30 = vsel %vm435_vm2, %v4102_v8, %v4106_v16  ;;  %v4516_v50 = vsel %vm1215_vm3, %v4513_v6, %v4515_v27  ;;  %v4522_v8 = vsel %vm1215_vm3, %v4519_v44, %v4521_v14 }
 0x2eb   : > { %v4115_v49 = vsel %vm435_vm2, %v4110_v48, %v4114_v18  ;;  %v4524_v48 = vsel %vm1215_vm3, %v4521_v14, %v4523_v60 }
 0x2ee   : > { %11337 = vmatmul.mubr.msk.bf16.gmra.mrb[24].mxu0 %vm253_vm1, %v4059_v56  ;;  %v4122_v56 = vrot.slane %v4120_v2, 1 }
 0x2ef   : > { %11340 = vmatprep.mubr.msk.bf16.mxu0 %vm253_vm1, %v4067_v9  ;;  %v13876_v9 = vld [vmem:[%s12864_s30 + $0xd8] ss:$0 sps:$4 sm:$0x11]  }
 0x2f0   : > { %v4126_v4 = vor.u32 %v4124_v54, %v4122_v56  ;;  %v4123_v46 = vsel %vm435_vm2, %v4118_v43, %v4122_v56  ;;  %v4136_v57 = vshll.u32 %v13876_v9, 16  ;;  %v4540_v56 = vsel %vm1215_vm3, %v4537_v39, %v4539_v5  ;;  %v13963_v43 = vld [vmem:[#allocation2 + $0x8] sm:$0xff] }
 0x2f1   : > { %v5794_v62 = vshll.u32 %v13963_v43, 16 }
 0x2f2   : > { %v4131_v1 = vsel %vm435_vm2, %v4126_v4, %v4130_v58  ;;  %v4138_v10 = vrot.slane %v4136_v57, 1  ;;  %v5554_v4 = vsel %vm704_vm0, %v10283_v0, 0  ;;  %v5432_v58 = vrot.slane %v13965_v13, 4 }
 0x2f3   : > { %11411 = vmatpush3.bf16.msra.mxu1 %v5554_v4  ;;  %v5796_v0 = vrot.slane %v5794_v62, 4 }
 0x2f4   : > { %v4139_v20 = vsel %vm435_vm2, %v4134_v33, %v4138_v10  ;;  %12638 = vmatprep.subr.msk.bf16.mxu1 %vm704_vm0, %v13980_v3  ;;  %v5044_v10 = vpop.permute.xlu0 %5043 }
 0x2f6   : > { %11341 = vmatmul.mubr.msk.bf16.gmra.mrb[28].mxu0 %vm253_vm1, %v4075_v19  ;;  %v4495_v19 = vrot.slane %v13595_v52, 1  ;;  %v4501_v52 = vrot.slane %v13634_v29, 1  ;;  %v4509_v29 = vrot.slane %v13688_v45, 1  ;;  %v4517_v45 = vrot.slane %v13740_v61, 1 }
 0x2f7   : > { %11344 = vmatprep.mubr.msk.bf16.mxu0 %vm253_vm1, %v4083_v21  ;;  %v4525_v61 = vrot.slane %v13792_v63, 1  ;;  %v4533_v63 = vrot.slane %v13844_v25, 1  ;;  %v4541_v25 = vrot.slane %v13876_v9, 1  ;;  %v5433_v9 = vrot.slane %v13963_v43, 4 }
 0x2f8   : > { %v4496_v21 = vsel %vm1215_vm3, %v4494_v17, %v4495_v19  ;;  %v4498_v22 = vsel %vm1215_vm3, %v4495_v19, %v4497_v31  ;;  %v4502_v32 = vsel %vm1215_vm3, %v4499_v40, %v4501_v52  ;;  %v4504_v34 = vsel %vm1215_vm3, %v4501_v52, %v4503_v23  ;;  %v5054_v17 = vpop.permute.xlu1 %5053  ;;  %v5049_v19 = vpop.permute.xlu0 %5048 }
 0x2f9   : > { %v4512_v37 = vsel %vm1215_vm3, %v4509_v29, %v4511_v51  ;;  %v4518_v42 = vsel %vm1215_vm3, %v4515_v27, %v4517_v45  ;;  %v4520_v16 = vsel %vm1215_vm3, %v4517_v45, %v4519_v44  ;;  %v4526_v18 = vsel %vm1215_vm3, %v4523_v60, %v4525_v61 }
 0x2fa   : > { %v4528_v2 = vsel %vm1215_vm3, %v4525_v61, %v4527_v12  ;;  %v4536_v54 = vsel %vm1215_vm3, %v4533_v63, %v4535_v26  ;;  %v4542_v28 = vsel %vm1215_vm3, %v4539_v5, %v4541_v25  ;;  %v5434_v15 = vsel %vm704_vm0, %v5432_v58, %v5433_v9 }
 0x2fb   : > { %11412 = vmatprep.mubr.msk.bf16.mxu1 %vm253_vm1, %v5434_v15 }
 0x2fe   : > { %11345 = vmatmul.mubr.msk.bf16.gmra.mrb[32].mxu0 %vm253_vm1, %v4091_v47  ;;  %v4510_v47 = vsel %vm1215_vm3, %v4507_v59, %v4509_v29 }
 0x2ff   : > { %11348 = vmatprep.mubr.msk.bf16.mxu0 %vm253_vm1, %v4099_v38  ;;  %v4514_v38 = vsel %vm1215_vm3, %v4511_v51, %v4513_v6 }
 0x306   : > { %11349 = vmatmul.mubr.msk.bf16.gmra.mrb[36].mxu0 %vm253_vm1, %v4107_v30  ;;  %v4530_v30 = vsel %vm1215_vm3, %v4527_v12, %v4529_v24 }
 0x307   : > { %11352 = vmatprep.mubr.msk.bf16.mxu0 %vm253_vm1, %v4115_v49  ;;  %v4534_v49 = vsel %vm1215_vm3, %v4531_v36, %v4533_v63 }
 0x30e   : > { %11353 = vmatmul.mubr.msk.bf16.gmra.mrb[40].mxu0 %vm253_vm1, %v4123_v46  ;;  %v5791_v46 = vshrl.u32 %v13963_v43, 16 }
 0x30f   : > { %11356 = vmatprep.mubr.msk.bf16.mxu0 %vm253_vm1, %v4131_v1  ;;  %v6319_v1 = vrot.slane %v5794_v62, 5 }
 0x310   : > { %v6318_v57 = vrot.slane %v5791_v46, 4 }
 0x312   : > { %v13984_v33 = vor.u32 %v6319_v1, %v6318_v57 }
 0x316   : > { %11357 = vmatmul.mubr.msk.bf16.gmra.mrb[44].mxu0 %vm253_vm1, %v4139_v20  ;;  %v5059_v20 = vpop.permute.xlu1 %5058 }
 0x317   : > { %11362 = vmatprep.mubr.msk.bf16.mxu0 %vm253_vm1, %v4496_v21  ;;  %v5064_v21 = vpop.permute.xlu0 %5063 }
 0x31a   : > { %v5069_v31 = vpop.permute.xlu1 %5068 }
 0x31b   : > { %v5074_v40 = vpop.permute.xlu0 %5073 }
 0x31e   : > { %11363 = vmatmul.mubr.msk.bf16.vlgmr.msra.gmra.mrb[0].mxu0 %vm253_vm1, %v4498_v22  ;;  %v5079_v22 = vpop.permute.xlu1 %5078 }
 0x31f   : > { %11366 = vmatprep.mubr.msk.bf16.mxu0 %vm253_vm1, %v4500_v7  ;;  %v13986_v7 = vpop.permute.xlu0 %5083 }
 0x322   : > { %v13988_v52 = vpop.permute.xlu1 %5088 }
 0x323   : > { %v13990_v23 = vpop.permute.xlu0 %5093 }
 0x326   : > { %11367 = vmatmul.mubr.msk.bf16.gmra.mrb[4].mxu0 %vm253_vm1, %v4502_v32  ;;  %v13992_v32 = vpop.permute.xlu1 %5098 }
 0x327   : > { %11370 = vmatprep.mubr.msk.bf16.mxu0 %vm253_vm1, %v4504_v34  ;;  %v13994_v34 = vpop.permute.xlu0 %5103 }
 0x32a   : > { %v13996_v11 = vpop.permute.xlu1 %5108 }
 0x32b   : > { %v13998_v59 = vpop.permute.xlu0 %5113 }
 0x32e   : > { %11371 = vmatmul.mubr.msk.bf16.gmra.mrb[8].mxu0 %vm253_vm1, %v4506_v53  ;;  %v14000_v53 = vpop.permute.xlu1 %5118 }
 0x32f   : > { %11374 = vmatprep.mubr.msk.bf16.mxu0 %vm253_vm1, %v4508_v35  ;;  %v14005_v35 = vld [vmem:[%s15797_s2] ss:$0 sm:$0xff]  ;;  %v14009_v27 = vpop.permute.xlu0 %5123 }
 0x332   : > { %v14012_v44 = vpop.permute.xlu1 %5128 }
 0x336   : > { %11375 = vmatmul.mubr.msk.bf16.gmra.mrb[12].mxu0 %vm253_vm1, %v4510_v47 }
 0x337   : > { %11378 = vmatprep.mubr.msk.bf16.mxu0 %vm253_vm1, %v4512_v37 }
 0x33e   : > { %11379 = vmatmul.mubr.msk.bf16.gmra.mrb[16].mxu0 %vm253_vm1, %v4514_v38 }
 0x33f   : > { %11382 = vmatprep.mubr.msk.bf16.mxu0 %vm253_vm1, %v4516_v50 }
 0x346   : > { %11383 = vmatmul.mubr.msk.bf16.gmra.mrb[20].mxu0 %vm253_vm1, %v4518_v42 }
 0x347   : > { %11386 = vmatprep.mubr.msk.bf16.mxu0 %vm253_vm1, %v4520_v16 }
 0x34e   : > { %11387 = vmatmul.mubr.msk.bf16.gmra.mrb[24].mxu0 %vm253_vm1, %v4522_v8 }
 0x34f   : > { %11390 = vmatprep.mubr.msk.bf16.mxu0 %vm253_vm1, %v4524_v48 }
 0x356   : > { %11391 = vmatmul.mubr.msk.bf16.gmra.mrb[28].mxu0 %vm253_vm1, %v4526_v18 }
 0x357   : > { %11394 = vmatprep.mubr.msk.bf16.mxu0 %vm253_vm1, %v4528_v2  ;;  %v14015_v2 = vpop.permute.xlu0 %5133 }
 0x35b   : > { %v14025_v58 = vpop.permute.xlu0 %5143 }
 0x35e   : > { %11395 = vmatmul.mubr.msk.bf16.gmra.mrb[32].mxu0 %vm253_vm1, %v4530_v30 }
 0x35f   : > { %11398 = vmatprep.mubr.msk.bf16.mxu0 %vm253_vm1, %v4532_v41  ;;  %v14018_v41 = vpop.permute.xlu1 %5138 }
 0x363   : > { %v14027_v1 = vpop.permute.xlu1 %5148 }
 0x366   : > { %11399 = vmatmul.mubr.msk.bf16.gmra.mrb[36].mxu0 %vm253_vm1, %v4534_v49 }
 0x367   : > { %11402 = vmatprep.mubr.msk.bf16.mxu0 %vm253_vm1, %v4536_v54 }
 0x36e   : > { %11403 = vmatmul.mubr.msk.bf16.gmra.mrb[40].mxu0 %vm253_vm1, %v4538_v55 }
 0x36f   : > { %11406 = vmatprep.mubr.msk.bf16.mxu0 %vm253_vm1, %v4540_v56 }
 0x376   : > { %11407 = vmatmul.mubr.msk.bf16.gmra.mrb[44].mxu0 %vm253_vm1, %v4542_v28  ;;  %v5793_v28 = vrot.slane %v5791_v46, 3 }
 0x3f1   : > { %v11364_v29 = vpop.f32.mrb[0].mxu0 }
 0x3f2   : > { %v4899_v51 = vadd.f32 %v11364_v29, %v14005_v35  ;;  %v4652_v47 = vpop.f32.mrb[1].mxu0 }
 0x3f3   : > { %v4897_v37 = vadd.f32 %v14005_v35, %v4652_v47  ;;  %v11365_v6 = vpop.f32.mrb[2].mxu0  ;;  %v14030_v47 = vor.u32 %v5796_v0, %v5793_v28 }
 0x3f4   : > { %v4947_v38 = vmax.f32 %v4899_v51, 0.0  ;;  %v4900_v50 = vadd.f32 %v11365_v6, %v14005_v35  ;;  %v4655_v45 = vpop.f32.mrb[3].mxu0  ;;  %v6079_v6 = vsel %vm704_vm0, %v13980_v3, 0 }
 0x3f5   : > { %v4945_v42 = vmax.f32 %v4897_v37, 0.0  ;;  %v4898_v16 = vadd.f32 %v14005_v35, %v4655_v45 }
 0x3f6   : > { %v4948_v14 = vmax.f32 %v4900_v50, 0.0  ;;  %v5283_v8 = vmul.f32 %v5054_v17, %v4947_v38 }
 0x3f7   : > { %v4946_v60 = vmax.f32 %v4898_v16, 0.0  ;;  %v5281_v61 = vmul.f32 %v5044_v10, %v4945_v42 }
 0x3f8   : > { %v5284_v48 = vmul.f32 %v5059_v20, %v4948_v14 }
 0x3f9   : > { %v5282_v12 = vmul.f32 %v5049_v19, %v4946_v60  ;;  %v11368_v18 = vpop.f32.mrb[4].mxu0  ;;  %v14043_v60 = vpop.permute.xlu0 %5153 }
 0x3fa   : > { %v5330_v24 = vpack.c.bf16 %v5284_v48, %v5283_v8  ;;  %v4903_v36 = vadd.f32 %v11368_v18, %v14005_v35  ;;  %v4668_v30 = vpop.f32.mrb[5].mxu0 }
 0x3fb   : > { %v5329_v63 = vpack.c.bf16 %v5282_v12, %v5281_v61  ;;  %v4901_v26 = vadd.f32 %v14005_v35, %v4668_v30  ;;  %v11369_v49 = vpop.f32.mrb[6].mxu0  ;;  %v14046_v12 = vpop.permute.xlu1 %5158  ;;  %v14054_v30 = vld [vmem:[%s15798_s3 + $0x8] sm:$0xf] }
 0x3fc   : > { %5354 = vst.msk [vmem:[#allocation2 + $0x18] sm:$0xff] %vm253_vm1, %v5330_v24  ;;  %v4951_v54 = vmax.f32 %v4903_v36, 0.0  ;;  %v4904_v39 = vadd.f32 %v11369_v49, %v14005_v35  ;;  %v4671_v5 = vpop.f32.mrb[7].mxu0 }
 0x3fd   : > { %5353 = vst.msk [vmem:[#allocation2 + $0x10] sm:$0xff] %vm253_vm1, %v5329_v63  ;;  %v4949_v55 = vmax.f32 %v4901_v26, 0.0  ;;  %v4902_v56 = vadd.f32 %v14005_v35, %v4671_v5 }
 0x3fe   : > { %v4952_v25 = vmax.f32 %v4904_v39, 0.0  ;;  %v5287_v15 = vmul.f32 %v5074_v40, %v4951_v54 }
 0x3ff   : > { %v4950_v4 = vmax.f32 %v4902_v56, 0.0  ;;  %v5285_v10 = vmul.f32 %v5064_v21, %v4949_v55 }
 0x400   : > { %v5288_v57 = vmul.f32 %v5079_v22, %v4952_v25 }
 0x401   : > { %v5286_v17 = vmul.f32 %v5069_v31, %v4950_v4  ;;  %v11372_v19 = vpop.f32.mrb[8].mxu0 }
 0x402   : > { %v5332_v20 = vpack.c.bf16 %v5288_v57, %v5287_v15  ;;  %v4907_v29 = vadd.f32 %v11372_v19, %v14005_v35  ;;  %v4684_v51 = vpop.f32.mrb[9].mxu0 }
 0x403   : > { %v5331_v37 = vpack.c.bf16 %v5286_v17, %v5285_v10  ;;  %v4905_v46 = vadd.f32 %v14005_v35, %v4684_v51  ;;  %v11373_v62 = vpop.f32.mrb[10].mxu0  ;;  %v14035_v40 = vld [vmem:[#allocation2 + $0x18] sm:$0xff]  ;;  %v14075_v17 = vpop.permute.xlu0 %5163 }
 0x404   : > { %5356 = vst.msk [vmem:[#allocation2 + $0x28] sm:$0xff] %vm253_vm1, %v5332_v20  ;;  %v4955_v21 = vmax.f32 %v4907_v29, 0.0  ;;  %v4908_v31 = vadd.f32 %v11373_v62, %v14005_v35  ;;  %v4687_v22 = vpop.f32.mrb[11].mxu0  ;;  %v5379_v38 = vld [vmem:[#allocation2 + $0x10] sm:$0xff]  ;;  %v5437_v50 = vrot.slane %v14035_v40, 4  ;;  %v5809_v45 = vshrl.u32 %v14035_v40, 16  ;;  %v14086_v62 = vpop.permute.xlu1 %5168 }
 0x405   : > { %5355 = vst.msk [vmem:[#allocation2 + $0x20] sm:$0xff] %vm253_vm1, %v5331_v37  ;;  %v4953_v42 = vmax.f32 %v4905_v46, 0.0  ;;  %v4906_v16 = vadd.f32 %v14005_v35, %v4687_v22  ;;  %v5435_v3 = vrot.slane %v5379_v38, 4  ;;  %v5800_v14 = vshrl.u32 %v5379_v38, 16 }
 0x406   : > { %v5291_v8 = vmul.f32 %v13990_v23, %v4955_v21  ;;  %v4956_v48 = vmax.f32 %v4908_v31, 0.0  ;;  %v5803_v61 = vshll.u32 %v5379_v38, 16  ;;  %v5811_v63 = vrot.slane %v5809_v45, 3 }
 0x407   : > { %v4954_v18 = vmax.f32 %v4906_v16, 0.0  ;;  %v5436_v24 = vsel %vm704_vm0, %v5433_v9, %v5435_v3  ;;  %v5802_v36 = vrot.slane %v5800_v14, 3  ;;  %v6322_v49 = vrot.slane %v5800_v14, 4 }
 0x408   : > { %v5292_v26 = vmul.f32 %v13992_v32, %v4956_v48  ;;  %11413 = vmatmul.mubr.msk.bf16.vlgmr.msra.gmra.mrb[0].mxu1 %vm253_vm1, %v5436_v24  ;;  %v5805_v23 = vrot.slane %v5803_v61, 4  ;;  %v6323_v54 = vrot.slane %v5803_v61, 5  ;;  %v5289_v39 = vmul.f32 %v13986_v7, %v4953_v42 }
 0x409   : > { %v5290_v43 = vmul.f32 %v13988_v52, %v4954_v18  ;;  %11461 = vmatpush3.bf16.msra.mxu1 %v6079_v6  ;;  %v11376_v9 = vpop.f32.mrb[12].mxu0  ;;  %v5438_v5 = vsel %vm704_vm0, %v5435_v3, %v5437_v50  ;;  %v5812_v55 = vshll.u32 %v14035_v40, 16  ;;  %v14068_v28 = vrot.slane %v5809_v45, 4 }
 0x40a   : > { %v5334_v56 = vpack.c.bf16 %v5292_v26, %v5291_v8  ;;  %v4911_v32 = vadd.f32 %v11376_v9, %v14005_v35  ;;  %11416 = vmatprep.mubr.msk.bf16.mxu1 %vm253_vm1, %v5438_v5  ;;  %v4700_v25 = vpop.f32.mrb[13].mxu0  ;;  %12639 = vmatprep.subr.msk.bf16.mxu1 %vm704_vm0, %v14054_v30  ;;  %v5806_v7 = vor.u32 %v5805_v23, %v5802_v36 }
 0x40b   : > { %v5333_v52 = vpack.c.bf16 %v5290_v43, %v5289_v39  ;;  %v4909_v0 = vadd.f32 %v14005_v35, %v4700_v25  ;;  %v11377_v4 = vpop.f32.mrb[14].mxu0  ;;  %v14071_v15 = vld [vmem:[#allocation2 + $0x28] sm:$0xff]  ;;  %v5814_v57 = vrot.slane %v5812_v55, 4  ;;  %v14073_v10 = vor.u32 %v6323_v54, %v6322_v49  ;;  %v14120_v39 = vpop.permute.xlu1 %5178 }
 0x40c   : > { %5358 = vst.msk [vmem:[#allocation2 + $0x38] sm:$0xff] %vm253_vm1, %v5334_v56  ;;  %v4959_v19 = vmax.f32 %v4911_v32, 0.0  ;;  %v4912_v20 = vadd.f32 %v11377_v4, %v14005_v35  ;;  %v4703_v29 = vpop.f32.mrb[15].mxu0  ;;  %v14079_v51 = vld [vmem:[#allocation2 + $0x20] sm:$0xff]  ;;  %v5441_v37 = vrot.slane %v14071_v15, 4  ;;  %v14084_v46 = vsel %vm5781_vm4, %v14030_v47, %v5806_v7 }
 0x40d   : > { %5357 = vst.msk [vmem:[#allocation2 + $0x30] sm:$0xff] %vm253_vm1, %v5333_v52  ;;  %v4957_v6 = vmax.f32 %v4909_v0, 0.0  ;;  %v4910_v21 = vadd.f32 %v14005_v35, %v4703_v29  ;;  %v5439_v31 = vrot.slane %v14079_v51, 4  ;;  %v5815_v22 = vor.u32 %v5814_v57, %v5811_v63  ;;  %v14117_v63 = vpop.permute.xlu0 %5173 }
 0x40e   : > { %v5295_v38 = vmul.f32 %v13998_v59, %v4959_v19  ;;  %v4960_v45 = vmax.f32 %v4912_v20, 0.0  ;;  %v5818_v42 = vshrl.u32 %v14079_v51, 16  ;;  %v5821_v16 = vshll.u32 %v14079_v51, 16 }
 0x40f   : > { %v5293_v3 = vmul.f32 %v13994_v34, %v4957_v6  ;;  %v4958_v14 = vmax.f32 %v4910_v21, 0.0  ;;  %v5440_v8 = vsel %vm704_vm0, %v5437_v50, %v5439_v31  ;;  %v5442_v48 = vsel %vm704_vm0, %v5439_v31, %v5441_v37 }
 0x410   : > { %v5296_v61 = vmul.f32 %v14000_v53, %v4960_v45  ;;  %11417 = vmatmul.mubr.msk.bf16.gmra.mrb[4].mxu1 %vm253_vm1, %v5440_v8  ;;  %v14102_v59 = vsel %vm5781_vm4, %v5806_v7, %v5815_v22  ;;  %v5820_v18 = vrot.slane %v5818_v42, 3  ;;  %v5823_v34 = vrot.slane %v5821_v16, 4 }
 0x411   : > { %v5294_v24 = vmul.f32 %v13996_v11, %v4958_v14  ;;  %v11380_v40 = vpop.f32.mrb[16].mxu0  ;;  %11420 = vmatprep.mubr.msk.bf16.mxu1 %vm253_vm1, %v5442_v48  ;;  %v5827_v50 = vshrl.u32 %v14071_v15, 16  ;;  %v5830_v53 = vshll.u32 %v14071_v15, 16  ;;  %v14115_v36 = vsel %vm6309_vm5, %v13984_v33, %v14073_v10  ;;  %v14146_v48 = vpop.permute.xlu0 %5183 }
 0x412   : > { %v5336_v26 = vpack.c.bf16 %v5296_v61, %v5295_v38  ;;  %v4915_v23 = vadd.f32 %v11380_v40, %v14005_v35  ;;  %v4716_v49 = vpop.f32.mrb[17].mxu0  ;;  %v5824_v54 = vor.u32 %v5823_v34, %v5820_v18  ;;  %v6327_v11 = vrot.slane %v5812_v55, 5  ;;  %v14157_v34 = vpop.permute.xlu1 %5188 }
 0x413   : > { %v5335_v43 = vpack.c.bf16 %v5294_v24, %v5293_v3  ;;  %v4913_v9 = vadd.f32 %v14005_v35, %v4716_v49  ;;  %v11381_v5 = vpop.f32.mrb[18].mxu0  ;;  %v14123_v56 = vld [vmem:[#allocation2 + $0x38] sm:$0xff]  ;;  %v5829_v32 = vrot.slane %v5827_v50, 3  ;;  %v5832_v25 = vrot.slane %v5830_v53, 4 }
 0x414   : > { %5360 = vst.msk [vmem:[#allocation2 + $0x48] sm:$0xff] %vm253_vm1, %v5336_v26  ;;  %v4963_v7 = vmax.f32 %v4915_v23, 0.0  ;;  %v4916_v52 = vadd.f32 %v11381_v5, %v14005_v35  ;;  %v4719_v55 = vpop.f32.mrb[19].mxu0  ;;  %v14131_v0 = vld [vmem:[#allocation2 + $0x30] sm:$0xff]  ;;  %v5445_v4 = vrot.slane %v14123_v56, 4  ;;  %v14135_v57 = vsel %vm5781_vm4, %v5815_v22, %v5824_v54 }
 0x415   : > { %5359 = vst.msk [vmem:[#allocation2 + $0x40] sm:$0xff] %vm253_vm1, %v5335_v43  ;;  %v4961_v19 = vmax.f32 %v4913_v9, 0.0  ;;  %v4914_v20 = vadd.f32 %v14005_v35, %v4719_v55  ;;  %v5443_v29 = vrot.slane %v14131_v0, 4  ;;  %v5833_v6 = vor.u32 %v5832_v25, %v5829_v32 }
 0x416   : > { %v5299_v21 = vmul.f32 %v14015_v2, %v4963_v7  ;;  %v4964_v31 = vmax.f32 %v4916_v52, 0.0  ;;  %v5836_v38 = vshrl.u32 %v14131_v0, 16  ;;  %v5839_v45 = vshll.u32 %v14131_v0, 16 }
 0x417   : > { %v5297_v3 = vmul.f32 %v14009_v27, %v4961_v19  ;;  %v4962_v14 = vmax.f32 %v4914_v20, 0.0  ;;  %v5444_v22 = vsel %vm704_vm0, %v5441_v37, %v5443_v29  ;;  %v5446_v8 = vsel %vm704_vm0, %v5443_v29, %v5445_v4 }
 0x418   : > { %v5300_v61 = vmul.f32 %v14018_v41, %v4964_v31  ;;  %11421 = vmatmul.mubr.msk.bf16.gmra.mrb[8].mxu1 %vm253_vm1, %v5444_v22  ;;  %v14151_v2 = vsel %vm5781_vm4, %v5824_v54, %v5833_v6  ;;  %v5838_v18 = vrot.slane %v5836_v38, 3  ;;  %v5841_v27 = vrot.slane %v5839_v45, 4 }
 0x419   : > { %v5298_v37 = vmul.f32 %v14012_v44, %v4962_v14  ;;  %v11384_v24 = vpop.f32.mrb[20].mxu0  ;;  %11424 = vmatprep.mubr.msk.bf16.mxu1 %vm253_vm1, %v5446_v8  ;;  %v15811_v41 = vshrl.u32 %v14123_v56, 16  ;;  %v15810_v40 = vshll.u32 %v14123_v56, 16  ;;  %v14164_v26 = vor.u32 %v6327_v11, %v14068_v28  ;;  %v14189_v14 = vpop.permute.xlu0 %5193 }
 0x41a   : > { %v5338_v23 = vpack.c.bf16 %v5300_v61, %v5299_v21  ;;  %v4919_v49 = vadd.f32 %v11384_v24, %v14005_v35  ;;  %v4732_v54 = vpop.f32.mrb[21].mxu0  ;;  %v5842_v43 = vor.u32 %v5841_v27, %v5838_v18  ;;  %v14169_v9 = vrot.slane %v5818_v42, 4  ;;  %v14194_v27 = vpop.permute.xlu1 %5198 }
 0x41b   : > { %v5337_v44 = vpack.c.bf16 %v5298_v37, %v5297_v3  ;;  %v4917_v5 = vadd.f32 %v14005_v35, %v4732_v54  ;;  %v11385_v32 = vpop.f32.mrb[22].mxu0  ;;  %v14172_v25 = vld [vmem:[#allocation2 + $0x48] sm:$0xff]  ;;  %v5847_v7 = vrot.slane %v15811_v41, 3  ;;  %v5850_v28 = vrot.slane %v15810_v40, 4 }
 0x41c   : > { %5362 = vst.msk [vmem:[#allocation2 + $0x58] sm:$0xff] %vm253_vm1, %v5338_v23  ;;  %v4967_v11 = vmax.f32 %v4919_v49, 0.0  ;;  %v4920_v52 = vadd.f32 %v11385_v32, %v14005_v35  ;;  %v4735_v55 = vpop.f32.mrb[23].mxu0  ;;  %v14180_v42 = vld [vmem:[#allocation2 + $0x40] sm:$0xff]  ;;  %v5449_v19 = vrot.slane %v14172_v25, 4  ;;  %v14184_v20 = vsel %vm5781_vm4, %v5833_v6, %v5842_v43 }
 0x41d   : > { %5361 = vst.msk [vmem:[#allocation2 + $0x50] sm:$0xff] %vm253_vm1, %v5337_v44  ;;  %v4965_v29 = vmax.f32 %v4917_v5, 0.0  ;;  %v4918_v21 = vadd.f32 %v14005_v35, %v4735_v55  ;;  %v5447_v31 = vrot.slane %v14180_v42, 4  ;;  %v5851_v3 = vor.u32 %v5850_v28, %v5847_v7 }
 0x41e   : > { %v5303_v22 = vmul.f32 %v14043_v60, %v4967_v11  ;;  %v4968_v8 = vmax.f32 %v4920_v52, 0.0  ;;  %v15809_v61 = vshrl.u32 %v14180_v42, 16  ;;  %v15808_v18 = vshll.u32 %v14180_v42, 16 }
 0x41f   : > { %v5301_v6 = vmul.f32 %v14025_v58, %v4965_v29  ;;  %v4966_v37 = vmax.f32 %v4918_v21, 0.0  ;;  %v5448_v24 = vsel %vm704_vm0, %v5445_v4, %v5447_v31  ;;  %v5450_v23 = vsel %vm704_vm0, %v5447_v31, %v5449_v19 }
 0x420   : > { %v5304_v49 = vmul.f32 %v14046_v12, %v4968_v8  ;;  %11425 = vmatmul.mubr.msk.bf16.gmra.mrb[12].mxu1 %vm253_vm1, %v5448_v24  ;;  %v14202_v60 = vsel %vm5781_vm4, %v5842_v43, %v5851_v3  ;;  %v5856_v54 = vrot.slane %v15809_v61, 3  ;;  %v5859_v44 = vrot.slane %v15808_v18, 4 }
 0x421   : > { %v5302_v58 = vmul.f32 %v14027_v1, %v4966_v37  ;;  %v11388_v5 = vpop.f32.mrb[24].mxu0  ;;  %11428 = vmatprep.mubr.msk.bf16.mxu1 %vm253_vm1, %v5450_v23  ;;  %v15807_v4 = vshrl.u32 %v14172_v25, 16  ;;  %v15802_v12 = vshll.u32 %v14172_v25, 16  ;;  %v14215_v43 = vsel %vm6309_vm5, %v14073_v10, %v14164_v26  ;;  %v14237_v23 = vpop.permute.xlu1 %5208 }
 0x422   : > { %v5340_v32 = vpack.c.bf16 %v5304_v49, %v5303_v22  ;;  %v4923_v7 = vadd.f32 %v11388_v5, %v14005_v35  ;;  %v4748_v28 = vpop.f32.mrb[25].mxu0  ;;  %v5860_v11 = vor.u32 %v5859_v44, %v5856_v54  ;;  %v6331_v1 = vrot.slane %v5821_v16, 5  ;;  %v14227_v22 = vpop.permute.xlu0 %5203 }
 0x423   : > { %v5339_v52 = vpack.c.bf16 %v5302_v58, %v5301_v6  ;;  %v4921_v55 = vadd.f32 %v14005_v35, %v4748_v28  ;;  %v11389_v29 = vpop.f32.mrb[26].mxu0  ;;  %v14221_v21 = vld [vmem:[#allocation2 + $0x58] sm:$0xff]  ;;  %v5865_v31 = vrot.slane %v15807_v4, 3  ;;  %v5868_v10 = vrot.slane %v15802_v12, 4 }
 0x424   : > { %5364 = vst.msk [vmem:[#allocation2 + $0x68] sm:$0xff] %vm253_vm1, %v5340_v32  ;;  %v4971_v8 = vmax.f32 %v4923_v7, 0.0  ;;  %v4924_v51 = vadd.f32 %v11389_v29, %v14005_v35  ;;  %v4751_v16 = vpop.f32.mrb[27].mxu0  ;;  %v14231_v6 = vld [vmem:[#allocation2 + $0x50] sm:$0xff]  ;;  %v5453_v37 = vrot.slane %v14221_v21, 4  ;;  %v14235_v24 = vsel %vm5781_vm4, %v5851_v3, %v5860_v11 }
 0x425   : > { %5363 = vst.msk [vmem:[#allocation2 + $0x60] sm:$0xff] %vm253_vm1, %v5339_v52  ;;  %v4969_v49 = vmax.f32 %v4921_v55, 0.0  ;;  %v4922_v54 = vadd.f32 %v14005_v35, %v4751_v16  ;;  %v5451_v44 = vrot.slane %v14231_v6, 4  ;;  %v5869_v58 = vor.u32 %v5868_v10, %v5865_v31 }
 0x426   : > { %v5307_v5 = vmul.f32 %v14117_v63, %v4971_v8  ;;  %v4972_v32 = vmax.f32 %v4924_v51, 0.0  ;;  %v15806_v7 = vshrl.u32 %v14231_v6, 16  ;;  %v15803_v28 = vshll.u32 %v14231_v6, 16 }
 0x427   : > { %v5305_v3 = vmul.f32 %v14075_v17, %v4969_v49  ;;  %v4970_v29 = vmax.f32 %v4922_v54, 0.0  ;;  %v5452_v12 = vsel %vm704_vm0, %v5449_v19, %v5451_v44  ;;  %v5454_v52 = vsel %vm704_vm0, %v5451_v44, %v5453_v37  ;;  %v5219_v44 = vpop.permute.xlu1 %5218 }
 0x428   : > { %v5308_v55 = vmul.f32 %v14120_v39, %v4972_v32  ;;  %11429 = vmatmul.mubr.msk.bf16.gmra.mrb[16].mxu1 %vm253_vm1, %v5452_v12  ;;  %v14251_v31 = vsel %vm5781_vm4, %v5860_v11, %v5869_v58  ;;  %v5874_v63 = vrot.slane %v15806_v7, 3  ;;  %v5877_v10 = vrot.slane %v15803_v28, 4  ;;  %v14264_v11 = vpop.permute.xlu0 %5213 }
 0x429   : > { %v5306_v17 = vmul.f32 %v14086_v62, %v4970_v29  ;;  %v11392_v8 = vpop.f32.mrb[28].mxu0  ;;  %11432 = vmatprep.mubr.msk.bf16.mxu1 %vm253_vm1, %v5454_v52  ;;  %v15805_v19 = vshrl.u32 %v14221_v21, 16  ;;  %v15804_v39 = vshll.u32 %v14221_v21, 16  ;;  %v14262_v12 = vor.u32 %v6331_v1, %v14169_v9 }
 0x42a   : > { %v5342_v51 = vpack.c.bf16 %v5308_v55, %v5307_v5  ;;  %v4927_v16 = vadd.f32 %v11392_v8, %v14005_v35  ;;  %v4764_v49 = vpop.f32.mrb[29].mxu0  ;;  %v5878_v54 = vor.u32 %v5877_v10, %v5874_v63  ;;  %v15861_v0 = vshll.u32 %v14123_v56, 16 }
 0x42b   : > { %v5341_v32 = vpack.c.bf16 %v5306_v17, %v5305_v3  ;;  %v4925_v62 = vadd.f32 %v14005_v35, %v4764_v49  ;;  %v11393_v29 = vpop.f32.mrb[30].mxu0  ;;  %v14268_v52 = vld [vmem:[#allocation2 + $0x68] sm:$0xff]  ;;  %v5883_v28 = vrot.slane %v15805_v19, 3  ;;  %v5886_v9 = vrot.slane %v15804_v39, 4 }
 0x42c   : > { %5366 = vst.msk [vmem:[#allocation2 + $0x78] sm:$0xff] %vm253_vm1, %v5342_v51  ;;  %v4975_v1 = vmax.f32 %v4927_v16, 0.0  ;;  %v4928_v5 = vadd.f32 %v11393_v29, %v14005_v35  ;;  %v4767_v55 = vpop.f32.mrb[31].mxu0  ;;  %v14276_v63 = vld [vmem:[#allocation2 + $0x60] sm:$0xff]  ;;  %v5457_v3 = vrot.slane %v14268_v52, 4  ;;  %v14280_v10 = vsel %vm5781_vm4, %v5869_v58, %v5878_v54  ;;  %v14289_v7 = vpop.permute.xlu0 %5223 }
 0x42d   : > { %5365 = vst.msk [vmem:[#allocation2 + $0x70] sm:$0xff] %vm253_vm1, %v5341_v32  ;;  %v4973_v17 = vmax.f32 %v4925_v62, 0.0  ;;  %v4926_v8 = vadd.f32 %v14005_v35, %v4767_v55  ;;  %v5455_v49 = vrot.slane %v14276_v63, 4  ;;  %v14285_v39 = vor.u32 %v5886_v9, %v5883_v28  ;;  %v14298_v28 = vpop.permute.xlu1 %5228 }
 0x42e   : > { %v4976_v51 = vmax.f32 %v4928_v5, 0.0  ;;  %v5311_v58 = vmul.f32 %v14189_v14, %v4975_v1  ;;  %v14306_v14 = vsel %vm6309_vm5, %v14164_v26, %v14262_v12 }
 0x42f   : > { %v4974_v16 = vmax.f32 %v4926_v8, 0.0  ;;  %v5456_v29 = vsel %vm704_vm0, %v5453_v37, %v5455_v49  ;;  %v5458_v19 = vsel %vm704_vm0, %v5455_v49, %v5457_v3  ;;  %v14296_v32 = vsel %vm5781_vm4, %v5878_v54, %v14285_v39  ;;  %15858 = vst [vmem:[#allocation3_spill] sm:$0xff] %v14306_v14 }
 0x430   : > { %v5312_v4 = vmul.f32 %v14194_v27, %v4976_v51  ;;  %11433 = vmatmul.mubr.msk.bf16.gmra.mrb[20].mxu1 %vm253_vm1, %v5456_v29  ;;  %v5309_v62 = vmul.f32 %v14146_v48, %v4973_v17 }
 0x431   : > { %v5310_v37 = vmul.f32 %v14157_v34, %v4974_v16  ;;  %v11396_v9 = vpop.f32.mrb[32].mxu0  ;;  %11436 = vmatprep.mubr.msk.bf16.mxu1 %vm253_vm1, %v5458_v19 }
 0x432   : > { %v5344_v27 = vpack.c.bf16 %v5312_v4, %v5311_v58  ;;  %v4931_v1 = vadd.f32 %v11396_v9, %v14005_v35  ;;  %v4780_v5 = vpop.f32.mrb[33].mxu0  ;;  %v6334_v4 = vrot.slane %v5827_v50, 4  ;;  %v6335_v58 = vrot.slane %v5830_v53, 5  ;;  %v5239_v9 = vpop.permute.xlu1 %5238 }
 0x433   : > { %v5343_v54 = vpack.c.bf16 %v5310_v37, %v5309_v62  ;;  %v4929_v55 = vadd.f32 %v14005_v35, %v4780_v5  ;;  %v11397_v8 = vpop.f32.mrb[34].mxu0  ;;  %v14310_v49 = vld [vmem:[#allocation2 + $0x78] sm:$0xff]  ;;  %v5234_v62 = vpop.permute.xlu0 %5233 }
 0x434   : > { %5368 = vst.msk [vmem:[#allocation2 + $0x88] sm:$0xff] %vm253_vm1, %v5344_v27  ;;  %v4979_v48 = vmax.f32 %v4931_v1, 0.0  ;;  %v4932_v34 = vadd.f32 %v11397_v8, %v14005_v35  ;;  %v4783_v19 = vpop.f32.mrb[35].mxu0  ;;  %v14314_v17 = vld [vmem:[#allocation2 + $0x70] sm:$0xff]  ;;  %v5461_v26 = vrot.slane %v14310_v49, 4  ;;  %v14331_v15 = vor.u32 %v6335_v58, %v6334_v4 }
 0x435   : > { %5367 = vst.msk [vmem:[#allocation2 + $0x80] sm:$0xff] %vm253_vm1, %v5343_v54  ;;  %v4977_v51 = vmax.f32 %v4929_v55, 0.0  ;;  %v4930_v16 = vadd.f32 %v14005_v35, %v4783_v19  ;;  %v5459_v29 = vrot.slane %v14314_v17, 4 }
 0x436   : > { %v4980_v37 = vmax.f32 %v4932_v34, 0.0  ;;  %v5315_v50 = vmul.f32 %v14264_v11, %v4979_v48  ;;  %v5249_v58 = vpop.permute.xlu1 %5248 }
 0x437   : > { %v4978_v27 = vmax.f32 %v4930_v16, 0.0  ;;  %v5460_v1 = vsel %vm704_vm0, %v5457_v3, %v5459_v29  ;;  %v5462_v5 = vsel %vm704_vm0, %v5459_v29, %v5461_v26  ;;  %v5313_v54 = vmul.f32 %v14227_v22, %v4977_v51  ;;  %v5244_v48 = vpop.permute.xlu0 %5243 }
 0x438   : > { %v5316_v8 = vmul.f32 %v5219_v44, %v4980_v37  ;;  %11437 = vmatmul.mubr.msk.bf16.gmra.mrb[24].mxu1 %vm253_vm1, %v5460_v1 }
 0x439   : > { %v5314_v55 = vmul.f32 %v14237_v23, %v4978_v27  ;;  %v11400_v19 = vpop.f32.mrb[36].mxu0  ;;  %11440 = vmatprep.mubr.msk.bf16.mxu1 %vm253_vm1, %v5462_v5 }
 0x43a   : > { %v5346_v53 = vpack.c.bf16 %v5316_v8, %v5315_v50  ;;  %v4935_v34 = vadd.f32 %v11400_v19, %v14005_v35  ;;  %v4796_v3 = vpop.f32.mrb[37].mxu0 }
 0x43b   : > { %v5345_v16 = vpack.c.bf16 %v5314_v55, %v5313_v54  ;;  %v4933_v29 = vadd.f32 %v14005_v35, %v4796_v3  ;;  %v11401_v11 = vpop.f32.mrb[38].mxu0  ;;  %v14335_v44 = vld [vmem:[#allocation2 + $0x88] sm:$0xff] }
 0x43c   : > { %5370 = vst.msk [vmem:[#allocation2 + $0x98] sm:$0xff] %vm253_vm1, %v5346_v53  ;;  %v4983_v22 = vmax.f32 %v4935_v34, 0.0  ;;  %v4936_v23 = vadd.f32 %v11401_v11, %v14005_v35  ;;  %v4799_v51 = vpop.f32.mrb[39].mxu0  ;;  %v14339_v37 = vld [vmem:[#allocation2 + $0x80] sm:$0xff]  ;;  %v5465_v4 = vrot.slane %v14335_v44, 4 }
 0x43d   : > { %5369 = vst.msk [vmem:[#allocation2 + $0x90] sm:$0xff] %vm253_vm1, %v5345_v16  ;;  %v4981_v27 = vmax.f32 %v4933_v29, 0.0  ;;  %v4934_v1 = vadd.f32 %v14005_v35, %v4799_v51  ;;  %v5463_v5 = vrot.slane %v14339_v37, 4  ;;  %v5254_v29 = vpop.permute.xlu0 %5253 }
 0x43e   : > { %v4984_v50 = vmax.f32 %v4936_v23, 0.0  ;;  %v5319_v19 = vmul.f32 %v5234_v62, %v4983_v22  ;;  %v6311_v22 = vshrl.u32 %v13965_v13, 16 }
 0x43f   : > { %v4982_v8 = vmax.f32 %v4934_v1, 0.0  ;;  %v5464_v54 = vsel %vm704_vm0, %v5461_v26, %v5463_v5  ;;  %v5466_v55 = vsel %vm704_vm0, %v5463_v5, %v5465_v4  ;;  %v5317_v34 = vmul.f32 %v14289_v7, %v4981_v27  ;;  %v5259_v1 = vpop.permute.xlu1 %5258 }
 0x440   : > { %v5320_v53 = vmul.f32 %v5239_v9, %v4984_v50  ;;  %11441 = vmatmul.mubr.msk.bf16.gmra.mrb[28].mxu1 %vm253_vm1, %v5464_v54  ;;  %v6314_v54 = vshll.u32 %v13965_v13, 16 }
 0x441   : > { %v5318_v3 = vmul.f32 %v14298_v28, %v4982_v8  ;;  %v11404_v16 = vpop.f32.mrb[40].mxu0  ;;  %11444 = vmatprep.mubr.msk.bf16.mxu1 %vm253_vm1, %v5466_v55 }
 0x442   : > { %v5348_v11 = vpack.c.bf16 %v5320_v53, %v5319_v19  ;;  %v4939_v23 = vadd.f32 %v11404_v16, %v14005_v35  ;;  %v4812_v51 = vpop.f32.mrb[41].mxu0 }
 0x443   : > { %v5347_v26 = vpack.c.bf16 %v5318_v3, %v5317_v34  ;;  %v4937_v5 = vadd.f32 %v14005_v35, %v4812_v51  ;;  %v11405_v62 = vpop.f32.mrb[42].mxu0  ;;  %v14353_v9 = vld [vmem:[#allocation2 + $0x98] sm:$0xff]  ;;  %v5269_v18 = vpop.permute.xlu1 %5268 }
 0x444   : > { %5372 = vst.msk [vmem:[#allocation2 + $0xa8] sm:$0xff] %vm253_vm1, %v5348_v11  ;;  %v4987_v7 = vmax.f32 %v4939_v23, 0.0  ;;  %v4940_v28 = vadd.f32 %v11405_v62, %v14005_v35  ;;  %v4815_v27 = vpop.f32.mrb[43].mxu0  ;;  %v14358_v50 = vld [vmem:[#allocation2 + $0x90] sm:$0xff]  ;;  %v5469_v8 = vrot.slane %v14353_v9, 4  ;;  %v5264_v23 = vpop.permute.xlu0 %5263 }
 0x445   : > { %5371 = vst.msk [vmem:[#allocation2 + $0xa0] sm:$0xff] %vm253_vm1, %v5347_v26  ;;  %v4985_v55 = vmax.f32 %v4937_v5, 0.0  ;;  %v4938_v19 = vadd.f32 %v14005_v35, %v4815_v27  ;;  %v5467_v53 = vrot.slane %v14358_v50, 4  ;;  %v6313_v5 = vrot.slane %v6311_v22, 4 }
 0x446   : > { %v4988_v34 = vmax.f32 %v4940_v28, 0.0  ;;  %v5323_v51 = vmul.f32 %v5254_v29, %v4987_v7  ;;  %v6316_v27 = vrot.slane %v6314_v54, 5 }
 0x447   : > { %v4986_v3 = vmax.f32 %v4938_v19, 0.0  ;;  %v5468_v16 = vsel %vm704_vm0, %v5465_v4, %v5467_v53  ;;  %v5470_v11 = vsel %vm704_vm0, %v5467_v53, %v5469_v8  ;;  %v5321_v13 = vmul.f32 %v5244_v48, %v4985_v55 }
 0x448   : > { %v5324_v62 = vmul.f32 %v5259_v1, %v4988_v34  ;;  %11445 = vmatmul.mubr.msk.bf16.gmra.mrb[32].mxu1 %vm253_vm1, %v5468_v16  ;;  %v5377_v34 = vld [vmem:[#allocation2] sm:$0xf8] }
 0x449   : > { %v5322_v61 = vmul.f32 %v5249_v58, %v4986_v3  ;;  %v11408_v26 = vpop.f32.mrb[44].mxu0  ;;  %11448 = vmatprep.mubr.msk.bf16.mxu1 %vm253_vm1, %v5470_v11  ;;  %v6317_v3 = vor.u32 %v6316_v27, %v6313_v5  ;;  %v5274_v11 = vpop.permute.xlu0 %5273 }
 0x44a   : > { %v5350_v40 = vpack.c.bf16 %v5324_v62, %v5323_v51  ;;  %v4943_v28 = vadd.f32 %v11408_v26, %v14005_v35  ;;  %v4828_v19 = vpop.f32.mrb[45].mxu0 }
 0x44b   : > { %v5349_v4 = vpack.c.bf16 %v5322_v61, %v5321_v13  ;;  %v4941_v53 = vadd.f32 %v14005_v35, %v4828_v19  ;;  %v11409_v41 = vpop.f32.mrb[46].mxu0  ;;  %v14371_v29 = vld [vmem:[#allocation2 + $0xa8] sm:$0xff]  ;;  %v5786_v19 = vshll.u32 %v5377_v34, 16  ;;  %v14387_v5 = vsel %vm6309_vm5, %v6317_v3, %v13984_v33 }
 0x44c   : > { %5374 = vst.msk [vmem:[#allocation2 + $0xb8] sm:$0xff] %vm253_vm1, %v5350_v40  ;;  %v4991_v1 = vmax.f32 %v4943_v28, 0.0  ;;  %v4944_v48 = vadd.f32 %v11409_v41, %v14005_v35  ;;  %v4831_v58 = vpop.f32.mrb[47].mxu0  ;;  %v14375_v7 = vld [vmem:[#allocation2 + $0xa0] sm:$0xff]  ;;  %v5473_v22 = vrot.slane %v14371_v29, 4  ;;  %v5279_v40 = vpop.permute.xlu1 %5278  ;;  %v5783_v28 = vshrl.u32 %v5377_v34, 16 }
 0x44d   : > { %5373 = vst.msk [vmem:[#allocation2 + $0xb0] sm:$0xff] %vm253_vm1, %v5349_v4  ;;  %v4989_v54 = vmax.f32 %v4941_v53, 0.0  ;;  %v4942_v61 = vadd.f32 %v14005_v35, %v4831_v58  ;;  %v5471_v55 = vrot.slane %v14375_v7, 4  ;;  %v6338_v53 = vrot.slane %v5836_v38, 4 }
 0x44e   : > { %v4992_v16 = vmax.f32 %v4944_v48, 0.0  ;;  %v5327_v13 = vmul.f32 %v5274_v11, %v4991_v1  ;;  %v6339_v1 = vrot.slane %v5839_v45, 5  ;;  %v5785_v58 = vrot.slane %v5783_v28, 3 }
 0x44f   : > { %v4990_v51 = vmax.f32 %v4942_v61, 0.0  ;;  %v5472_v41 = vsel %vm704_vm0, %v5469_v8, %v5471_v55  ;;  %v5474_v62 = vsel %vm704_vm0, %v5471_v55, %v5473_v22  ;;  %v5325_v4 = vmul.f32 %v5264_v23, %v4989_v54 }
 0x450   : > { %v5328_v26 = vmul.f32 %v5279_v40, %v4992_v16  ;;  %11449 = vmatmul.mubr.msk.bf16.gmra.mrb[36].mxu1 %vm253_vm1, %v5472_v41  ;;  %v14392_v8 = vsel %vm6309_vm5, %v14262_v12, %v14331_v15  ;;  %v5788_v54 = vrot.slane %v5786_v19, 4  ;;  %v15860_v61 = vshrl.u32 %v14123_v56, 16 }
 0x451   : > { %v5326_v35 = vmul.f32 %v5269_v18, %v4990_v51  ;;  %11452 = vmatprep.mubr.msk.bf16.mxu1 %vm253_vm1, %v5474_v62  ;;  %15859 = vst [vmem:[#allocation4_spill] sm:$0xff] %v14392_v8  ;;  %v6340_v38 = vor.u32 %v6339_v1, %v6338_v53  ;;  %v6343_v45 = vrot.slane %v15861_v0, 5  ;;  %v15863_v51 = vshrl.u32 %v14180_v42, 16 }
 0x452   : > { %v5352_v27 = vpack.c.bf16 %v5328_v26, %v5327_v13  ;;  %v6342_v12 = vrot.slane %v15860_v61, 4  ;;  %v5789_v16 = vor.u32 %v5788_v54, %v5785_v58  ;;  %v15864_v56 = vshll.u32 %v14180_v42, 16 }
 0x453   : > { %v5351_v23 = vpack.c.bf16 %v5326_v35, %v5325_v4  ;;  %v14398_v18 = vld [vmem:[#allocation2 + $0xb8] sm:$0xff]  ;;  %v14412_v11 = vsel %vm6309_vm5, %v14331_v15, %v6340_v38  ;;  %v6346_v41 = vrot.slane %v15863_v51, 4  ;;  %v15866_v26 = vshll.u32 %v14172_v25, 16 }
 0x454   : > { %5376 = vst.msk [vmem:[#allocation2 + $0xc8] sm:$0xff] %vm253_vm1, %v5352_v27  ;;  %v5399_v48 = vld [vmem:[#allocation2 + $0xb0] sm:$0xff]  ;;  %v5477_v33 = vrot.slane %v14398_v18, 4  ;;  %15862 = vst [vmem:[#allocation5_spill] sm:$0xff] %v14412_v11  ;;  %v6344_v40 = vor.u32 %v6343_v45, %v6342_v12  ;;  %v6347_v62 = vrot.slane %v15864_v56, 5  ;;  %v15868_v15 = vshrl.u32 %v14231_v6, 16 }
 0x455   : > { %5375 = vst.msk [vmem:[#allocation2 + $0xc0] sm:$0xff] %vm253_vm1, %v5351_v23  ;;  %v5475_v55 = vrot.slane %v5399_v48, 4  ;;  %v6351_v28 = vrot.slane %v15866_v26, 5  ;;  %v15869_v35 = vshll.u32 %v14231_v6, 16  ;;  %v15870_v42 = vshrl.u32 %v14221_v21, 16 }
 0x456   : > { %v14424_v19 = vsel %vm6309_vm5, %v6340_v38, %v6344_v40  ;;  %v6354_v4 = vrot.slane %v15868_v15, 4  ;;  %v6348_v53 = vor.u32 %v6347_v62, %v6346_v41  ;;  %v15871_v58 = vshll.u32 %v14221_v21, 16 }
 0x457   : > { %v5476_v34 = vsel %vm704_vm0, %v5473_v22, %v5475_v55  ;;  %v5478_v3 = vsel %vm704_vm0, %v5475_v55, %v5477_v33  ;;  %v15865_v22 = vshrl.u32 %v14172_v25, 16  ;;  %15867 = vst [vmem:[#allocation6_spill] sm:$0xff] %v14424_v19  ;;  %v6355_v27 = vrot.slane %v15869_v35, 5 }
 0x458   : > { %11453 = vmatmul.mubr.msk.bf16.gmra.mrb[40].mxu1 %vm253_vm1, %v5476_v34  ;;  %v6358_v23 = vrot.slane %v15870_v42, 4  ;;  %v6359_v54 = vrot.slane %v15871_v58, 5  ;;  %v5798_v25 = vsel %vm5781_vm4, %v5789_v16, %v14030_v47  ;;  %v14439_v12 = vshrl.u32 %v14310_v49, 16 }
 0x459   : > { %11456 = vmatprep.mubr.msk.bf16.mxu1 %vm253_vm1, %v5478_v3  ;;  %v6350_v13 = vrot.slane %v15865_v22, 4  ;;  %v6356_v55 = vor.u32 %v6355_v27, %v6354_v4  ;;  %v14443_v38 = vshll.u32 %v14310_v49, 16  ;;  %v14446_v0 = vshrl.u32 %v14339_v37, 16 }
 0x45a   : > { %v14449_v21 = vsel %vm6309_vm5, %v6344_v40, %v6348_v53  ;;  %v14452_v45 = vshll.u32 %v14339_v37, 16  ;;  %v14460_v3 = vor.u32 %v6359_v54, %v6358_v23  ;;  %v6492_v16 = vsel %vm704_vm0, %v14054_v30, 0 }
 0x45b   : > { %v6352_v1 = vor.u32 %v6351_v28, %v6350_v13  ;;  %15872 = vst [vmem:[#allocation7_spill] sm:$0xff] %v14449_v21  ;;  %v14466_v51 = vshrl.u32 %v14335_v44, 16  ;;  %v14469_v40 = vshll.u32 %v14335_v44, 16  ;;  %v14473_v37 = vshrl.u32 %v14358_v50, 16 }
 0x45c   : > { %v14434_v61 = vld [vmem:[#allocation2 + $0xc0] sm:$0xf]  ;;  %15875 = vst [vmem:[#allocation10_spill] sm:$0xff] %v14460_v3  ;;  %v14476_v41 = vshll.u32 %v14358_v50, 16  ;;  %v14479_v56 = vshrl.u32 %v14353_v9, 16  ;;  %v14483_v30 = vsel %vm6309_vm5, %v6356_v55, %v14460_v3  ;;  %v14487_v44 = vshll.u32 %v14353_v9, 16 }
 0x45d   : > { %v5479_v6 = vrot.slane %v14434_v61, 4  ;;  %v14455_v47 = vsel %vm6309_vm5, %v6348_v53, %v6352_v1  ;;  %v14458_v34 = vsel %vm6309_vm5, %v6352_v1, %v6356_v55  ;;  %15876 = vst [vmem:[#allocation11_spill] sm:$0xff] %v14483_v30  ;;  %v6374_v62 = vrot.slane %v14439_v12, 4 }
 0x45e   : > { %15873 = vst [vmem:[#allocation8_spill] sm:$0xff] %v14455_v47  ;;  %15874 = vst [vmem:[#allocation9_spill] sm:$0xff] %v14458_v34  ;;  %v6375_v50 = vrot.slane %v14443_v38, 5  ;;  %v14495_v22 = vshll.u32 %v14375_v7, 16  ;;  %v14498_v13 = vshrl.u32 %v14371_v29, 16  ;;  %v6378_v26 = vrot.slane %v14446_v0, 4 }
 0x45f   : > { %v5480_v49 = vsel %vm704_vm0, %v5477_v33, %v5479_v6  ;;  %v14490_v33 = vshrl.u32 %v14375_v7, 16  ;;  %v6379_v28 = vrot.slane %v14452_v45, 5  ;;  %v14503_v9 = vshll.u32 %v14371_v29, 16  ;;  %v14531_v6 = vld [vmem:[%s15798_s3 + $0xc] sm:$0xf] }
 0x460   : > { %11457 = vmatmul.mubr.msk.bf16.gmra.mrb[44].mxu1 %vm253_vm1, %v5480_v49  ;;  %v14505_v15 = vshrl.u32 %v5399_v48, 16  ;;  %v14507_v4 = vor.u32 %v6375_v50, %v6374_v62  ;;  %v6382_v35 = vrot.slane %v14466_v51, 4  ;;  %v14510_v27 = vshll.u32 %v5399_v48, 16 }
 0x461   : > { %11462 = vmatprep.mubr.msk.bf16.mxu1 %vm253_vm1, %v5798_v25  ;;  %v6380_v7 = vor.u32 %v6379_v28, %v6378_v26  ;;  %v6383_v53 = vrot.slane %v14469_v40, 5  ;;  %v6386_v1 = vrot.slane %v14473_v37, 4  ;;  %v14515_v42 = vshrl.u32 %v14398_v18, 16 }
 0x462   : > { %15877 = vst [vmem:[#allocation12_spill] sm:$0xff] %v14507_v4  ;;  %v14518_v23 = vshll.u32 %v14398_v18, 16  ;;  %v6387_v29 = vrot.slane %v14476_v41, 5  ;;  %v6390_v58 = vrot.slane %v14479_v56, 4  ;;  %v6391_v25 = vrot.slane %v14487_v44, 5 }
 0x463   : > { %v14524_v54 = vsel %vm6309_vm5, %v14507_v4, %v6380_v7  ;;  %v6384_v48 = vor.u32 %v6383_v53, %v6382_v35  ;;  %v6394_v55 = vrot.slane %v14490_v33, 4  ;;  %v6395_v49 = vrot.slane %v14495_v22, 5 }
 0x464   : > { %15878 = vst [vmem:[#allocation13_spill] sm:$0xff] %v14524_v54  ;;  %v6388_v18 = vor.u32 %v6387_v29, %v6386_v1  ;;  %v6398_v62 = vrot.slane %v14498_v13, 4  ;;  %v6399_v50 = vrot.slane %v14503_v9, 5  ;;  %v6392_v28 = vor.u32 %v6391_v25, %v6390_v58 }
 0x465   : > { %v14539_v26 = vsel %vm6309_vm5, %v6380_v7, %v6384_v48  ;;  %v6402_v35 = vrot.slane %v14505_v15, 4  ;;  %v6403_v53 = vrot.slane %v14510_v27, 5  ;;  %v6396_v29 = vor.u32 %v6395_v49, %v6394_v55 }
 0x466   : > { %15879 = vst [vmem:[#allocation14_spill] sm:$0xff] %v14539_v26  ;;  %v14546_v1 = vsel %vm6309_vm5, %v6384_v48, %v6388_v18  ;;  %v6400_v54 = vor.u32 %v6399_v50, %v6398_v62  ;;  %v6406_v4 = vrot.slane %v14515_v42, 4  ;;  %v6407_v58 = vrot.slane %v14518_v23, 5 }
 0x467   : > { %15880 = vst [vmem:[#allocation15_spill] sm:$0xff] %v14546_v1  ;;  %v6404_v7 = vor.u32 %v6403_v53, %v6402_v35  ;;  %v6914_v49 = vrot.slane %v14446_v0, 7  ;;  %v6922_v50 = vrot.slane %v14466_v51, 7  ;;  %v6930_v53 = vrot.slane %v14473_v37, 7 }
 0x468   : > { %11463 = vmatmul.mubr.msk.bf16.vlgmr.msra.gmra.mrb[0].mxu1 %vm253_vm1, %v14084_v46  ;;  %v14552_v46 = vsel %vm6309_vm5, %v6388_v18, %v6392_v28  ;;  %v14564_v25 = vor.u32 %v6407_v58, %v6406_v4  ;;  %v14576_v18 = vld [vmem:[#allocation2 + $0x10] sm:$0xff]  ;;  %v6906_v4 = vrot.slane %v14439_v12, 7  ;;  %v6962_v35 = vrot.slane %v14505_v15, 7 }
 0x469   : > { %11511 = vmatpush3.bf16.msra.mxu1 %v6492_v16  ;;  %11466 = vmatprep.mubr.msk.bf16.mxu1 %vm253_vm1, %v14102_v59  ;;  %15881 = vst [vmem:[#allocation16_spill] sm:$0xff] %v14552_v46  ;;  %v14556_v16 = vsel %vm6309_vm5, %v6392_v28, %v6396_v29  ;;  %v14559_v59 = vsel %vm6309_vm5, %v6396_v29, %v6400_v54  ;;  %15887 = vst [vmem:[#allocation22_spill] sm:$0xff] %v14576_v18  ;;  %v6938_v29 = vrot.slane %v14479_v56, 7 }
 0x46a   : > { %12640 = vmatprep.subr.msk.bf16.mxu1 %vm704_vm0, %v14531_v6  ;;  %15882 = vst [vmem:[#allocation17_spill] sm:$0xff] %v14556_v16  ;;  %15883 = vst [vmem:[#allocation18_spill] sm:$0xff] %v14559_v59  ;;  %v14562_v48 = vsel %vm6309_vm5, %v6400_v54, %v6404_v7  ;;  %v14568_v55 = vsel %vm6309_vm5, %v6404_v7, %v14564_v25  ;;  %v14581_v54 = vld [vmem:[#allocation2 + $0x18] sm:$0xff]  ;;  %v14586_v62 = vor.u32 %v6906_v4, %v14443_v38  ;;  %v14600_v7 = vld [vmem:[#allocation2 + $0xc0] sm:$0xff] }
 0x46b   : > { %15884 = vst [vmem:[#allocation19_spill] sm:$0xff] %v14562_v48  ;;  %15885 = vst [vmem:[#allocation20_spill] sm:$0xff] %v14564_v25  ;;  %v6933_v25 = vor.u32 %v6930_v53, %v14476_v41  ;;  %v6941_v28 = vor.u32 %v6938_v29, %v14487_v44  ;;  %v14620_v48 = vshrl.u32 %v14600_v7, 16 }
 0x46c   : > { %15886 = vst [vmem:[#allocation21_spill] sm:$0xff] %v14568_v55  ;;  %15888 = vst [vmem:[#allocation23_spill] sm:$0xff] %v14581_v54  ;;  %v6970_v55 = vrot.slane %v14515_v42, 7 }
 0x46d   : > { %15889 = vst [vmem:[#allocation24_spill] sm:$0xff] %v14586_v62  ;;  %15892 = vst [vmem:[#allocation27_spill] sm:$0xff] %v14600_v7  ;;  %v6954_v62 = vrot.slane %v14498_v13, 7  ;;  %v14625_v59 = vsel %vm6794_vm6, %v6922_v50, %v6933_v25  ;;  %v14628_v16 = vsel %vm6794_vm6, %v6930_v53, %v6941_v28  ;;  %v15815_v46 = vrot.slane %v14620_v48, 7 }
 0x46e   : > { %15895 = vst [vmem:[#allocation30_spill] sm:$0xff] %v14620_v48  ;;  %15896 = vst [vmem:[#allocation31_spill] sm:$0xff] %v14625_v59  ;;  %v14643_v25 = vshrl.u32 %v14268_v52, 16 }
 0x46f   : > { %15897 = vst [vmem:[#allocation32_spill] sm:$0xff] %v14628_v16 }
 0x470   : > { %11467 = vmatmul.mubr.msk.bf16.gmra.mrb[4].mxu1 %vm253_vm1, %v14135_v57  ;;  %v6946_v57 = vrot.slane %v14490_v33, 7  ;;  %15901 = vst [vmem:[#allocation36_spill] sm:$0xff] %v14643_v25 }
 0x471   : > { %11470 = vmatprep.mubr.msk.bf16.mxu1 %vm253_vm1, %v14151_v2  ;;  %v14589_v2 = vshrl.u32 %v14276_v63, 16 }
 0x473   : > { %15890 = vst [vmem:[#allocation25_spill] sm:$0xff] %v14589_v2 }
 0x478   : > { %11471 = vmatmul.mubr.msk.bf16.gmra.mrb[8].mxu1 %vm253_vm1, %v14184_v20  ;;  %v14592_v20 = vshll.u32 %v14276_v63, 16  ;;  %v6925_v63 = vor.u32 %v6922_v50, %v14469_v40  ;;  %v14646_v50 = vshll.u32 %v14268_v52, 16 }
 0x479   : > { %11474 = vmatprep.mubr.msk.bf16.mxu1 %vm253_vm1, %v14202_v60  ;;  %v6917_v60 = vor.u32 %v6914_v49, %v14452_v45 }
 0x47a   : > { %15891 = vst [vmem:[#allocation26_spill] sm:$0xff] %v14592_v20  ;;  %15902 = vst [vmem:[#allocation37_spill] sm:$0xff] %v14646_v50 }
 0x47b   : > { %v14603_v58 = vsel %vm6794_vm6, %v6906_v4, %v6917_v60  ;;  %v14615_v4 = vsel %vm6794_vm6, %v6914_v49, %v6925_v63  ;;  %v6949_v60 = vor.u32 %v6946_v57, %v14495_v22  ;;  %v6973_v49 = vor.u32 %v6970_v55, %v14518_v23 }
 0x47c   : > { %15893 = vst [vmem:[#allocation28_spill] sm:$0xff] %v14603_v58  ;;  %15894 = vst [vmem:[#allocation29_spill] sm:$0xff] %v14615_v4  ;;  %v6957_v58 = vor.u32 %v6954_v62, %v14503_v9 }
 0x47d   : > { %v14633_v63 = vsel %vm6794_vm6, %v6938_v29, %v6949_v60  ;;  %v14652_v53 = vsel %vm6794_vm6, %v6962_v35, %v6973_v49  ;;  %v5892_v49 = vrot.slane %v14589_v2, 3 }
 0x47e   : > { %15898 = vst [vmem:[#allocation33_spill] sm:$0xff] %v14633_v63  ;;  %v14636_v4 = vsel %vm6794_vm6, %v6946_v57, %v6957_v58  ;;  %15904 = vst [vmem:[#allocation39_spill] sm:$0xff] %v14652_v53  ;;  %v15816_v57 = vshrl.u32 %v14581_v54, 16  ;;  %v15905_v58 = vshll.u32 %v14576_v18, 16 }
 0x47f   : > { %15899 = vst [vmem:[#allocation34_spill] sm:$0xff] %v14636_v4 }
 0x480   : > { %11475 = vmatmul.mubr.msk.bf16.gmra.mrb[12].mxu1 %vm253_vm1, %v14235_v24  ;;  %v6965_v24 = vor.u32 %v6962_v35, %v14510_v27  ;;  %v7697_v60 = vrot.slane %v15905_v58, 1  ;;  %v5901_v58 = vrot.slane %v14643_v25, 3 }
 0x481   : > { %11478 = vmatprep.mubr.msk.bf16.mxu1 %vm253_vm1, %v14251_v31  ;;  %v14640_v31 = vshll.u32 %v14600_v7, 16  ;;  %v15906_v7 = vshll.u32 %v14581_v54, 16  ;;  %v14814_v54 = vld [vmem:[#allocation2 + $0xb8] sm:$0xff] }
 0x482   : > { %v14649_v28 = vsel %vm6794_vm6, %v6954_v62, %v6965_v24  ;;  %v15908_v62 = vshrl.u32 %v14576_v18, 16  ;;  %15916 = vst [vmem:[#allocation48_spill] sm:$0xff] %v14814_v54 }
 0x483   : > { %15900 = vst [vmem:[#allocation35_spill] sm:$0xff] %v14640_v31  ;;  %15903 = vst [vmem:[#allocation38_spill] sm:$0xff] %v14649_v28  ;;  %v6981_v29 = vor.u32 %v14640_v31, %v15815_v46  ;;  %v7702_v4 = vrot.slane %v15906_v7, 1  ;;  %v5895_v46 = vrot.slane %v14592_v20, 4  ;;  %v5904_v7 = vrot.slane %v14646_v50, 4  ;;  %v14805_v28 = vld [vmem:[#allocation2 + $0xb0] sm:$0xff] }
 0x484   : > { %v7698_v24 = vor.u32 %v7697_v60, %v15908_v62  ;;  %v14686_v60 = vshll.u32 %v14314_v17, 16  ;;  %v14826_v30 = vshll.u32 %v14805_v28, 16  ;;  %v14829_v50 = vshrl.u32 %v14805_v28, 16 }
 0x485   : > { %v14663_v52 = vsel %vm6794_vm6, %v6970_v55, %v6981_v29  ;;  %v14669_v35 = vor.u32 %v7702_v4, %v15816_v57  ;;  %v14683_v29 = vshrl.u32 %v14314_v17, 16  ;;  %v5896_v62 = vor.u32 %v5895_v46, %v5892_v49 }
 0x486   : > { %15907 = vst [vmem:[#allocation40_spill] sm:$0xff] %v14663_v52  ;;  %v14678_v55 = vsel %vm435_vm2, %v7698_v24, %v7702_v4  ;;  %15912 = vst [vmem:[#allocation44_spill] sm:$0xff] %v14686_v60  ;;  %v5905_v57 = vor.u32 %v5904_v7, %v5901_v58  ;;  %v5913_v31 = vrot.slane %v14686_v60, 4  ;;  %v5922_v24 = vrot.slane %v14443_v38, 4 }
 0x487   : > { %15909 = vst [vmem:[#allocation41_spill] sm:$0xff] %v14669_v35  ;;  %15910 = vst [vmem:[#allocation42_spill] sm:$0xff] %v14678_v55  ;;  %v5897_v35 = vsel %vm5781_vm4, %v14285_v39, %v5896_v62  ;;  %v5928_v58 = vrot.slane %v14446_v0, 3  ;;  %v5931_v7 = vrot.slane %v14452_v45, 4  ;;  %v5937_v39 = vrot.slane %v14466_v51, 3 }
 0x488   : > { %11479 = vmatmul.mubr.msk.bf16.gmra.mrb[16].mxu1 %vm253_vm1, %v14280_v10  ;;  %15911 = vst [vmem:[#allocation43_spill] sm:$0xff] %v14683_v29  ;;  %v5910_v10 = vrot.slane %v14683_v29, 3  ;;  %v5906_v4 = vsel %vm5781_vm4, %v5896_v62, %v5905_v57  ;;  %v5946_v62 = vrot.slane %v14473_v37, 3  ;;  %v5955_v38 = vrot.slane %v14479_v56, 3  ;;  %15918 = vst [vmem:[#allocation50_spill] sm:$0xff] %v14826_v30 }
 0x489   : > { %11482 = vmatprep.mubr.msk.bf16.mxu1 %vm253_vm1, %v14296_v32  ;;  %v5919_v32 = vrot.slane %v14439_v12, 3  ;;  %v5949_v12 = vrot.slane %v14476_v41, 4  ;;  %v5973_v45 = vrot.slane %v14498_v13, 3  ;;  %v5976_v51 = vrot.slane %v14503_v9, 4  ;;  %15919 = vst [vmem:[#allocation51_spill] sm:$0xff] %v14829_v50 }
 0x48a   : > { %v5914_v17 = vor.u32 %v5913_v31, %v5910_v10  ;;  %v5964_v31 = vrot.slane %v14490_v33, 3  ;;  %v14836_v20 = vshll.u32 %v14814_v54, 16 }
 0x48b   : > { %v5923_v46 = vor.u32 %v5922_v24, %v5919_v32  ;;  %v5950_v41 = vor.u32 %v5949_v12, %v5946_v62  ;;  %v14717_v32 = vld [vmem:[#allocation2 + $0x60] sm:$0xff]  ;;  %v14737_v62 = vld [vmem:[#allocation2 + $0x78] sm:$0xff] }
 0x48c   : > { %v5915_v49 = vsel %vm5781_vm4, %v5905_v57, %v5914_v17  ;;  %v5967_v57 = vrot.slane %v14495_v22, 4  ;;  %15913 = vst [vmem:[#allocation45_spill] sm:$0xff] %v14717_v32  ;;  %v14739_v12 = vld [vmem:[#allocation2 + $0x80] sm:$0xff]  ;;  %15921 = vst [vmem:[#allocation53_spill] sm:$0xff] %v14836_v20 }
 0x48d   : > { %v5924_v0 = vsel %vm5781_vm4, %v5914_v17, %v5923_v46 }
 0x48e   : > { %v5968_v10 = vor.u32 %v5967_v57, %v5964_v31  ;;  %v14745_v31 = vshll.u32 %v14717_v32, 16  ;;  %v14748_v57 = vshrl.u32 %v14717_v32, 16 }
 0x490   : > { %11483 = vmatmul.mubr.msk.bf16.gmra.mrb[20].mxu1 %vm253_vm1, %v5897_v35  ;;  %v5940_v35 = vrot.slane %v14469_v40, 4  ;;  %v5932_v40 = vor.u32 %v5931_v7, %v5928_v58  ;;  %v14727_v58 = vld [vmem:[#allocation2 + $0x70] sm:$0xff]  ;;  %v8346_v63 = vrot.slane %v14748_v57, 3  ;;  %v8349_v18 = vrot.slane %v14745_v31, 4 }
 0x491   : > { %11486 = vmatprep.mubr.msk.bf16.mxu1 %vm253_vm1, %v5906_v4  ;;  %v5958_v4 = vrot.slane %v14487_v44, 4  ;;  %v14713_v44 = vor.u32 %v5976_v51, %v5973_v45  ;;  %v14752_v45 = vld [vmem:[#allocation2 + $0x90] sm:$0xff] }
 0x492   : > { %v5941_v37 = vor.u32 %v5940_v35, %v5937_v39  ;;  %v5933_v33 = vsel %vm5781_vm4, %v5923_v46, %v5932_v40  ;;  %v14782_v35 = vld [vmem:[#allocation2 + $0xa8] sm:$0xff]  ;;  %v14791_v7 = vshll.u32 %v14752_v45, 16  ;;  %v14794_v55 = vshrl.u32 %v14752_v45, 16 }
 0x493   : > { %v5959_v56 = vor.u32 %v5958_v4, %v5955_v38  ;;  %v14732_v46 = vsel %vm5781_vm4, %v5968_v10, %v14713_v44  ;;  %v14777_v4 = vshll.u32 %v14739_v12, 16  ;;  %v14780_v38 = vshrl.u32 %v14739_v12, 16 }
 0x494   : > { %v5942_v22 = vsel %vm5781_vm4, %v5932_v40, %v5941_v37  ;;  %v5951_v24 = vsel %vm5781_vm4, %v5941_v37, %v5950_v41  ;;  %v14761_v37 = vshll.u32 %v14727_v58, 16  ;;  %v14812_v59 = vshll.u32 %v14782_v35, 16 }
 0x495   : > { %v5960_v13 = vsel %vm5781_vm4, %v5950_v41, %v5959_v56  ;;  %v14722_v9 = vsel %vm5781_vm4, %v5959_v56, %v5968_v10  ;;  %v14764_v41 = vshrl.u32 %v14727_v58, 16  ;;  %v14766_v56 = vld [vmem:[#allocation2 + $0x98] sm:$0xff]  ;;  %v14768_v10 = vld [vmem:[#allocation2 + $0xa0] sm:$0xff]  ;;  %15914 = vst [vmem:[#allocation46_spill] sm:$0xff] %v14777_v4  ;;  %v14819_v26 = vshrl.u32 %v14782_v35, 16 }
 0x496   : > { %v14797_v48 = vshll.u32 %v14766_v56, 16  ;;  %v14800_v52 = vshrl.u32 %v14766_v56, 16  ;;  %v14803_v53 = vshll.u32 %v14768_v10, 16  ;;  %v14809_v16 = vshrl.u32 %v14768_v10, 16 }
 0x497   : > { %15917 = vst [vmem:[#allocation49_spill] sm:$0xff] %v14819_v26  ;;  %v8364_v29 = vrot.slane %v14764_v41, 3  ;;  %v8367_v3 = vrot.slane %v14761_v37, 4  ;;  %v14831_v25 = vor.u32 %v8349_v18, %v8346_v63  ;;  %v8382_v19 = vrot.slane %v14780_v38, 3 }
 0x498   : > { %11487 = vmatmul.mubr.msk.bf16.gmra.mrb[24].mxu1 %vm253_vm1, %v5915_v49  ;;  %v14725_v49 = vld [vmem:[#allocation2 + $0x68] sm:$0xff]  ;;  %v8385_v11 = vrot.slane %v14777_v4, 4  ;;  %v8403_v8 = vrot.slane %v14791_v7, 4  ;;  %v8409_v14 = vrot.slane %v14800_v52, 3 }
 0x499   : > { %11490 = vmatprep.mubr.msk.bf16.mxu1 %vm253_vm1, %v5924_v0  ;;  %v14750_v0 = vld [vmem:[#allocation2 + $0x88] sm:$0xff]  ;;  %v14755_v51 = vshll.u32 %v14725_v49, 16  ;;  %v14758_v40 = vshrl.u32 %v14725_v49, 16  ;;  %15920 = vst [vmem:[#allocation52_spill] sm:$0xff] %v14831_v25  ;;  %v8368_v47 = vor.u32 %v8367_v3, %v8364_v29 }
 0x49a   : > { %v14785_v17 = vshll.u32 %v14750_v0, 16  ;;  %v14788_v39 = vshrl.u32 %v14750_v0, 16  ;;  %v8386_v29 = vor.u32 %v8385_v11, %v8382_v19  ;;  %v8421_v11 = vrot.slane %v14803_v53, 4 }
 0x49b   : > { %v8355_v1 = vrot.slane %v14758_v40, 3  ;;  %v8358_v60 = vrot.slane %v14755_v51, 4  ;;  %v8427_v19 = vrot.slane %v14819_v26, 3 }
 0x49c   : > { %15915 = vst [vmem:[#allocation47_spill] sm:$0xff] %v14788_v39  ;;  %v8391_v18 = vrot.slane %v14788_v39, 3  ;;  %v8394_v3 = vrot.slane %v14785_v17, 4 }
 0x49d   : > { %v8359_v2 = vor.u32 %v8358_v60, %v8355_v1  ;;  %v8400_v60 = vrot.slane %v14794_v55, 3 }
 0x49e   : > { %v8395_v39 = vor.u32 %v8394_v3, %v8391_v18  ;;  %v8436_v18 = vrot.slane %v14829_v50, 3 }
 0x49f   : > { %v14847_v63 = vsel %vm5781_vm4, %v14831_v25, %v8359_v2  ;;  %v8412_v25 = vrot.slane %v14797_v48, 4 }
 0x4a0   : > { %11491 = vmatmul.mubr.msk.bf16.gmra.mrb[28].mxu1 %vm253_vm1, %v5933_v33  ;;  %v14771_v33 = vshll.u32 %v14737_v62, 16  ;;  %15923 = vst [vmem:[#allocation55_spill] sm:$0xff] %v14847_v63  ;;  %v8418_v63 = vrot.slane %v14809_v16, 3 }
 0x4a1   : > { %11494 = vmatprep.mubr.msk.bf16.mxu1 %vm253_vm1, %v5942_v22  ;;  %v14774_v22 = vshrl.u32 %v14737_v62, 16 }
 0x4a2   : > { %v8376_v21 = vrot.slane %v14771_v33, 4 }
 0x4a3   : > { %v8373_v34 = vrot.slane %v14774_v22, 3 }
 0x4a5   : > { %v8377_v1 = vor.u32 %v8376_v21, %v8373_v34  ;;  %v8404_v21 = vor.u32 %v8403_v8, %v8400_v60  ;;  %v14867_v34 = vsel %vm5781_vm4, %v8386_v29, %v8395_v39  ;;  %v8439_v8 = vrot.slane %v14826_v30, 4 }
 0x4a6   : > { %15927 = vst [vmem:[#allocation59_spill] sm:$0xff] %v14867_v34 }
 0x4a7   : > { %v14857_v4 = vsel %vm5781_vm4, %v8368_v47, %v8377_v1  ;;  %v14874_v3 = vsel %vm5781_vm4, %v8395_v39, %v8404_v21  ;;  %v15931_v39 = vrot.slane %v14505_v15, 3 }
 0x4a8   : > { %11495 = vmatmul.mubr.msk.bf16.gmra.mrb[32].mxu1 %vm253_vm1, %v5951_v24  ;;  %v14840_v24 = vshrl.u32 %v14814_v54, 16  ;;  %15925 = vst [vmem:[#allocation57_spill] sm:$0xff] %v14857_v4  ;;  %15928 = vst [vmem:[#allocation60_spill] sm:$0xff] %v14874_v3 }
 0x4a9   : > { %11498 = vmatprep.mubr.msk.bf16.mxu1 %vm253_vm1, %v5960_v13  ;;  %v14850_v13 = vsel %vm5781_vm4, %v8359_v2, %v8368_v47  ;;  %v14862_v2 = vsel %vm5781_vm4, %v8377_v1, %v8386_v29  ;;  %v8430_v47 = vrot.slane %v14812_v59, 4  ;;  %v8422_v1 = vor.u32 %v8421_v11, %v8418_v63 }
 0x4aa   : > { %15922 = vst [vmem:[#allocation54_spill] sm:$0xff] %v14840_v24  ;;  %15924 = vst [vmem:[#allocation56_spill] sm:$0xff] %v14850_v13  ;;  %v8413_v13 = vor.u32 %v8412_v25, %v8409_v14  ;;  %v8445_v60 = vrot.slane %v14840_v24, 3  ;;  %v8448_v29 = vrot.slane %v14836_v20, 4  ;;  %v15932_v63 = vrot.slane %v14510_v27, 4 }
 0x4ab   : > { %15926 = vst [vmem:[#allocation58_spill] sm:$0xff] %v14862_v2  ;;  %v8431_v25 = vor.u32 %v8430_v47, %v8427_v19  ;;  %v15937_v47 = vshrl.u32 %v14434_v61, 16 }
 0x4ac   : > { %v14881_v14 = vsel %vm5781_vm4, %v8404_v21, %v8413_v13  ;;  %v14885_v34 = vsel %vm5781_vm4, %v8413_v13, %v8422_v1  ;;  %v5986_v11 = vor.u32 %v15932_v63, %v15931_v39  ;;  %v14894_v2 = vor.u32 %v8448_v29, %v8445_v60 }
 0x4ad   : > { %15929 = vst [vmem:[#allocation61_spill] sm:$0xff] %v14881_v14  ;;  %15930 = vst [vmem:[#allocation62_spill] sm:$0xff] %v14885_v34  ;;  %v14892_v3 = vsel %vm5781_vm4, %v8422_v1, %v8431_v25  ;;  %v15936_v21 = vrot.slane %v14518_v23, 4  ;;  %v6000_v13 = vrot.slane %v15937_v47, 3  ;;  %v8882_v60 = vrot.slane %v14725_v49, 4  ;;  %v15198_v34 = vld [vmem:[#allocation2 + $0x58] sm:$0xff] }
 0x4ae   : > { %15933 = vst [vmem:[#allocation63_spill] sm:$0xff] %v14892_v3  ;;  %15934 = vst [vmem:[#allocation64_spill] sm:$0xff] %v14894_v2  ;;  %v5987_v1 = vsel %vm5781_vm4, %v14713_v44, %v5986_v11  ;;  %v8886_v29 = vrot.slane %v14737_v62, 4  ;;  %v8888_v39 = vrot.slane %v14739_v12, 4  ;;  %v8890_v63 = vrot.slane %v14750_v0, 4 }
 0x4af   : > { %v8894_v62 = vrot.slane %v14766_v56, 4  ;;  %v8896_v12 = vrot.slane %v14768_v10, 4  ;;  %v8898_v0 = vrot.slane %v14782_v35, 4  ;;  %v15843_v56 = vrot.slane %v14814_v54, 4 }
 0x4b0   : > { %11499 = vmatmul.mubr.msk.bf16.gmra.mrb[36].mxu1 %vm253_vm1, %v14722_v9  ;;  %v8440_v9 = vor.u32 %v8439_v8, %v8436_v18  ;;  %v15938_v18 = vshll.u32 %v14434_v61, 16  ;;  %v15844_v61 = vrot.slane %v14717_v32, 4  ;;  %v7064_v10 = vsel %vm704_vm0, %v14531_v6, 0  ;;  %v14984_v6 = vld [vmem:[#allocation2 + $0xd0] sm:$0xff]  ;;  %v15174_v32 = vld [vmem:[#allocation2 + $0x48] sm:$0xff] }
 0x4b1   : > { %11502 = vmatprep.mubr.msk.bf16.mxu1 %vm253_vm1, %v14732_v46  ;;  %v15935_v46 = vrot.slane %v14515_v42, 3  ;;  %15952 = vst [vmem:[#allocation78_spill] sm:$0xff] %v14984_v6  ;;  %v15202_v14 = vshll.u32 %v15174_v32, 16 }
 0x4b2   : > { %v6003_v8 = vrot.slane %v15938_v18, 4  ;;  %v14905_v15 = vsel %vm5781_vm4, %v8431_v25, %v8440_v9  ;;  %v14909_v27 = vsel %vm5781_vm4, %v8440_v9, %v14894_v2  ;;  %v8884_v25 = vrot.slane %v14727_v58, 4  ;;  %v15180_v2 = vld [vmem:[#allocation2 + $0x50] sm:$0xff] }
 0x4b3   : > { %v5995_v19 = vor.u32 %v15936_v21, %v15935_v46  ;;  %15939 = vst [vmem:[#allocation65_spill] sm:$0xff] %v14905_v15  ;;  %15940 = vst [vmem:[#allocation66_spill] sm:$0xff] %v14909_v27  ;;  %v14924_v44 = vsel %vm704_vm0, %v15844_v61, %v8882_v60  ;;  %v8892_v58 = vrot.slane %v14752_v45, 4  ;;  %v14937_v46 = vsel %vm704_vm0, %v8886_v29, %v8888_v39  ;;  %v15959_v61 = vld [vmem:[#allocation4_spill] sm:$0xff] }
 0x4b4   : > { %v6004_v23 = vor.u32 %v6003_v8, %v6000_v13  ;;  %15941 = vst [vmem:[#allocation67_spill] sm:$0xff] %v14924_v44  ;;  %v14932_v49 = vsel %vm704_vm0, %v8884_v25, %v8886_v29  ;;  %15944 = vst [vmem:[#allocation70_spill] sm:$0xff] %v14937_v46  ;;  %v14940_v21 = vsel %vm704_vm0, %v8888_v39, %v8890_v63  ;;  %v8900_v45 = vrot.slane %v14805_v28, 4  ;;  %v14974_v8 = vld [vmem:[%s15798_s3 + $0x10] sm:$0xf]  ;;  %v15148_v46 = vld [vmem:[#allocation2 + $0x38] sm:$0xff] }
 0x4b5   : > { %v5996_v42 = vsel %vm5781_vm4, %v5986_v11, %v5995_v19  ;;  %v14929_v11 = vsel %vm704_vm0, %v8882_v60, %v8884_v25  ;;  %15943 = vst [vmem:[#allocation69_spill] sm:$0xff] %v14932_v49  ;;  %15945 = vst [vmem:[#allocation71_spill] sm:$0xff] %v14940_v21  ;;  %v14948_v47 = vsel %vm704_vm0, %v8892_v58, %v8894_v62  ;;  %v9312_v25 = vrot.slane %v14761_v37, 5 }
 0x4b6   : > { %v6005_v9 = vsel %vm5781_vm4, %v5995_v19, %v6004_v23  ;;  %15942 = vst [vmem:[#allocation68_spill] sm:$0xff] %v14929_v11  ;;  %v14945_v19 = vsel %vm704_vm0, %v8890_v63, %v8892_v58  ;;  %15947 = vst [vmem:[#allocation73_spill] sm:$0xff] %v14948_v47  ;;  %v14954_v13 = vsel %vm704_vm0, %v8894_v62, %v8896_v12  ;;  %v9308_v23 = vrot.slane %v14755_v51, 5 }
 0x4b7   : > { %15946 = vst [vmem:[#allocation72_spill] sm:$0xff] %v14945_v19  ;;  %15948 = vst [vmem:[#allocation74_spill] sm:$0xff] %v14954_v13  ;;  %v14957_v18 = vsel %vm704_vm0, %v8896_v12, %v8898_v0  ;;  %v14962_v35 = vsel %vm704_vm0, %v8898_v0, %v8900_v45  ;;  %v14967_v28 = vsel %vm704_vm0, %v8900_v45, %v15843_v56  ;;  %v9315_v29 = vrot.slane %v14774_v22, 4  ;;  %v15955_v45 = vld [vmem:[#allocation46_spill] sm:$0xff]  ;;  %v15143_v19 = vld [vmem:[%s15798_s3 + $0x14] sm:$0xf] }
 0x4b8   : > { %11503 = vmatmul.mubr.msk.bf16.gmra.mrb[40].mxu1 %vm253_vm1, %v5987_v1  ;;  %15949 = vst [vmem:[#allocation75_spill] sm:$0xff] %v14957_v18  ;;  %15950 = vst [vmem:[#allocation76_spill] sm:$0xff] %v14962_v35  ;;  %v9304_v1 = vrot.slane %v14745_v31, 5  ;;  %v9319_v62 = vrot.slane %v14780_v38, 4  ;;  %v9324_v56 = vrot.slane %v14785_v17, 5  ;;  %v9331_v63 = vrot.slane %v14800_v52, 4 }
 0x4b9   : > { %11506 = vmatprep.mubr.msk.bf16.mxu1 %vm253_vm1, %v5996_v42  ;;  %15951 = vst [vmem:[#allocation77_spill] sm:$0xff] %v14967_v28  ;;  %v9307_v42 = vrot.slane %v14758_v40, 4  ;;  %v15205_v4 = vshll.u32 %v15180_v2, 16 }
 0x4c0   : > { %11507 = vmatmul.mubr.msk.bf16.gmra.mrb[44].mxu1 %vm253_vm1, %v6005_v9  ;;  %v9316_v9 = vrot.slane %v14771_v33, 5 }
 0x4c1   : > { %11512 = vmatprep.mubr.msk.bf16.mxu1 %vm253_vm1, %v14387_v5  ;;  %v9303_v5 = vrot.slane %v14748_v57, 4 }
 0x4c2   : > { %v9317_v0 = vor.u32 %v9316_v9, %v9315_v29 }
 0x4c3   : > { %v14988_v60 = vor.u32 %v9304_v1, %v9303_v5  ;;  %v15956_v5 = vld [vmem:[#allocation47_spill] sm:$0xff] }
 0x4c4   : > { %v9323_v1 = vrot.slane %v15956_v5, 4 }
 0x4c5   : > { %15953 = vst [vmem:[#allocation79_spill] sm:$0xff] %v14988_v60 }
 0x4c6   : > { %v9325_v39 = vor.u32 %v9324_v56, %v9323_v1  ;;  %v9343_v1 = vrot.slane %v14829_v50, 4 }
 0x4c8   : > { %11513 = vmatmul.mubr.msk.bf16.vlgmr.msra.gmra.mrb[0].mxu1 %vm253_vm1, %v14115_v36  ;;  %v9311_v36 = vrot.slane %v14764_v41, 4 }
 0x4c9   : > { %11561 = vmatpush3.bf16.msra.mxu1 %v7064_v10  ;;  %11516 = vmatprep.mubr.msk.bf16.mxu1 %vm253_vm1, %v14215_v43  ;;  %v9309_v43 = vor.u32 %v9308_v23, %v9307_v42  ;;  %v9320_v10 = vrot.slane %v15955_v45, 5  ;;  %v15957_v42 = vld [vmem:[#allocation3_spill] sm:$0xff] }
 0x4ca   : > { %12641 = vmatprep.subr.msk.bf16.mxu1 %vm704_vm0, %v14974_v8  ;;  %v9313_v58 = vor.u32 %v9312_v25, %v9311_v36  ;;  %v9327_v36 = vrot.slane %v14794_v55, 4  ;;  %v9328_v25 = vrot.slane %v14791_v7, 5 }
 0x4cb   : > { %v14999_v12 = vsel %vm6309_vm5, %v14988_v60, %v9309_v43  ;;  %v9321_v9 = vor.u32 %v9320_v10, %v9319_v62 }
 0x4cc   : > { %15954 = vst [vmem:[#allocation80_spill] sm:$0xff] %v14999_v12  ;;  %v15006_v23 = vsel %vm6309_vm5, %v9309_v43, %v9313_v58  ;;  %v15014_v29 = vsel %vm6309_vm5, %v9313_v58, %v9317_v0  ;;  %v9329_v43 = vor.u32 %v9328_v25, %v9327_v36  ;;  %v9336_v12 = vrot.slane %v14803_v53, 5 }
 0x4cd   : > { %15958 = vst [vmem:[#allocation46_spill] sm:$0xff] %v15006_v23  ;;  %15960 = vst [vmem:[#allocation47_spill] sm:$0xff] %v15014_v29  ;;  %v9335_v23 = vrot.slane %v14809_v16, 4  ;;  %v15021_v60 = vsel %vm6309_vm5, %v9317_v0, %v9321_v9  ;;  %v9340_v58 = vrot.slane %v14812_v59, 5  ;;  %v15026_v62 = vsel %vm6309_vm5, %v9321_v9, %v9325_v39 }
 0x4ce   : > { %15961 = vst [vmem:[#allocation3_spill] sm:$0xff] %v15021_v60  ;;  %15962 = vst [vmem:[#allocation4_spill] sm:$0xff] %v15026_v62  ;;  %v15029_v10 = vsel %vm6309_vm5, %v9325_v39, %v9329_v43  ;;  %v9344_v0 = vrot.slane %v14826_v30, 5  ;;  %v9348_v9 = vrot.slane %v14836_v20, 5  ;;  %v15219_v20 = vshll.u32 %v15198_v34, 16 }
 0x4cf   : > { %15963 = vst [vmem:[#allocation81_spill] sm:$0xff] %v15029_v10  ;;  %v9337_v56 = vor.u32 %v9336_v12, %v9335_v23  ;;  %v15967_v12 = vld [vmem:[#allocation5_spill] sm:$0xff]  ;;  %v15971_v10 = vld [vmem:[#allocation6_spill] sm:$0xff] }
 0x4d0   : > { %11517 = vmatmul.mubr.msk.bf16.gmra.mrb[4].mxu1 %vm253_vm1, %v15957_v42  ;;  %v9332_v42 = vrot.slane %v14797_v48, 5  ;;  %v9345_v39 = vor.u32 %v9344_v0, %v9343_v1  ;;  %v15975_v0 = vld [vmem:[#allocation7_spill] sm:$0xff] }
 0x4d1   : > { %11520 = vmatprep.mubr.msk.bf16.mxu1 %vm253_vm1, %v15959_v61  ;;  %v9339_v61 = vrot.slane %v14819_v26, 4 }
 0x4d2   : > { %v9333_v54 = vor.u32 %v9332_v42, %v9331_v63  ;;  %v9347_v63 = vrot.slane %v14840_v24, 4 }
 0x4d3   : > { %v9341_v25 = vor.u32 %v9340_v58, %v9339_v61  ;;  %v15970_v58 = vshll.u32 %v14984_v6, 16 }
 0x4d4   : > { %v15033_v36 = vsel %vm6309_vm5, %v9329_v43, %v9333_v54  ;;  %v15038_v42 = vsel %vm6309_vm5, %v9333_v54, %v9337_v56  ;;  %v15046_v23 = vor.u32 %v9348_v9, %v9347_v63  ;;  %v15969_v43 = vshrl.u32 %v14984_v6, 16  ;;  %v15976_v63 = vld [vmem:[#allocation8_spill] sm:$0xff]  ;;  %v15977_v9 = vld [vmem:[#allocation25_spill] sm:$0xff] }
 0x4d5   : > { %15964 = vst [vmem:[#allocation82_spill] sm:$0xff] %v15033_v36  ;;  %15965 = vst [vmem:[#allocation83_spill] sm:$0xff] %v15038_v42  ;;  %v15042_v62 = vsel %vm6309_vm5, %v9337_v56, %v9341_v25  ;;  %v9360_v36 = vrot.slane %v15970_v58, 5  ;;  %v15055_v54 = vsel %vm6309_vm5, %v9341_v25, %v9345_v39  ;;  %v15980_v25 = vld [vmem:[#allocation36_spill] sm:$0xff]  ;;  %v15178_v6 = vshll.u32 %v15148_v46, 16 }
 0x4d6   : > { %15966 = vst [vmem:[#allocation84_spill] sm:$0xff] %v15042_v62  ;;  %15968 = vst [vmem:[#allocation5_spill] sm:$0xff] %v15046_v23  ;;  %v9359_v61 = vrot.slane %v15969_v43, 4  ;;  %v15059_v56 = vsel %vm6309_vm5, %v9345_v39, %v15046_v23  ;;  %v15978_v43 = vld [vmem:[#allocation26_spill] sm:$0xff]  ;;  %v15981_v62 = vld [vmem:[#allocation37_spill] sm:$0xff]  ;;  %v6882_v24 = vrot.slane %v15977_v9, 7 }
 0x4d7   : > { %15972 = vst [vmem:[#allocation6_spill] sm:$0xff] %v15055_v54  ;;  %15973 = vst [vmem:[#allocation85_spill] sm:$0xff] %v15059_v56  ;;  %v6363_v58 = vrot.slane %v15978_v43, 5  ;;  %v6366_v54 = vrot.slane %v15980_v25, 4  ;;  %v6367_v39 = vrot.slane %v15981_v62, 5  ;;  %v15982_v23 = vld [vmem:[#allocation11_spill] sm:$0xff] }
 0x4d8   : > { %11521 = vmatmul.mubr.msk.bf16.gmra.mrb[8].mxu1 %vm253_vm1, %v15967_v12  ;;  %v15061_v1 = vor.u32 %v9360_v36, %v9359_v61  ;;  %v6362_v12 = vrot.slane %v15977_v9, 4  ;;  %v15985_v42 = vld [vmem:[#allocation44_spill] sm:$0xff]  ;;  %v6885_v50 = vor.u32 %v6882_v24, %v15978_v43  ;;  %v16004_v43 = vld [vmem:[#allocation29_spill] sm:$0xff] }
 0x4d9   : > { %11524 = vmatprep.mubr.msk.bf16.mxu1 %vm253_vm1, %v15971_v10  ;;  %v15979_v10 = vld [vmem:[#allocation9_spill] sm:$0xff]  ;;  %v6368_v61 = vor.u32 %v6367_v39, %v6366_v54  ;;  %v6371_v60 = vrot.slane %v15985_v42, 5  ;;  %v15990_v39 = vld [vmem:[#allocation16_spill] sm:$0xff] }
 0x4da   : > { %15974 = vst [vmem:[#allocation86_spill] sm:$0xff] %v15061_v1  ;;  %v6364_v36 = vor.u32 %v6363_v58, %v6362_v12  ;;  %v15987_v12 = vld [vmem:[#allocation13_spill] sm:$0xff]  ;;  %v15988_v58 = vld [vmem:[#allocation14_spill] sm:$0xff] }
 0x4e0   : > { %11525 = vmatmul.mubr.msk.bf16.gmra.mrb[12].mxu1 %vm253_vm1, %v15975_v0  ;;  %v15983_v0 = vld [vmem:[#allocation10_spill] sm:$0xff] }
 0x4e1   : > { %11528 = vmatprep.mubr.msk.bf16.mxu1 %vm253_vm1, %v15976_v63  ;;  %v6365_v1 = vsel %vm6309_vm5, %v15983_v0, %v6364_v36  ;;  %v15984_v63 = vld [vmem:[#allocation43_spill] sm:$0xff] }
 0x4e2   : > { %v6370_v56 = vrot.slane %v15984_v63, 4 }
 0x4e4   : > { %v6372_v29 = vor.u32 %v6371_v60, %v6370_v56  ;;  %v15991_v60 = vld [vmem:[#allocation17_spill] sm:$0xff]  ;;  %v15992_v56 = vld [vmem:[#allocation18_spill] sm:$0xff] }
 0x4e6   : > { %v6373_v28 = vsel %vm6309_vm5, %v6368_v61, %v6372_v29 }
 0x4e8   : > { %11529 = vmatmul.mubr.msk.bf16.gmra.mrb[16].mxu1 %vm253_vm1, %v15979_v10  ;;  %v6369_v10 = vsel %vm6309_vm5, %v6364_v36, %v6368_v61  ;;  %v6767_v61 = vld [vmem:[#allocation2 + $0x8] sm:$0x80] }
 0x4e9   : > { %11532 = vmatprep.mubr.msk.bf16.mxu1 %vm253_vm1, %v15982_v23  ;;  %v15986_v23 = vld [vmem:[#allocation12_spill] sm:$0xff] }
 0x4ea   : > { %v6377_v54 = vsel %vm6309_vm5, %v6372_v29, %v15986_v23  ;;  %v15993_v23 = vld [vmem:[#allocation19_spill] sm:$0xff] }
 0x4f0   : > { %11533 = vmatmul.mubr.msk.bf16.gmra.mrb[20].mxu1 %vm253_vm1, %v6365_v1  ;;  %v15989_v1 = vld [vmem:[#allocation15_spill] sm:$0xff] }
 0x4f1   : > { %11536 = vmatprep.mubr.msk.bf16.mxu1 %vm253_vm1, %v6369_v10 }
 0x4f8   : > { %11537 = vmatmul.mubr.msk.bf16.gmra.mrb[24].mxu1 %vm253_vm1, %v6373_v28  ;;  %v6306_v28 = vld [vmem:[#allocation2 + $0xc0] sm:$0x1f] }
 0x4f9   : > { %11540 = vmatprep.mubr.msk.bf16.mxu1 %vm253_vm1, %v6377_v54  ;;  %v6411_v29 = vshrl.u32 %v6306_v28, 16  ;;  %v6414_v36 = vshll.u32 %v6306_v28, 16  ;;  %v6796_v54 = vshrl.u32 %v6767_v61, 16  ;;  %v15999_v61 = vld [vmem:[#allocation23_spill] sm:$0xff] }
 0x4fa   : > { %v16000_v13 = vshrl.u32 %v15999_v61, 16 }
 0x4fb   : > { %v6413_v0 = vrot.slane %v6411_v29, 4  ;;  %v6416_v10 = vrot.slane %v6414_v36, 5  ;;  %v6798_v18 = vrot.slane %v6796_v54, 7  ;;  %v15998_v36 = vld [vmem:[#allocation20_spill] sm:$0xff] }
 0x4fc   : > { %v6810_v47 = vrot.slane %v16000_v13, 7 }
 0x4fd   : > { %v6417_v35 = vor.u32 %v6416_v10, %v6413_v0  ;;  %v15119_v0 = vld [vmem:[#allocation2 + $0x28] sm:$0xff]  ;;  %v15122_v10 = vld [vmem:[#allocation2 + $0x30] sm:$0xff] }
 0x4fe   : > { %v15130_v13 = vshrl.u32 %v15119_v0, 16 }
 0x500   : > { %11541 = vmatmul.mubr.msk.bf16.gmra.mrb[28].mxu1 %vm253_vm1, %v15987_v12  ;;  %v15994_v12 = vld [vmem:[#allocation22_spill] sm:$0xff] }
 0x501   : > { %11544 = vmatprep.mubr.msk.bf16.mxu1 %vm253_vm1, %v15988_v58  ;;  %v15995_v58 = vshrl.u32 %v15994_v12, 16 }
 0x508   : > { %11545 = vmatmul.mubr.msk.bf16.gmra.mrb[32].mxu1 %vm253_vm1, %v15989_v1  ;;  %v6802_v1 = vrot.slane %v15995_v58, 7 }
 0x509   : > { %11548 = vmatprep.mubr.msk.bf16.mxu1 %vm253_vm1, %v15990_v39  ;;  %v15996_v39 = vld [vmem:[#allocation21_spill] sm:$0xff] }
 0x510   : > { %11549 = vmatmul.mubr.msk.bf16.gmra.mrb[36].mxu1 %vm253_vm1, %v15991_v60  ;;  %v15105_v60 = vld [vmem:[#allocation2 + $0x20] sm:$0xff] }
 0x511   : > { %11552 = vmatprep.mubr.msk.bf16.mxu1 %vm253_vm1, %v15992_v56  ;;  %v15997_v56 = vshll.u32 %v15994_v12, 16  ;;  %v15110_v29 = vshrl.u32 %v15105_v60, 16  ;;  %v15125_v54 = vshll.u32 %v15105_v60, 16 }
 0x513   : > { %v6805_v28 = vor.u32 %v15997_v56, %v6802_v1 }
 0x515   : > { %v6806_v58 = vsel %vm6794_vm6, %v6798_v18, %v6805_v28  ;;  %v15134_v18 = vshrl.u32 %v15122_v10, 16  ;;  %v7390_v28 = vsel %vm704_vm0, %v14974_v8, 0  ;;  %v15152_v8 = vshll.u32 %v15119_v0, 16 }
 0x517   : > { %v6834_v21 = vrot.slane %v15134_v18, 7 }
 0x518   : > { %11553 = vmatmul.mubr.msk.bf16.gmra.mrb[40].mxu1 %vm253_vm1, %v15993_v23  ;;  %v6418_v23 = vsel %vm6309_vm5, %v15998_v36, %v6417_v35  ;;  %v16001_v35 = vshll.u32 %v15999_v61, 16 }
 0x519   : > { %11556 = vmatprep.mubr.msk.bf16.mxu1 %vm253_vm1, %v15996_v39  ;;  %v6818_v39 = vrot.slane %v15110_v29, 7 }
 0x51a   : > { %v6813_v56 = vor.u32 %v16001_v35, %v6810_v47 }
 0x51b   : > { %v6821_v36 = vor.u32 %v15125_v54, %v6818_v39 }
 0x51d   : > { %v6822_v35 = vsel %vm6794_vm6, %v6810_v47, %v6821_v36  ;;  %v15163_v36 = vshrl.u32 %v15148_v46, 16 }
 0x51f   : > { %v6842_v49 = vrot.slane %v15163_v36, 7 }
 0x520   : > { %11557 = vmatmul.mubr.msk.bf16.gmra.mrb[44].mxu1 %vm253_vm1, %v6418_v23  ;;  %v6814_v23 = vsel %vm6794_vm6, %v6802_v1, %v6813_v56  ;;  %v15154_v1 = vld [vmem:[#allocation2 + $0x40] sm:$0xff]  ;;  %v15157_v56 = vshll.u32 %v15122_v10, 16 }
 0x521   : > { %11562 = vmatprep.mubr.msk.bf16.mxu1 %vm253_vm1, %v6806_v58  ;;  %v6826_v58 = vrot.slane %v15130_v13, 7  ;;  %v15183_v27 = vshll.u32 %v15154_v1, 16 }
 0x523   : > { %v6829_v47 = vor.u32 %v15152_v8, %v6826_v58 }
 0x528   : > { %11563 = vmatmul.mubr.msk.bf16.vlgmr.msra.gmra.mrb[0].mxu1 %vm253_vm1, %v6814_v23  ;;  %v15167_v23 = vshrl.u32 %v15154_v1, 16 }
 0x529   : > { %11611 = vmatpush3.bf16.msra.mxu1 %v7390_v28  ;;  %11566 = vmatprep.mubr.msk.bf16.mxu1 %vm253_vm1, %v6822_v35  ;;  %v6837_v28 = vor.u32 %v15157_v56, %v6834_v21  ;;  %v6830_v35 = vsel %vm6794_vm6, %v6818_v39, %v6829_v47  ;;  %v6845_v39 = vor.u32 %v15178_v6, %v6842_v49  ;;  %v15187_v47 = vshrl.u32 %v15174_v32, 16 }
 0x52a   : > { %12642 = vmatprep.subr.msk.bf16.mxu1 %vm704_vm0, %v15143_v19  ;;  %v6850_v44 = vrot.slane %v15167_v23, 7 }
 0x52b   : > { %v6838_v11 = vsel %vm6794_vm6, %v6826_v58, %v6837_v28  ;;  %v15191_v28 = vshrl.u32 %v15180_v2, 16 }
 0x52c   : > { %v6853_v58 = vor.u32 %v15183_v27, %v6850_v44 }
 0x52d   : > { %v6866_v3 = vrot.slane %v15191_v28, 7 }
 0x52e   : > { %v6854_v15 = vsel %vm6794_vm6, %v6842_v49, %v6853_v58 }
 0x530   : > { %11567 = vmatmul.mubr.msk.bf16.gmra.mrb[4].mxu1 %vm253_vm1, %v6830_v35  ;;  %v6858_v35 = vrot.slane %v15187_v47, 7 }
 0x531   : > { %11570 = vmatprep.mubr.msk.bf16.mxu1 %vm253_vm1, %v6838_v11  ;;  %v6846_v11 = vsel %vm6794_vm6, %v6834_v21, %v6845_v39  ;;  %v15209_v39 = vshrl.u32 %v15198_v34, 16 }
 0x532   : > { %v6861_v21 = vor.u32 %v15202_v14, %v6858_v35 }
 0x533   : > { %v6874_v58 = vrot.slane %v15209_v39, 7 }
 0x534   : > { %v6862_v49 = vsel %vm6794_vm6, %v6850_v44, %v6861_v21  ;;  %v6890_v44 = vrot.slane %v15980_v25, 7  ;;  %v16008_v25 = vld [vmem:[#allocation34_spill] sm:$0xff] }
 0x535   : > { %v6877_v26 = vor.u32 %v15219_v20, %v6874_v58  ;;  %v6886_v21 = vsel %vm6794_vm6, %v6874_v58, %v6885_v50  ;;  %v16003_v50 = vld [vmem:[#allocation28_spill] sm:$0xff]  ;;  %v16009_v58 = vld [vmem:[#allocation38_spill] sm:$0xff] }
 0x536   : > { %v6893_v9 = vor.u32 %v6890_v44, %v15981_v62  ;;  %v16005_v62 = vld [vmem:[#allocation31_spill] sm:$0xff] }
 0x537   : > { %v6878_v30 = vsel %vm6794_vm6, %v6866_v3, %v6877_v26 }
 0x538   : > { %11571 = vmatmul.mubr.msk.bf16.gmra.mrb[8].mxu1 %vm253_vm1, %v6846_v11  ;;  %v6869_v11 = vor.u32 %v15205_v4, %v6866_v3  ;;  %v16002_v3 = vld [vmem:[#allocation24_spill] sm:$0xff] }
 0x539   : > { %11574 = vmatprep.mubr.msk.bf16.mxu1 %vm253_vm1, %v6854_v15 }
 0x53a   : > { %v6870_v15 = vsel %vm6794_vm6, %v6858_v35, %v6869_v11  ;;  %v6898_v35 = vrot.slane %v15984_v63, 7  ;;  %v15250_v63 = vld [vmem:[#allocation2 + $0xc8] sm:$0xff] }
 0x53c   : > { %v6901_v11 = vor.u32 %v6898_v35, %v15985_v42  ;;  %v16007_v42 = vld [vmem:[#allocation33_spill] sm:$0xff] }
 0x53e   : > { %v6902_v26 = vsel %vm6794_vm6, %v6890_v44, %v6901_v11 }
 0x540   : > { %11575 = vmatmul.mubr.msk.bf16.gmra.mrb[12].mxu1 %vm253_vm1, %v6862_v49  ;;  %v6894_v49 = vsel %vm6794_vm6, %v6882_v24, %v6893_v9  ;;  %v16006_v24 = vld [vmem:[#allocation32_spill] sm:$0xff]  ;;  %v15263_v9 = vshll.u32 %v15250_v63, 16 }
 0x541   : > { %11578 = vmatprep.mubr.msk.bf16.mxu1 %vm253_vm1, %v6870_v15  ;;  %v15255_v15 = vshrl.u32 %v15250_v63, 16 }
 0x543   : > { %v6986_v44 = vrot.slane %v15255_v15, 7 }
 0x545   : > { %v6989_v11 = vor.u32 %v15263_v9, %v6986_v44  ;;  %v12793_v44 = vld [vmem:[#allocation2 + $0xa8] sm:$0xff] }
 0x548   : > { %11579 = vmatmul.mubr.msk.bf16.gmra.mrb[16].mxu1 %vm253_vm1, %v6878_v30  ;;  %v6910_v30 = vsel %vm6794_vm6, %v6898_v35, %v16002_v3  ;;  %v16011_v35 = vld [vmem:[#allocation40_spill] sm:$0xff] }
 0x549   : > { %11582 = vmatprep.mubr.msk.bf16.mxu1 %vm253_vm1, %v6886_v21  ;;  %v16010_v21 = vld [vmem:[#allocation39_spill] sm:$0xff] }
 0x550   : > { %11583 = vmatmul.mubr.msk.bf16.gmra.mrb[20].mxu1 %vm253_vm1, %v6894_v49  ;;  %v16012_v49 = vld [vmem:[#allocation30_spill] sm:$0xff] }
 0x551   : > { %11586 = vmatprep.mubr.msk.bf16.mxu1 %vm253_vm1, %v6902_v26  ;;  %v16013_v26 = vrot.slane %v16012_v49, 7 }
 0x553   : > { %v6990_v3 = vsel %vm6794_vm6, %v16013_v26, %v6989_v11  ;;  %v16014_v11 = vld [vmem:[#allocation27_spill] sm:$0xff]  ;;  %v7710_v26 = vrot.slane %v15125_v54, 1 }
 0x558   : > { %11587 = vmatmul.mubr.msk.bf16.gmra.mrb[24].mxu1 %vm253_vm1, %v6910_v30  ;;  %v7961_v30 = vsel %vm704_vm0, %v15143_v19, 0  ;;  %v12784_v19 = vld [vmem:[#allocation2 + $0x60] sm:$0xff] }
 0x559   : > { %11590 = vmatprep.mubr.msk.bf16.mxu1 %vm253_vm1, %v16003_v50  ;;  %v10432_v50 = vld [vmem:[%s15798_s3 + $0x18] sm:$0xf] }
 0x560   : > { %11591 = vmatmul.mubr.msk.bf16.gmra.mrb[28].mxu1 %vm253_vm1, %v16004_v43  ;;  %v12787_v43 = vld [vmem:[#allocation2 + $0x78] sm:$0xff] }
 0x561   : > { %11594 = vmatprep.mubr.msk.bf16.mxu1 %vm253_vm1, %v16005_v62  ;;  %v12788_v62 = vld [vmem:[#allocation2 + $0x80] sm:$0xff] }
 0x568   : > { %11595 = vmatmul.mubr.msk.bf16.gmra.mrb[32].mxu1 %vm253_vm1, %v16006_v24  ;;  %v12789_v24 = vld [vmem:[#allocation2 + $0x88] sm:$0xff] }
 0x569   : > { %11598 = vmatprep.mubr.msk.bf16.mxu1 %vm253_vm1, %v16007_v42  ;;  %v12790_v42 = vld [vmem:[#allocation2 + $0x90] sm:$0xff] }
 0x570   : > { %11599 = vmatmul.mubr.msk.bf16.gmra.mrb[36].mxu1 %vm253_vm1, %v16008_v25  ;;  %v12791_v25 = vld [vmem:[#allocation2 + $0x98] sm:$0xff] }
 0x571   : > { %11602 = vmatprep.mubr.msk.bf16.mxu1 %vm253_vm1, %v16009_v58  ;;  %v12792_v58 = vld [vmem:[#allocation2 + $0xa0] sm:$0xff] }
 0x578   : > { %11603 = vmatmul.mubr.msk.bf16.gmra.mrb[40].mxu1 %vm253_vm1, %v16010_v21  ;;  %v12794_v21 = vld [vmem:[#allocation2 + $0xb0] sm:$0xff] }
 0x579   : > { %11606 = vmatprep.mubr.msk.bf16.mxu1 %vm253_vm1, %v16011_v35  ;;  %v12795_v35 = vld [vmem:[#allocation2 + $0xb8] sm:$0xff] }
 0x580   : > { %11607 = vmatmul.mubr.msk.bf16.gmra.mrb[44].mxu1 %vm253_vm1, %v6990_v3  ;;  %v16015_v3 = vld [vmem:[#allocation42_spill] sm:$0xff] }
 0x581   : > { %11612 = vmatprep.mubr.msk.bf16.mxu1 %vm253_vm1, %v15994_v12  ;;  %v12785_v12 = vld [vmem:[#allocation2 + $0x68] sm:$0xff] }
 0x588   : > { %11613 = vmatmul.mubr.msk.bf16.vlgmr.msra.gmra.mrb[0].mxu1 %vm253_vm1, %v15999_v61  ;;  %v12786_v61 = vld [vmem:[#allocation2 + $0x70] sm:$0xff] }
 0x589   : > { %11661 = vmatpush3.bf16.msra.mxu1 %v7961_v30  ;;  %11616 = vmatprep.mubr.msk.bf16.mxu1 %vm253_vm1, %v15105_v60  ;;  %v7714_v30 = vor.u32 %v7710_v26, %v15110_v29 }
 0x58a   : > { %12643 = vmatprep.subr.msk.bf16.mxu1 %vm704_vm0, %v10432_v50 }
 0x590   : > { %11617 = vmatmul.mubr.msk.bf16.gmra.mrb[4].mxu1 %vm253_vm1, %v15119_v0 }
 0x591   : > { %11620 = vmatprep.mubr.msk.bf16.mxu1 %vm253_vm1, %v15122_v10 }
 0x598   : > { %11621 = vmatmul.mubr.msk.bf16.gmra.mrb[8].mxu1 %vm253_vm1, %v15148_v46 }
 0x599   : > { %11624 = vmatprep.mubr.msk.bf16.mxu1 %vm253_vm1, %v15154_v1 }
 0x5a0   : > { %11625 = vmatmul.mubr.msk.bf16.gmra.mrb[12].mxu1 %vm253_vm1, %v15174_v32 }
 0x5a1   : > { %11628 = vmatprep.mubr.msk.bf16.mxu1 %vm253_vm1, %v15180_v2 }
 0x5a8   : > { %11629 = vmatmul.mubr.msk.bf16.gmra.mrb[16].mxu1 %vm253_vm1, %v15198_v34 }
 0x5a9   : > { %11632 = vmatprep.mubr.msk.bf16.mxu1 %vm253_vm1, %v12784_v19  ;;  %v8560_v19 = vsel %vm704_vm0, %v10432_v50, 0 }
 0x5b0   : > { %11633 = vmatmul.mubr.msk.bf16.gmra.mrb[20].mxu1 %vm253_vm1, %v12785_v12  ;;  %v7718_v12 = vrot.slane %v15152_v8, 1 }
 0x5b1   : > { %11636 = vmatprep.mubr.msk.bf16.mxu1 %vm253_vm1, %v12786_v61  ;;  %v16016_v61 = vld [vmem:[#allocation41_spill] sm:$0xff] }
 0x5b8   : > { %11637 = vmatmul.mubr.msk.bf16.gmra.mrb[24].mxu1 %vm253_vm1, %v12787_v43  ;;  %v7711_v43 = vsel %vm435_vm2, %v16016_v61, %v7710_v26 }
 0x5b9   : > { %11640 = vmatprep.mubr.msk.bf16.mxu1 %vm253_vm1, %v12788_v62  ;;  %v15323_v62 = vld [vmem:[%s15798_s3 + $0x1c] sm:$0xf] }
 0x5c0   : > { %11641 = vmatmul.mubr.msk.bf16.gmra.mrb[28].mxu1 %vm253_vm1, %v12789_v24  ;;  %v7719_v24 = vsel %vm435_vm2, %v7714_v30, %v7718_v12 }
 0x5c1   : > { %11644 = vmatprep.mubr.msk.bf16.mxu1 %vm253_vm1, %v12790_v42  ;;  %v7726_v42 = vrot.slane %v15157_v56, 1 }
 0x5c3   : > { %v7730_v50 = vor.u32 %v7726_v42, %v15134_v18 }
 0x5c8   : > { %11645 = vmatmul.mubr.msk.bf16.gmra.mrb[32].mxu1 %vm253_vm1, %v12791_v25  ;;  %v7722_v25 = vor.u32 %v7718_v12, %v15130_v13  ;;  %v7758_v12 = vrot.slane %v15205_v4, 1 }
 0x5c9   : > { %11648 = vmatprep.mubr.msk.bf16.mxu1 %vm253_vm1, %v12792_v58  ;;  %v7734_v58 = vrot.slane %v15178_v6, 1 }
 0x5ca   : > { %v7762_v61 = vor.u32 %v7758_v12, %v15191_v28 }
 0x5cb   : > { %v7738_v26 = vor.u32 %v7734_v58, %v15163_v36 }
 0x5d0   : > { %11649 = vmatmul.mubr.msk.bf16.gmra.mrb[36].mxu1 %vm253_vm1, %v12793_v44  ;;  %v7727_v44 = vsel %vm435_vm2, %v7722_v25, %v7726_v42  ;;  %v7774_v25 = vrot.slane %v14745_v31, 1 }
 0x5d1   : > { %11652 = vmatprep.mubr.msk.bf16.mxu1 %vm253_vm1, %v12794_v21  ;;  %v7735_v21 = vsel %vm435_vm2, %v7730_v50, %v7734_v58 }
 0x5d2   : > { %v7778_v58 = vor.u32 %v14748_v57, %v7774_v25  ;;  %v7798_v57 = vrot.slane %v14771_v33, 1 }
 0x5d8   : > { %11653 = vmatmul.mubr.msk.bf16.gmra.mrb[40].mxu1 %vm253_vm1, %v12795_v35  ;;  %v7742_v35 = vrot.slane %v15183_v27, 1 }
 0x5d9   : > { %11656 = vmatprep.mubr.msk.bf16.mxu1 %vm253_vm1, %v16014_v11 }
 0x5da   : > { %v7746_v11 = vor.u32 %v7742_v35, %v15167_v23  ;;  %v7743_v30 = vsel %vm435_vm2, %v7738_v26, %v7742_v35  ;;  %v7790_v26 = vrot.slane %v14761_v37, 1 }
 0x5dc   : > { %v7794_v31 = vor.u32 %v14764_v41, %v7790_v26  ;;  %v7814_v41 = vrot.slane %v14785_v17, 1 }
 0x5e0   : > { %11657 = vmatmul.mubr.msk.bf16.gmra.mrb[44].mxu1 %vm253_vm1, %v15250_v63 }
 0x5e1   : > { %11662 = vmatprep.mubr.msk.bf16.mxu1 %vm253_vm1, %v16015_v3  ;;  %v7750_v3 = vrot.slane %v15202_v14, 1 }
 0x5e8   : > { %11663 = vmatmul.mubr.msk.bf16.vlgmr.msra.gmra.mrb[0].mxu1 %vm253_vm1, %v7711_v43  ;;  %v7754_v43 = vor.u32 %v7750_v3, %v15187_v47 }
 0x5e9   : > { %11711 = vmatpush3.bf16.msra.mxu1 %v8560_v19  ;;  %11666 = vmatprep.mubr.msk.bf16.mxu1 %vm253_vm1, %v7719_v24  ;;  %v7751_v19 = vsel %vm435_vm2, %v7746_v11, %v7750_v3  ;;  %v7766_v24 = vrot.slane %v15219_v20, 1 }
 0x5ea   : > { %12644 = vmatprep.subr.msk.bf16.mxu1 %vm704_vm0, %v15323_v62  ;;  %v7759_v42 = vsel %vm435_vm2, %v7754_v43, %v7758_v12  ;;  %v7802_v12 = vor.u32 %v14774_v22, %v7798_v57  ;;  %v7818_v43 = vor.u32 %v15956_v5, %v7814_v41 }
 0x5eb   : > { %v7767_v50 = vsel %vm435_vm2, %v7762_v61, %v7766_v24  ;;  %v7822_v61 = vrot.slane %v14791_v7, 1 }
 0x5ed   : > { %v7823_v22 = vsel %vm435_vm2, %v7818_v43, %v7822_v61 }
 0x5f0   : > { %11667 = vmatmul.mubr.msk.bf16.gmra.mrb[4].mxu1 %vm253_vm1, %v7727_v44  ;;  %v7770_v44 = vor.u32 %v7766_v24, %v15209_v39  ;;  %v7838_v24 = vrot.slane %v14803_v53, 1 }
 0x5f1   : > { %11670 = vmatprep.mubr.msk.bf16.mxu1 %vm253_vm1, %v7735_v21  ;;  %v7782_v21 = vrot.slane %v14755_v51, 1  ;;  %v7799_v51 = vsel %vm435_vm2, %v7794_v31, %v7798_v57  ;;  %v8236_v31 = vld [vmem:[#allocation2 + $0x18] sm:$0xf8]  ;;  %v7689_v57 = vld [vmem:[#allocation2 + $0xd0] sm:$0x1] }
 0x5f2   : > { %v7775_v35 = vsel %vm435_vm2, %v7770_v44, %v7774_v25  ;;  %v7842_v7 = vor.u32 %v14809_v16, %v7838_v24  ;;  %v16019_v44 = vld [vmem:[#allocation49_spill] sm:$0xff] }
 0x5f3   : > { %v7783_v11 = vsel %vm435_vm2, %v7778_v58, %v7782_v21  ;;  %v7786_v3 = vor.u32 %v14758_v40, %v7782_v21  ;;  %v16018_v58 = vld [vmem:[#allocation51_spill] sm:$0xff] }
 0x5f8   : > { %11671 = vmatmul.mubr.msk.bf16.gmra.mrb[8].mxu1 %vm253_vm1, %v7743_v30  ;;  %v7791_v30 = vsel %vm435_vm2, %v7786_v3, %v7790_v26 }
 0x5f9   : > { %11674 = vmatprep.mubr.msk.bf16.mxu1 %vm253_vm1, %v7751_v19  ;;  %v7806_v19 = vrot.slane %v15955_v45, 1  ;;  %v7826_v45 = vor.u32 %v14794_v55, %v7822_v61  ;;  %v7846_v55 = vrot.slane %v14812_v59, 1  ;;  %v8274_v61 = vrot.slane %v15110_v29, 3 }
 0x5fb   : > { %v7810_v37 = vor.u32 %v14780_v38, %v7806_v19  ;;  %v7807_v40 = vsel %vm435_vm2, %v7802_v12, %v7806_v19  ;;  %v7830_v38 = vrot.slane %v14797_v48, 1  ;;  %v7847_v48 = vsel %vm435_vm2, %v7842_v7, %v7846_v55 }
 0x5fc   : > { %v7850_v21 = vor.u32 %v16019_v44, %v7846_v55  ;;  %v7878_v19 = vrot.slane %v15263_v9, 1  ;;  %v8267_v12 = vshll.u32 %v8236_v31, 16  ;;  %v8283_v55 = vrot.slane %v15130_v13, 3 }
 0x5fd   : > { %v7815_v33 = vsel %vm435_vm2, %v7810_v37, %v7814_v41  ;;  %v7831_v17 = vsel %vm435_vm2, %v7826_v45, %v7830_v38  ;;  %v8264_v37 = vshrl.u32 %v8236_v31, 16  ;;  %v8277_v45 = vrot.slane %v15125_v54, 4 }
 0x5fe   : > { %v8985_v44 = vsel %vm704_vm0, %v15323_v62, 0  ;;  %v8313_v31 = vrot.slane %v15183_v27, 4 }
 0x5ff   : > { %v8266_v43 = vrot.slane %v8264_v37, 3  ;;  %v8328_v37 = vrot.slane %v15191_v28, 3 }
 0x600   : > { %11675 = vmatmul.mubr.msk.bf16.gmra.mrb[12].mxu1 %vm253_vm1, %v7759_v42  ;;  %v7834_v42 = vor.u32 %v14800_v52, %v7830_v38  ;;  %v8269_v38 = vrot.slane %v8267_v12, 4  ;;  %v8331_v12 = vrot.slane %v15205_v4, 4 }
 0x601   : > { %11678 = vmatprep.mubr.msk.bf16.mxu1 %vm253_vm1, %v7767_v50  ;;  %v16017_v50 = vld [vmem:[#allocation50_spill] sm:$0xff] }
 0x602   : > { %v7839_v5 = vsel %vm435_vm2, %v7834_v42, %v7838_v24  ;;  %v7854_v25 = vrot.slane %v16017_v50, 1  ;;  %v8278_v24 = vor.u32 %v8277_v45, %v8274_v61  ;;  %v8270_v7 = vor.u32 %v8269_v38, %v8266_v43 }
 0x603   : > { %v8292_v50 = vrot.slane %v15134_v18, 3  ;;  %v8337_v61 = vrot.slane %v15209_v39, 3  ;;  %v8340_v45 = vrot.slane %v15219_v20, 4 }
 0x604   : > { %v7858_v53 = vor.u32 %v16018_v58, %v7854_v25  ;;  %v7855_v52 = vsel %vm435_vm2, %v7850_v21, %v7854_v25  ;;  %v8295_v25 = vrot.slane %v15157_v56, 4 }
 0x605   : > { %v8341_v38 = vor.u32 %v8340_v45, %v8337_v61 }
 0x608   : > { %11679 = vmatmul.mubr.msk.bf16.gmra.mrb[16].mxu1 %vm253_vm1, %v7775_v35  ;;  %v16020_v35 = vld [vmem:[#allocation53_spill] sm:$0xff] }
 0x609   : > { %11682 = vmatprep.mubr.msk.bf16.mxu1 %vm253_vm1, %v7783_v11  ;;  %v7862_v16 = vrot.slane %v16020_v35, 1  ;;  %v16021_v11 = vld [vmem:[#allocation35_spill] sm:$0xff]  ;;  %v8301_v35 = vrot.slane %v15163_v36, 3 }
 0x60a   : > { %v7870_v26 = vrot.slane %v16021_v11, 1 }
 0x60b   : > { %v7863_v59 = vsel %vm435_vm2, %v7858_v53, %v7862_v16  ;;  %v8296_v53 = vor.u32 %v8295_v25, %v8292_v50  ;;  %v16029_v50 = vld [vmem:[#allocation60_spill] sm:$0xff]  ;;  %v16030_v25 = vld [vmem:[#allocation61_spill] sm:$0xff] }
 0x60c   : > { %v7874_v3 = vor.u32 %v7870_v26, %v16012_v49 }
 0x610   : > { %11683 = vmatmul.mubr.msk.bf16.gmra.mrb[20].mxu1 %vm253_vm1, %v7791_v30  ;;  %v16022_v30 = vld [vmem:[#allocation54_spill] sm:$0xff] }
 0x611   : > { %11686 = vmatprep.mubr.msk.bf16.mxu1 %vm253_vm1, %v7799_v51  ;;  %v7866_v51 = vor.u32 %v16022_v30, %v7862_v16  ;;  %v8304_v16 = vrot.slane %v15178_v6, 4  ;;  %v8319_v30 = vrot.slane %v15187_v47, 3 }
 0x613   : > { %v7871_v41 = vsel %vm435_vm2, %v7866_v51, %v7870_v26  ;;  %v8310_v26 = vrot.slane %v15167_v23, 3  ;;  %v8305_v62 = vor.u32 %v8304_v16, %v8301_v35  ;;  %v8322_v51 = vrot.slane %v15202_v14, 4  ;;  %v16033_v35 = vld [vmem:[#allocation65_spill] sm:$0xff] }
 0x618   : > { %11687 = vmatmul.mubr.msk.bf16.gmra.mrb[24].mxu1 %vm253_vm1, %v7807_v40  ;;  %v7884_v40 = vshll.u32 %v7689_v57, 16  ;;  %v8306_v57 = vsel %vm5781_vm4, %v8296_v53, %v8305_v62 }
 0x619   : > { %11690 = vmatprep.mubr.msk.bf16.mxu1 %vm253_vm1, %v7815_v33  ;;  %v7879_v33 = vsel %vm435_vm2, %v7874_v3, %v7878_v19  ;;  %v8314_v3 = vor.u32 %v8313_v31, %v8310_v26  ;;  %v8463_v26 = vrot.slane %v15255_v15, 3  ;;  %v8466_v31 = vrot.slane %v15263_v9, 4 }
 0x620   : > { %11691 = vmatmul.mubr.msk.bf16.gmra.mrb[28].mxu1 %vm253_vm1, %v7823_v22  ;;  %v7882_v22 = vor.u32 %v7878_v19, %v15255_v15  ;;  %v8315_v19 = vsel %vm5781_vm4, %v8305_v62, %v8314_v3  ;;  %v16034_v62 = vld [vmem:[#allocation66_spill] sm:$0xff] }
 0x621   : > { %11694 = vmatprep.mubr.msk.bf16.mxu1 %vm253_vm1, %v7831_v17  ;;  %v7886_v17 = vrot.slane %v7884_v40, 1  ;;  %v8332_v40 = vor.u32 %v8331_v12, %v8328_v37 }
 0x623   : > { %v7887_v42 = vsel %vm435_vm2, %v7882_v22, %v7886_v17  ;;  %v8342_v22 = vsel %vm5781_vm4, %v8332_v40, %v8341_v38  ;;  %v16023_v17 = vld [vmem:[#allocation52_spill] sm:$0xff] }
 0x628   : > { %11695 = vmatmul.mubr.msk.bf16.gmra.mrb[32].mxu1 %vm253_vm1, %v7839_v5  ;;  %v8286_v5 = vrot.slane %v15152_v8, 4 }
 0x629   : > { %11698 = vmatprep.mubr.msk.bf16.mxu1 %vm253_vm1, %v7847_v48  ;;  %v8279_v48 = vsel %vm5781_vm4, %v8270_v7, %v8278_v24  ;;  %v16024_v7 = vld [vmem:[#allocation55_spill] sm:$0xff] }
 0x62a   : > { %v8287_v58 = vor.u32 %v8286_v5, %v8283_v55  ;;  %v16026_v55 = vld [vmem:[#allocation57_spill] sm:$0xff]  ;;  %v16027_v5 = vld [vmem:[#allocation58_spill] sm:$0xff] }
 0x62c   : > { %v8288_v21 = vsel %vm5781_vm4, %v8278_v24, %v8287_v58  ;;  %v8351_v24 = vsel %vm5781_vm4, %v8341_v38, %v16023_v17 }
 0x630   : > { %11699 = vmatmul.mubr.msk.bf16.gmra.mrb[36].mxu1 %vm253_vm1, %v7855_v52  ;;  %v15429_v52 = vld [vmem:[%s15798_s3 + $0x20] sm:$0xf] }
 0x631   : > { %11702 = vmatprep.mubr.msk.bf16.mxu1 %vm253_vm1, %v7863_v59  ;;  %v8297_v59 = vsel %vm5781_vm4, %v8287_v58, %v8296_v53  ;;  %v16031_v58 = vld [vmem:[#allocation62_spill] sm:$0xff]  ;;  %v16032_v53 = vld [vmem:[#allocation63_spill] sm:$0xff] }
 0x638   : > { %11703 = vmatmul.mubr.msk.bf16.gmra.mrb[40].mxu1 %vm253_vm1, %v7871_v41  ;;  %v8323_v41 = vor.u32 %v8322_v51, %v8319_v30  ;;  %v16036_v30 = vld [vmem:[#allocation78_spill] sm:$0xff] }
 0x639   : > { %11706 = vmatprep.mubr.msk.bf16.mxu1 %vm253_vm1, %v7879_v33  ;;  %v16037_v51 = vshrl.u32 %v16036_v30, 16  ;;  %v16038_v37 = vshll.u32 %v16036_v30, 16 }
 0x63a   : > { %v8324_v33 = vsel %vm5781_vm4, %v8314_v3, %v8323_v41  ;;  %v8333_v43 = vsel %vm5781_vm4, %v8323_v41, %v8332_v40  ;;  %v16035_v3 = vld [vmem:[#allocation64_spill] sm:$0xff] }
 0x63b   : > { %v8475_v12 = vrot.slane %v16038_v37, 4  ;;  %v16048_v37 = vld [vmem:[#allocation74_spill] sm:$0xff] }
 0x640   : > { %11707 = vmatmul.mubr.msk.bf16.gmra.mrb[44].mxu1 %vm253_vm1, %v7887_v42  ;;  %v16025_v42 = vld [vmem:[#allocation56_spill] sm:$0xff] }
 0x641   : > { %11712 = vmatprep.mubr.msk.bf16.mxu1 %vm253_vm1, %v8279_v48  ;;  %v16028_v48 = vld [vmem:[#allocation59_spill] sm:$0xff] }
 0x648   : > { %11713 = vmatmul.mubr.msk.bf16.vlgmr.msra.gmra.mrb[0].mxu1 %vm253_vm1, %v8288_v21  ;;  %v8457_v21 = vrot.slane %v16021_v11, 4 }
 0x649   : > { %11761 = vmatpush3.bf16.msra.mxu1 %v8985_v44  ;;  %11716 = vmatprep.mubr.msk.bf16.mxu1 %vm253_vm1, %v8297_v59  ;;  %v8454_v44 = vrot.slane %v16012_v49, 3  ;;  %v15479_v59 = vld [vmem:[#allocation2 + $0xd8] sm:$0xf] }
 0x64a   : > { %12645 = vmatprep.subr.msk.bf16.mxu1 %vm704_vm0, %v15429_v52  ;;  %v8479_v41 = vshrl.u32 %v15479_v59, 16  ;;  %v8482_v40 = vshll.u32 %v15479_v59, 16 }
 0x64b   : > { %v8458_v16 = vor.u32 %v8457_v21, %v8454_v44  ;;  %v8872_v44 = vrot.slane %v15154_v1, 4  ;;  %v8876_v21 = vrot.slane %v15180_v2, 4  ;;  %v8878_v1 = vrot.slane %v15198_v34, 4  ;;  %v16041_v2 = vld [vmem:[#allocation67_spill] sm:$0xff]  ;;  %v16044_v34 = vld [vmem:[#allocation70_spill] sm:$0xff] }
 0x64c   : > { %v8481_v45 = vrot.slane %v8479_v41, 3  ;;  %v16050_v41 = vld [vmem:[#allocation76_spill] sm:$0xff] }
 0x650   : > { %11717 = vmatmul.mubr.msk.bf16.gmra.mrb[4].mxu1 %vm253_vm1, %v8306_v57  ;;  %v8459_v57 = vsel %vm5781_vm4, %v16035_v3, %v8458_v16  ;;  %v16043_v3 = vld [vmem:[#allocation69_spill] sm:$0xff] }
 0x651   : > { %11720 = vmatprep.mubr.msk.bf16.mxu1 %vm253_vm1, %v8315_v19  ;;  %v8472_v19 = vrot.slane %v16037_v51, 3  ;;  %v16046_v51 = vld [vmem:[#allocation72_spill] sm:$0xff] }
 0x653   : > { %v8476_v61 = vor.u32 %v8475_v12, %v8472_v19  ;;  %v16047_v19 = vld [vmem:[#allocation73_spill] sm:$0xff]  ;;  %v16049_v12 = vld [vmem:[#allocation75_spill] sm:$0xff] }
 0x658   : > { %11721 = vmatmul.mubr.msk.bf16.gmra.mrb[8].mxu1 %vm253_vm1, %v8324_v33  ;;  %v8467_v33 = vor.u32 %v8466_v31, %v8463_v26  ;;  %v16039_v26 = vld [vmem:[#allocation45_spill] sm:$0xff] }
 0x659   : > { %11724 = vmatprep.mubr.msk.bf16.mxu1 %vm253_vm1, %v8333_v43  ;;  %v8484_v43 = vrot.slane %v8482_v40, 4  ;;  %v16040_v31 = vrot.slane %v16039_v26, 4  ;;  %v12796_v40 = vld [vmem:[#allocation2 + $0xc0] sm:$0xff]  ;;  %v9295_v26 = vrot.slane %v15191_v28, 4 }
 0x65a   : > { %v8468_v38 = vsel %vm5781_vm4, %v8458_v16, %v8467_v33  ;;  %v8879_v16 = vsel %vm704_vm0, %v8876_v21, %v8878_v1 }
 0x65b   : > { %v8485_v17 = vor.u32 %v8484_v43, %v8481_v45  ;;  %v16052_v45 = vld [vmem:[#allocation48_spill] sm:$0xff] }
 0x65c   : > { %v16053_v43 = vrot.slane %v16052_v45, 4 }
 0x660   : > { %11725 = vmatmul.mubr.msk.bf16.gmra.mrb[12].mxu1 %vm253_vm1, %v8342_v22  ;;  %v8477_v22 = vsel %vm5781_vm4, %v8467_v33, %v8476_v61  ;;  %v8904_v33 = vrot.slane %v12796_v40, 4  ;;  %v9351_v40 = vrot.slane %v16012_v49, 4 }
 0x661   : > { %11728 = vmatprep.mubr.msk.bf16.mxu1 %vm253_vm1, %v8351_v24  ;;  %v8835_v24 = vld [vmem:[#allocation2 + $0x18] sm:$0xf0] }
 0x668   : > { %11729 = vmatmul.mubr.msk.bf16.gmra.mrb[16].mxu1 %vm253_vm1, %v16024_v7  ;;  %v8864_v7 = vrot.slane %v15105_v60, 4 }
 0x669   : > { %11732 = vmatprep.mubr.msk.bf16.mxu1 %vm253_vm1, %v16025_v42  ;;  %v8486_v42 = vsel %vm5781_vm4, %v8476_v61, %v8485_v17  ;;  %v16051_v61 = vld [vmem:[#allocation77_spill] sm:$0xff]  ;;  %v8908_v17 = vrot.slane %v16036_v30, 4 }
 0x670   : > { %11733 = vmatmul.mubr.msk.bf16.gmra.mrb[20].mxu1 %vm253_vm1, %v16026_v55  ;;  %v8863_v55 = vrot.slane %v8835_v24, 4 }
 0x671   : > { %11736 = vmatprep.mubr.msk.bf16.mxu1 %vm253_vm1, %v16027_v5 }
 0x672   : > { %v8865_v5 = vsel %vm704_vm0, %v8863_v55, %v8864_v7 }
 0x678   : > { %11737 = vmatmul.mubr.msk.bf16.gmra.mrb[24].mxu1 %vm253_vm1, %v16028_v48  ;;  %v8866_v48 = vrot.slane %v15119_v0, 4 }
 0x679   : > { %11740 = vmatprep.mubr.msk.bf16.mxu1 %vm253_vm1, %v16029_v50  ;;  %v8868_v50 = vrot.slane %v15122_v10, 4 }
 0x67b   : > { %v8869_v60 = vsel %vm704_vm0, %v8866_v48, %v8868_v50 }
 0x680   : > { %11741 = vmatmul.mubr.msk.bf16.gmra.mrb[28].mxu1 %vm253_vm1, %v16030_v25  ;;  %v9445_v25 = vsel %vm704_vm0, %v15429_v52, 0  ;;  %v8874_v52 = vrot.slane %v15174_v32, 4  ;;  %v8881_v32 = vsel %vm704_vm0, %v8878_v1, %v16040_v31 }
 0x681   : > { %11744 = vmatprep.mubr.msk.bf16.mxu1 %vm253_vm1, %v16031_v58  ;;  %v8867_v58 = vsel %vm704_vm0, %v8864_v7, %v8866_v48  ;;  %v9264_v7 = vshrl.u32 %v8835_v24, 16  ;;  %v9271_v48 = vrot.slane %v15110_v29, 4 }
 0x688   : > { %11745 = vmatmul.mubr.msk.bf16.gmra.mrb[32].mxu1 %vm253_vm1, %v16032_v53  ;;  %v8870_v53 = vrot.slane %v15148_v46, 4  ;;  %v8877_v46 = vsel %vm704_vm0, %v8874_v52, %v8876_v21  ;;  %v9283_v21 = vrot.slane %v15163_v36, 4  ;;  %v9292_v36 = vrot.slane %v15202_v14, 5 }
 0x689   : > { %11748 = vmatprep.mubr.msk.bf16.mxu1 %vm253_vm1, %v16033_v35  ;;  %v8875_v35 = vsel %vm704_vm0, %v8872_v44, %v8874_v52 }
 0x68a   : > { %v8871_v0 = vsel %vm704_vm0, %v8868_v50, %v8870_v53  ;;  %v8873_v10 = vsel %vm704_vm0, %v8870_v53, %v8872_v44  ;;  %v9272_v50 = vrot.slane %v15125_v54, 5  ;;  %v9275_v53 = vrot.slane %v15130_v13, 4 }
 0x68b   : > { %v9276_v44 = vrot.slane %v15152_v8, 5  ;;  %v9279_v54 = vrot.slane %v15134_v18, 4  ;;  %v9284_v13 = vrot.slane %v15178_v6, 5  ;;  %v9288_v18 = vrot.slane %v15183_v27, 5 }
 0x690   : > { %11749 = vmatmul.mubr.msk.bf16.gmra.mrb[36].mxu1 %vm253_vm1, %v16034_v62  ;;  %v16042_v62 = vld [vmem:[#allocation68_spill] sm:$0xff] }
 0x691   : > { %11752 = vmatprep.mubr.msk.bf16.mxu1 %vm253_vm1, %v8459_v57  ;;  %v16045_v57 = vld [vmem:[#allocation71_spill] sm:$0xff] }
 0x698   : > { %11753 = vmatmul.mubr.msk.bf16.gmra.mrb[40].mxu1 %vm253_vm1, %v8468_v38  ;;  %v8905_v38 = vsel %vm704_vm0, %v16053_v43, %v8904_v33  ;;  %v9260_v43 = vld [vmem:[#allocation2 + $0xd8] sm:$0x1f] }
 0x699   : > { %11756 = vmatprep.mubr.msk.bf16.mxu1 %vm253_vm1, %v8477_v22  ;;  %v8906_v22 = vrot.slane %v15250_v63, 4  ;;  %v9364_v49 = vshrl.u32 %v9260_v43, 16 }
 0x69b   : > { %v8907_v55 = vsel %vm704_vm0, %v8904_v33, %v8906_v22  ;;  %v9352_v33 = vrot.slane %v16021_v11, 5  ;;  %v9367_v11 = vshll.u32 %v9260_v43, 16 }
 0x69d   : > { %v9353_v45 = vor.u32 %v9352_v33, %v9351_v40 }
 0x6a0   : > { %11757 = vmatmul.mubr.msk.bf16.gmra.mrb[44].mxu1 %vm253_vm1, %v8486_v42  ;;  %v9267_v42 = vshll.u32 %v8835_v24, 16 }
 0x6a1   : > { %11762 = vmatprep.mubr.msk.bf16.mxu1 %vm253_vm1, %v8865_v5  ;;  %v8909_v5 = vsel %vm704_vm0, %v8906_v22, %v8908_v17  ;;  %v9356_v22 = vrot.slane %v15263_v9, 5 }
 0x6a2   : > { %v9269_v63 = vrot.slane %v9267_v42, 5 }
 0x6a8   : > { %11763 = vmatmul.mubr.msk.bf16.vlgmr.msra.gmra.mrb[0].mxu1 %vm253_vm1, %v8867_v58  ;;  %v9266_v58 = vrot.slane %v9264_v7, 4  ;;  %v16066_v7 = vld [vmem:[#allocation5_spill] sm:$0xff] }
 0x6a9   : > { %11811 = vmatpush3.bf16.msra.mxu1 %v9445_v25  ;;  %11766 = vmatprep.mubr.msk.bf16.mxu1 %vm253_vm1, %v8869_v60  ;;  %v8910_v25 = vrot.slane %v15479_v59, 4  ;;  %v9273_v60 = vor.u32 %v9272_v50, %v9271_v48  ;;  %v9277_v59 = vor.u32 %v9276_v44, %v9275_v53  ;;  %v9354_v42 = vsel %vm6309_vm5, %v16066_v7, %v9353_v45 }
 0x6aa   : > { %v9270_v24 = vor.u32 %v9269_v63, %v9266_v58  ;;  %v9369_v48 = vrot.slane %v9367_v11, 5  ;;  %v15641_v63 = vld [vmem:[%s15799_s4] ss:$0 sm:$0xff] }
 0x6ab   : > { %v8911_v30 = vsel %vm704_vm0, %v8908_v17, %v8910_v25  ;;  %v9278_v52 = vsel %vm6309_vm5, %v9273_v60, %v9277_v59  ;;  %v16065_v17 = vld [vmem:[#allocation85_spill] sm:$0xff] }
 0x6ac   : > { %v9274_v29 = vsel %vm6309_vm5, %v9270_v24, %v9273_v60 }
 0x6b0   : > { %11767 = vmatmul.mubr.msk.bf16.gmra.mrb[4].mxu1 %vm253_vm1, %v8871_v0  ;;  %v9280_v0 = vrot.slane %v15157_v56, 5  ;;  %v9285_v56 = vor.u32 %v9284_v13, %v9283_v21 }
 0x6b1   : > { %11770 = vmatprep.mubr.msk.bf16.mxu1 %vm253_vm1, %v8873_v10 }
 0x6b2   : > { %v9281_v10 = vor.u32 %v9280_v0, %v9279_v54 }
 0x6b4   : > { %v9282_v8 = vsel %vm6309_vm5, %v9277_v59, %v9281_v10  ;;  %v9286_v1 = vsel %vm6309_vm5, %v9281_v10, %v9285_v56 }
 0x6b8   : > { %11771 = vmatmul.mubr.msk.bf16.gmra.mrb[8].mxu1 %vm253_vm1, %v8875_v35  ;;  %v9287_v35 = vrot.slane %v15167_v23, 4  ;;  %v9296_v23 = vrot.slane %v15205_v4, 5  ;;  %v16054_v4 = vld [vmem:[#allocation79_spill] sm:$0xff] }
 0x6b9   : > { %11774 = vmatprep.mubr.msk.bf16.mxu1 %vm253_vm1, %v8877_v46 }
 0x6ba   : > { %v9289_v46 = vor.u32 %v9288_v18, %v9287_v35  ;;  %v9297_v31 = vor.u32 %v9296_v23, %v9295_v26 }
 0x6bc   : > { %v9290_v6 = vsel %vm6309_vm5, %v9285_v56, %v9289_v46 }
 0x6c0   : > { %11775 = vmatmul.mubr.msk.bf16.gmra.mrb[12].mxu1 %vm253_vm1, %v8879_v16  ;;  %v9291_v16 = vrot.slane %v15187_v47, 4  ;;  %v9300_v47 = vrot.slane %v15219_v20, 5  ;;  %v16056_v20 = vld [vmem:[#allocation46_spill] sm:$0xff] }
 0x6c1   : > { %11778 = vmatprep.mubr.msk.bf16.mxu1 %vm253_vm1, %v8881_v32 }
 0x6c2   : > { %v9293_v27 = vor.u32 %v9292_v36, %v9291_v16 }
 0x6c4   : > { %v9294_v32 = vsel %vm6309_vm5, %v9289_v46, %v9293_v27  ;;  %v9298_v14 = vsel %vm6309_vm5, %v9293_v27, %v9297_v31 }
 0x6c8   : > { %11779 = vmatmul.mubr.msk.bf16.gmra.mrb[16].mxu1 %vm253_vm1, %v16041_v2  ;;  %v9299_v2 = vrot.slane %v15209_v39, 4  ;;  %v16057_v39 = vld [vmem:[#allocation47_spill] sm:$0xff] }
 0x6c9   : > { %11782 = vmatprep.mubr.msk.bf16.mxu1 %vm253_vm1, %v16042_v62 }
 0x6ca   : > { %v9301_v62 = vor.u32 %v9300_v47, %v9299_v2 }
 0x6cc   : > { %v9302_v28 = vsel %vm6309_vm5, %v9297_v31, %v9301_v62 }
 0x6d0   : > { %11783 = vmatmul.mubr.msk.bf16.gmra.mrb[20].mxu1 %vm253_vm1, %v16043_v3  ;;  %v9306_v3 = vsel %vm6309_vm5, %v9301_v62, %v16054_v4 }
 0x6d1   : > { %11786 = vmatprep.mubr.msk.bf16.mxu1 %vm253_vm1, %v16044_v34  ;;  %v16055_v34 = vld [vmem:[#allocation80_spill] sm:$0xff] }
 0x6d8   : > { %11787 = vmatmul.mubr.msk.bf16.gmra.mrb[24].mxu1 %vm253_vm1, %v16045_v57  ;;  %v16058_v57 = vld [vmem:[#allocation3_spill] sm:$0xff] }
 0x6d9   : > { %11790 = vmatprep.mubr.msk.bf16.mxu1 %vm253_vm1, %v16046_v51  ;;  %v16059_v51 = vld [vmem:[#allocation4_spill] sm:$0xff] }
 0x6e0   : > { %11791 = vmatmul.mubr.msk.bf16.gmra.mrb[28].mxu1 %vm253_vm1, %v16047_v19  ;;  %v16060_v19 = vld [vmem:[#allocation81_spill] sm:$0xff] }
 0x6e1   : > { %11794 = vmatprep.mubr.msk.bf16.mxu1 %vm253_vm1, %v16048_v37  ;;  %v16061_v37 = vld [vmem:[#allocation82_spill] sm:$0xff] }
 0x6e8   : > { %11795 = vmatmul.mubr.msk.bf16.gmra.mrb[32].mxu1 %vm253_vm1, %v16049_v12  ;;  %v16062_v12 = vld [vmem:[#allocation83_spill] sm:$0xff] }
 0x6e9   : > { %11798 = vmatprep.mubr.msk.bf16.mxu1 %vm253_vm1, %v16050_v41  ;;  %v16063_v41 = vld [vmem:[#allocation84_spill] sm:$0xff] }
 0x6f0   : > { %11799 = vmatmul.mubr.msk.bf16.gmra.mrb[36].mxu1 %vm253_vm1, %v16051_v61  ;;  %v16064_v61 = vld [vmem:[#allocation6_spill] sm:$0xff] }
 0x6f1   : > { %11802 = vmatprep.mubr.msk.bf16.mxu1 %vm253_vm1, %v8905_v38  ;;  %v9355_v38 = vrot.slane %v15255_v15, 4  ;;  %v16067_v15 = vld [vmem:[#allocation86_spill] sm:$0xff] }
 0x6f8   : > { %11803 = vmatmul.mubr.msk.bf16.gmra.mrb[40].mxu1 %vm253_vm1, %v8907_v55  ;;  %v9357_v55 = vor.u32 %v9356_v22, %v9355_v38 }
 0x6f9   : > { %11806 = vmatprep.mubr.msk.bf16.mxu1 %vm253_vm1, %v8909_v5  ;;  %v9366_v5 = vrot.slane %v9364_v49, 4 }
 0x6fa   : > { %v9358_v50 = vsel %vm6309_vm5, %v9353_v45, %v9357_v55  ;;  %v9362_v9 = vsel %vm6309_vm5, %v9357_v55, %v16067_v15 }
 0x6fb   : > { %v9370_v25 = vor.u32 %v9369_v48, %v9366_v5 }
 0x6fd   : > { %v9371_v58 = vsel %vm6309_vm5, %v16067_v15, %v9370_v25 }
 0x700   : > { %11807 = vmatmul.mubr.msk.bf16.gmra.mrb[44].mxu1 %vm253_vm1, %v8911_v30 }
 0x701   : > { %11812 = vmatprep.mubr.msk.bf16.mxu1 %vm253_vm1, %v9274_v29 }
 0x708   : > { %11813 = vmatmul.mubr.msk.bf16.vlgmr.msra.gmra.mrb[0].mxu1 %vm253_vm1, %v9278_v52 }
 0x709   : > { %11816 = vmatprep.mubr.msk.bf16.mxu1 %vm253_vm1, %v9282_v8 }
 0x710   : > { %11817 = vmatmul.mubr.msk.bf16.gmra.mrb[4].mxu1 %vm253_vm1, %v9286_v1 }
 0x711   : > { %11820 = vmatprep.mubr.msk.bf16.mxu1 %vm253_vm1, %v9290_v6 }
 0x718   : > { %11821 = vmatmul.mubr.msk.bf16.gmra.mrb[8].mxu1 %vm253_vm1, %v9294_v32 }
 0x719   : > { %11824 = vmatprep.mubr.msk.bf16.mxu1 %vm253_vm1, %v9298_v14 }
 0x720   : > { %11825 = vmatmul.mubr.msk.bf16.gmra.mrb[12].mxu1 %vm253_vm1, %v9302_v28 }
 0x721   : > { %11828 = vmatprep.mubr.msk.bf16.mxu1 %vm253_vm1, %v9306_v3 }
 0x728   : > { %11829 = vmatmul.mubr.msk.bf16.gmra.mrb[16].mxu1 %vm253_vm1, %v16055_v34 }
 0x729   : > { %11832 = vmatprep.mubr.msk.bf16.mxu1 %vm253_vm1, %v16056_v20 }
 0x730   : > { %11833 = vmatmul.mubr.msk.bf16.gmra.mrb[20].mxu1 %vm253_vm1, %v16057_v39 }
 0x731   : > { %11836 = vmatprep.mubr.msk.bf16.mxu1 %vm253_vm1, %v16058_v57 }
 0x738   : > { %11837 = vmatmul.mubr.msk.bf16.gmra.mrb[24].mxu1 %vm253_vm1, %v16059_v51 }
 0x739   : > { %11840 = vmatprep.mubr.msk.bf16.mxu1 %vm253_vm1, %v16060_v19 }
 0x740   : > { %11841 = vmatmul.mubr.msk.bf16.gmra.mrb[28].mxu1 %vm253_vm1, %v16061_v37 }
 0x741   : > { %11844 = vmatprep.mubr.msk.bf16.mxu1 %vm253_vm1, %v16062_v12 }
 0x748   : > { %11845 = vmatmul.mubr.msk.bf16.gmra.mrb[32].mxu1 %vm253_vm1, %v16063_v41 }
 0x749   : > { %11848 = vmatprep.mubr.msk.bf16.mxu1 %vm253_vm1, %v16064_v61 }
 0x750   : > { %11849 = vmatmul.mubr.msk.bf16.gmra.mrb[36].mxu1 %vm253_vm1, %v16065_v17 }
 0x751   : > { %11852 = vmatprep.mubr.msk.bf16.mxu1 %vm253_vm1, %v9354_v42 }
 0x758   : > { %11853 = vmatmul.mubr.msk.bf16.gmra.mrb[40].mxu1 %vm253_vm1, %v9358_v50 }
 0x759   : > { %11856 = vmatprep.mubr.msk.bf16.mxu1 %vm253_vm1, %v9362_v9 }
 0x760   : > { %11857 = vmatmul.mubr.msk.bf16.gmra.mrb[44].mxu1 %vm253_vm1, %v9371_v58 }
 0x7db   : > { %v11814_v60 = vpop.f32.mrb[0].mxu1 }
 0x7dc   : > { %v9728_v30 = vadd.f32 %v11814_v60, %v15641_v63  ;;  %v9481_v24 = vpop.f32.mrb[1].mxu1 }
 0x7dd   : > { %v9726_v53 = vadd.f32 %v15641_v63, %v9481_v24  ;;  %v11815_v44 = vpop.f32.mrb[2].mxu1 }
 0x7de   : > { %v9776_v29 = vmax.f32 %v9728_v30, 0.0  ;;  %v9729_v54 = vadd.f32 %v11815_v44, %v15641_v63  ;;  %v9484_v0 = vpop.f32.mrb[3].mxu1 }
 0x7df   : > { %v9774_v59 = vmax.f32 %v9726_v53, 0.0  ;;  %v9727_v10 = vadd.f32 %v15641_v63, %v9484_v0 }
 0x7e0   : > { %9824 = vst.msk [vmem:[%s15647_s14 + $0x10] sm:$0xff] %vm253_vm1, %v9776_v29  ;;  %v9777_v52 = vmax.f32 %v9729_v54, 0.0 }
 0x7e1   : > { %9822 = vst.msk [vmem:[%s15647_s14] sm:$0xff] %vm253_vm1, %v9774_v59  ;;  %v9775_v21 = vmax.f32 %v9727_v10, 0.0 }
 0x7e2   : > { %9825 = vst.msk [vmem:[%s15647_s14 + $0x18] sm:$0xff] %vm253_vm1, %v9777_v52 }
 0x7e3   : > { %9823 = vst.msk [vmem:[%s15647_s14 + $0x8] sm:$0xff] %vm253_vm1, %v9775_v21  ;;  %v11818_v13 = vpop.f32.mrb[4].mxu1 }
 0x7e4   : > { %v9732_v8 = vadd.f32 %v11818_v13, %v15641_v63  ;;  %v9497_v35 = vpop.f32.mrb[5].mxu1 }
 0x7e5   : > { %v9730_v18 = vadd.f32 %v15641_v63, %v9497_v35  ;;  %v11819_v56 = vpop.f32.mrb[6].mxu1 }
 0x7e6   : > { %v9780_v46 = vmax.f32 %v9732_v8, 0.0  ;;  %v9733_v1 = vadd.f32 %v11819_v56, %v15641_v63  ;;  %v9500_v16 = vpop.f32.mrb[7].mxu1 }
 0x7e7   : > { %v9778_v36 = vmax.f32 %v9730_v18, 0.0  ;;  %v9731_v6 = vadd.f32 %v15641_v63, %v9500_v16 }
 0x7e8   : > { %9828 = vst.msk [vmem:[%s15647_s14 + $0x30] sm:$0xff] %vm253_vm1, %v9780_v46  ;;  %v9781_v26 = vmax.f32 %v9733_v1, 0.0 }
 0x7e9   : > { %9826 = vst.msk [vmem:[%s15647_s14 + $0x20] sm:$0xff] %vm253_vm1, %v9778_v36  ;;  %v9779_v23 = vmax.f32 %v9731_v6, 0.0 }
 0x7ea   : > { %9829 = vst.msk [vmem:[%s15647_s14 + $0x38] sm:$0xff] %vm253_vm1, %v9781_v26 }
 0x7eb   : > { %9827 = vst.msk [vmem:[%s15647_s14 + $0x28] sm:$0xff] %vm253_vm1, %v9779_v23  ;;  %v11822_v27 = vpop.f32.mrb[8].mxu1 }
 0x7ec   : > { %v9736_v31 = vadd.f32 %v11822_v27, %v15641_v63  ;;  %v9513_v32 = vpop.f32.mrb[9].mxu1 }
 0x7ed   : > { %v9734_v2 = vadd.f32 %v15641_v63, %v9513_v32  ;;  %v11823_v47 = vpop.f32.mrb[10].mxu1 }
 0x7ee   : > { %v9784_v14 = vmax.f32 %v9736_v31, 0.0  ;;  %v9737_v62 = vadd.f32 %v11823_v47, %v15641_v63  ;;  %v9516_v28 = vpop.f32.mrb[11].mxu1 }
 0x7ef   : > { %v9782_v4 = vmax.f32 %v9734_v2, 0.0  ;;  %v9735_v3 = vadd.f32 %v15641_v63, %v9516_v28 }
 0x7f0   : > { %9832 = vst.msk [vmem:[%s15647_s14 + $0x50] sm:$0xff] %vm253_vm1, %v9784_v14  ;;  %v9785_v34 = vmax.f32 %v9737_v62, 0.0 }
 0x7f1   : > { %9830 = vst.msk [vmem:[%s15647_s14 + $0x40] sm:$0xff] %vm253_vm1, %v9782_v4  ;;  %v9783_v20 = vmax.f32 %v9735_v3, 0.0 }
 0x7f2   : > { %9833 = vst.msk [vmem:[%s15647_s14 + $0x58] sm:$0xff] %vm253_vm1, %v9785_v34 }
 0x7f3   : > { %9831 = vst.msk [vmem:[%s15647_s14 + $0x48] sm:$0xff] %vm253_vm1, %v9783_v20  ;;  %v11826_v39 = vpop.f32.mrb[12].mxu1 }
 0x7f4   : > { %v9740_v57 = vadd.f32 %v11826_v39, %v15641_v63  ;;  %v9529_v51 = vpop.f32.mrb[13].mxu1 }
 0x7f5   : > { %v9738_v19 = vadd.f32 %v15641_v63, %v9529_v51  ;;  %v11827_v37 = vpop.f32.mrb[14].mxu1 }
 0x7f6   : > { %v9788_v12 = vmax.f32 %v9740_v57, 0.0  ;;  %v9741_v41 = vadd.f32 %v11827_v37, %v15641_v63  ;;  %v9532_v40 = vpop.f32.mrb[15].mxu1 }
 0x7f7   : > { %v9786_v33 = vmax.f32 %v9738_v19, 0.0  ;;  %v9739_v61 = vadd.f32 %v15641_v63, %v9532_v40 }
 0x7f8   : > { %9836 = vst.msk [vmem:[%s15647_s14 + $0x70] sm:$0xff] %vm253_vm1, %v9788_v12  ;;  %v9789_v45 = vmax.f32 %v9741_v41, 0.0 }
 0x7f9   : > { %9834 = vst.msk [vmem:[%s15647_s14 + $0x60] sm:$0xff] %vm253_vm1, %v9786_v33  ;;  %v9787_v43 = vmax.f32 %v9739_v61, 0.0 }
 0x7fa   : > { %9837 = vst.msk [vmem:[%s15647_s14 + $0x78] sm:$0xff] %vm253_vm1, %v9789_v45 }
 0x7fb   : > { %9835 = vst.msk [vmem:[%s15647_s14 + $0x68] sm:$0xff] %vm253_vm1, %v9787_v43  ;;  %v11830_v38 = vpop.f32.mrb[16].mxu1 }
 0x7fc   : > { %v9744_v22 = vadd.f32 %v11830_v38, %v15641_v63  ;;  %v9545_v17 = vpop.f32.mrb[17].mxu1 }
 0x7fd   : > { %v9742_v7 = vadd.f32 %v15641_v63, %v9545_v17  ;;  %v11831_v42 = vpop.f32.mrb[18].mxu1 }
 0x7fe   : > { %v9792_v49 = vmax.f32 %v9744_v22, 0.0  ;;  %v9745_v11 = vadd.f32 %v11831_v42, %v15641_v63  ;;  %v9548_v55 = vpop.f32.mrb[19].mxu1 }
 0x7ff   : > { %v9790_v5 = vmax.f32 %v9742_v7, 0.0  ;;  %v9743_v48 = vadd.f32 %v15641_v63, %v9548_v55 }
 0x800   : > { %9840 = vst.msk [vmem:[%s15647_s14 + $0x90] sm:$0xff] %vm253_vm1, %v9792_v49  ;;  %v9793_v50 = vmax.f32 %v9745_v11, 0.0 }
 0x801   : > { %9838 = vst.msk [vmem:[%s15647_s14 + $0x80] sm:$0xff] %vm253_vm1, %v9790_v5  ;;  %v9791_v15 = vmax.f32 %v9743_v48, 0.0 }
 0x802   : > { %9841 = vst.msk [vmem:[%s15647_s14 + $0x98] sm:$0xff] %vm253_vm1, %v9793_v50 }
 0x803   : > { %9839 = vst.msk [vmem:[%s15647_s14 + $0x88] sm:$0xff] %vm253_vm1, %v9791_v15  ;;  %v11834_v9 = vpop.f32.mrb[20].mxu1 }
 0x804   : > { %v9748_v25 = vadd.f32 %v11834_v9, %v15641_v63  ;;  %v9561_v58 = vpop.f32.mrb[21].mxu1 }
 0x805   : > { %v9746_v60 = vadd.f32 %v15641_v63, %v9561_v58  ;;  %v11835_v30 = vpop.f32.mrb[22].mxu1 }
 0x806   : > { %v9796_v24 = vmax.f32 %v9748_v25, 0.0  ;;  %v9749_v53 = vadd.f32 %v11835_v30, %v15641_v63  ;;  %v9564_v44 = vpop.f32.mrb[23].mxu1 }
 0x807   : > { %v9794_v29 = vmax.f32 %v9746_v60, 0.0  ;;  %v9747_v54 = vadd.f32 %v15641_v63, %v9564_v44 }
 0x808   : > { %9844 = vst.msk [vmem:[%s15647_s14 + $0xb0] sm:$0xff] %vm253_vm1, %v9796_v24  ;;  %v9797_v0 = vmax.f32 %v9749_v53, 0.0 }
 0x809   : > { %9842 = vst.msk [vmem:[%s15647_s14 + $0xa0] sm:$0xff] %vm253_vm1, %v9794_v29  ;;  %v9795_v59 = vmax.f32 %v9747_v54, 0.0 }
 0x80a   : > { %9845 = vst.msk [vmem:[%s15647_s14 + $0xb8] sm:$0xff] %vm253_vm1, %v9797_v0 }
 0x80b   : > { %9843 = vst.msk [vmem:[%s15647_s14 + $0xa8] sm:$0xff] %vm253_vm1, %v9795_v59  ;;  %v11838_v10 = vpop.f32.mrb[24].mxu1 }
 0x80c   : > { %v9752_v52 = vadd.f32 %v11838_v10, %v15641_v63  ;;  %v9577_v21 = vpop.f32.mrb[25].mxu1 }
 0x80d   : > { %v9750_v13 = vadd.f32 %v15641_v63, %v9577_v21  ;;  %v11839_v8 = vpop.f32.mrb[26].mxu1 }
 0x80e   : > { %v9800_v35 = vmax.f32 %v9752_v52, 0.0  ;;  %v9753_v18 = vadd.f32 %v11839_v8, %v15641_v63  ;;  %v9580_v56 = vpop.f32.mrb[27].mxu1 }
 0x80f   : > { %v9798_v46 = vmax.f32 %v9750_v13, 0.0  ;;  %v9751_v1 = vadd.f32 %v15641_v63, %v9580_v56 }
 0x810   : > { %9848 = vst.msk [vmem:[%s15647_s14 + $0xd0] sm:$0xff] %vm253_vm1, %v9800_v35  ;;  %v9801_v16 = vmax.f32 %v9753_v18, 0.0 }
 0x811   : > { %9846 = vst.msk [vmem:[%s15647_s14 + $0xc0] sm:$0xff] %vm253_vm1, %v9798_v46  ;;  %v9799_v36 = vmax.f32 %v9751_v1, 0.0 }
 0x812   : > { %9849 = vst.msk [vmem:[%s15647_s14 + $0xd8] sm:$0xff] %vm253_vm1, %v9801_v16 }
 0x813   : > { %9847 = vst.msk [vmem:[%s15647_s14 + $0xc8] sm:$0xff] %vm253_vm1, %v9799_v36  ;;  %v11842_v6 = vpop.f32.mrb[28].mxu1 }
 0x814   : > { %v9756_v26 = vadd.f32 %v11842_v6, %v15641_v63  ;;  %v9593_v23 = vpop.f32.mrb[29].mxu1 }
 0x815   : > { %v9754_v27 = vadd.f32 %v15641_v63, %v9593_v23  ;;  %v11843_v31 = vpop.f32.mrb[30].mxu1 }
 0x816   : > { %v9804_v32 = vmax.f32 %v9756_v26, 0.0  ;;  %v9757_v2 = vadd.f32 %v11843_v31, %v15641_v63  ;;  %v9596_v47 = vpop.f32.mrb[31].mxu1 }
 0x817   : > { %v9802_v14 = vmax.f32 %v9754_v27, 0.0  ;;  %v9755_v62 = vadd.f32 %v15641_v63, %v9596_v47 }
 0x818   : > { %9852 = vst.msk [vmem:[%s15647_s14 + $0xf0] sm:$0xff] %vm253_vm1, %v9804_v32  ;;  %v9805_v28 = vmax.f32 %v9757_v2, 0.0 }
 0x819   : > { %9850 = vst.msk [vmem:[%s15647_s14 + $0xe0] sm:$0xff] %vm253_vm1, %v9802_v14  ;;  %v9803_v4 = vmax.f32 %v9755_v62, 0.0 }
 0x81a   : > { %9853 = vst.msk [vmem:[%s15647_s14 + $0xf8] sm:$0xff] %vm253_vm1, %v9805_v28 }
 0x81b   : > { %9851 = vst.msk [vmem:[%s15647_s14 + $0xe8] sm:$0xff] %vm253_vm1, %v9803_v4  ;;  %v11846_v3 = vpop.f32.mrb[32].mxu1 }
 0x81c   : > { %v9760_v34 = vadd.f32 %v11846_v3, %v15641_v63  ;;  %v9609_v20 = vpop.f32.mrb[33].mxu1 }
 0x81d   : > { %v9758_v39 = vadd.f32 %v15641_v63, %v9609_v20  ;;  %v11847_v57 = vpop.f32.mrb[34].mxu1 }
 0x81e   : > { %v9808_v51 = vmax.f32 %v9760_v34, 0.0  ;;  %v9761_v19 = vadd.f32 %v11847_v57, %v15641_v63  ;;  %v9612_v37 = vpop.f32.mrb[35].mxu1 }
 0x81f   : > { %v9806_v12 = vmax.f32 %v9758_v39, 0.0  ;;  %v9759_v41 = vadd.f32 %v15641_v63, %v9612_v37 }
 0x820   : > { %9856 = vst.msk [vmem:[%s15647_s14 + $0x110] sm:$0xff] %vm253_vm1, %v9808_v51  ;;  %v9809_v40 = vmax.f32 %v9761_v19, 0.0 }
 0x821   : > { %9854 = vst.msk [vmem:[%s15647_s14 + $0x100] sm:$0xff] %vm253_vm1, %v9806_v12  ;;  %v9807_v33 = vmax.f32 %v9759_v41, 0.0 }
 0x822   : > { %9857 = vst.msk [vmem:[%s15647_s14 + $0x118] sm:$0xff] %vm253_vm1, %v9809_v40 }
 0x823   : > { %9855 = vst.msk [vmem:[%s15647_s14 + $0x108] sm:$0xff] %vm253_vm1, %v9807_v33  ;;  %v11850_v61 = vpop.f32.mrb[36].mxu1 }
 0x824   : > { %v9764_v45 = vadd.f32 %v11850_v61, %v15641_v63  ;;  %v9625_v43 = vpop.f32.mrb[37].mxu1 }
 0x825   : > { %v9762_v38 = vadd.f32 %v15641_v63, %v9625_v43  ;;  %v11851_v22 = vpop.f32.mrb[38].mxu1 }
 0x826   : > { %v9812_v17 = vmax.f32 %v9764_v45, 0.0  ;;  %v9765_v7 = vadd.f32 %v11851_v22, %v15641_v63  ;;  %v9628_v42 = vpop.f32.mrb[39].mxu1 }
 0x827   : > { %v9810_v49 = vmax.f32 %v9762_v38, 0.0  ;;  %v9763_v11 = vadd.f32 %v15641_v63, %v9628_v42 }
 0x828   : > { %9860 = vst.msk [vmem:[%s15647_s14 + $0x130] sm:$0xff] %vm253_vm1, %v9812_v17  ;;  %v9813_v55 = vmax.f32 %v9765_v7, 0.0 }
 0x829   : > { %9858 = vst.msk [vmem:[%s15647_s14 + $0x120] sm:$0xff] %vm253_vm1, %v9810_v49  ;;  %v9811_v5 = vmax.f32 %v9763_v11, 0.0 }
 0x82a   : > { %9861 = vst.msk [vmem:[%s15647_s14 + $0x138] sm:$0xff] %vm253_vm1, %v9813_v55 }
 0x82b   : > { %9859 = vst.msk [vmem:[%s15647_s14 + $0x128] sm:$0xff] %vm253_vm1, %v9811_v5  ;;  %v11854_v48 = vpop.f32.mrb[40].mxu1 }
 0x82c   : > { %v9768_v50 = vadd.f32 %v11854_v48, %v15641_v63  ;;  %v9641_v15 = vpop.f32.mrb[41].mxu1 }
 0x82d   : > { %v9766_v9 = vadd.f32 %v15641_v63, %v9641_v15  ;;  %v11855_v25 = vpop.f32.mrb[42].mxu1 }
 0x82e   : > { %v9816_v58 = vmax.f32 %v9768_v50, 0.0  ;;  %v9769_v60 = vadd.f32 %v11855_v25, %v15641_v63  ;;  %v9644_v30 = vpop.f32.mrb[43].mxu1 }
 0x82f   : > { %v9814_v24 = vmax.f32 %v9766_v9, 0.0  ;;  %v9767_v53 = vadd.f32 %v15641_v63, %v9644_v30 }
 0x830   : > { %9864 = vst.msk [vmem:[%s15647_s14 + $0x150] sm:$0xff] %vm253_vm1, %v9816_v58  ;;  %v9817_v44 = vmax.f32 %v9769_v60, 0.0 }
 0x831   : > { %9862 = vst.msk [vmem:[%s15647_s14 + $0x140] sm:$0xff] %vm253_vm1, %v9814_v24  ;;  %v9815_v29 = vmax.f32 %v9767_v53, 0.0 }
 0x832   : > { %9865 = vst.msk [vmem:[%s15647_s14 + $0x158] sm:$0xff] %vm253_vm1, %v9817_v44 }
 0x833   : > { %9863 = vst.msk [vmem:[%s15647_s14 + $0x148] sm:$0xff] %vm253_vm1, %v9815_v29  ;;  %v11858_v54 = vpop.f32.mrb[44].mxu1 }
 0x834   : > { %v9772_v0 = vadd.f32 %v11858_v54, %v15641_v63  ;;  %v9657_v59 = vpop.f32.mrb[45].mxu1 }
 0x835   : > { %v9770_v10 = vadd.f32 %v15641_v63, %v9657_v59  ;;  %v11859_v52 = vpop.f32.mrb[46].mxu1 }
 0x836   : > { %v9820_v21 = vmax.f32 %v9772_v0, 0.0  ;;  %v9773_v13 = vadd.f32 %v11859_v52, %v15641_v63  ;;  %v9660_v8 = vpop.f32.mrb[47].mxu1 }
 0x837   : > { %v9818_v35 = vmax.f32 %v9770_v10, 0.0  ;;  %v9771_v18 = vadd.f32 %v15641_v63, %v9660_v8 }
 0x838   : > { %9868 = vst.msk [vmem:[%s15647_s14 + $0x170] sm:$0xff] %vm253_vm1, %v9820_v21  ;;  %v9821_v56 = vmax.f32 %v9773_v13, 0.0 }
 0x839   : > { %9866 = vst.msk [vmem:[%s15647_s14 + $0x160] sm:$0xff] %vm253_vm1, %v9818_v35  ;;  %v9819_v46 = vmax.f32 %v9771_v18, 0.0 }
 0x83a   : > { %9869 = vst.msk [vmem:[%s15647_s14 + $0x178] sm:$0xff] %vm253_vm1, %v9821_v56 }
 0x83b   : > { %9867 = vst.msk [vmem:[%s15647_s14 + $0x168] sm:$0xff] %vm253_vm1, %v9819_v46 }
 0x83c PF: > { %s16_s21 = sadd.s32 1, %s12803_s21  }
 0x83d   : > { %p13_p4 = scmp.ge.s32.totalorder %s16_s21, 4  }
 0x83f   :  { %15 = sbr.rel (!%p13_p4) target bundleno = 1 (0x1), region = 90 }

</bundles_post_ra>
